<compile_context>
chip_gen: v6e
topology: v6e:2x2x1
jax: 0.10.0
libtpu: 0.0.40
codegen_flags: <defaults>
</compile_context>

<pallas_src>
import functools

import jax
import jax.numpy as jnp
import numpy as np
from jax import lax
from jax.experimental import pallas as pl
from jax.experimental.pallas import tpu as pltpu


def _round_up(v, m):
    return ((v + m - 1) // m) * m


# -----------------------------------------------------------------------------
# Fused Pallas kernel (built per static (T, B_pad, H, num_layers))
# -----------------------------------------------------------------------------
def _make_fused_kernel(T, B, H, num_layers):
    """B is the *padded*, sublane-aligned batch (multiple of 8)."""
    G = 4 * H      # per-direction gate width (= 128 lanes for H=32)
    GG = 2 * G     # fused fwd+bwd gate width (8H)

    def kernel(*refs):
        idx = 0
        seq_ref = refs[idx]; idx += 1                       # (T*B, In)  bf16
        layer_refs = []
        for _ in range(num_layers):
            layer_refs.append(refs[idx:idx + 3]); idx += 3  # w_ih, whh, b
        fc_w_ref = refs[idx]; idx += 1                      # (2H, C_pad) f32
        fc_b_ref = refs[idx]; idx += 1                      # (1, C_pad)  f32
        out_ref = refs[idx]; idx += 1                       # (T*B, C_pad)
        hbuf_ref = refs[idx]; idx += 1                      # (T*B, 2H) scratch
        xp_ref = refs[idx]; idx += 1                        # (T*B, 8H) scratch

        for l, (w_ih_ref, whh_ref, b_ref) in enumerate(layer_refs):
            # --- Hoisted, time-parallel input projection for BOTH directions
            #     and ALL T steps in one MXU call (bf16 operands on layer 0,
            #     f32 accumulation).  Gate cols: [i|f|o|g]_fwd | [i|f|o|g]_bwd
            if l == 0:
                xp = jnp.dot(seq_ref[...], w_ih_ref[...],
                             preferred_element_type=jnp.float32)
            else:
                xp = jnp.dot(hbuf_ref[...], w_ih_ref[...],
                             preferred_element_type=jnp.float32)
            xp_ref[...] = xp + b_ref[...]       # bias broadcast hoisted

            whh = whh_ref[...]                  # (2H, 8H) block-diag fwd/bwd

            h_f = jnp.zeros((B, H), jnp.float32)
            c_f = jnp.zeros((B, H), jnp.float32)
            h_b = jnp.zeros((B, H), jnp.float32)
            c_b = jnp.zeros((B, H), jnp.float32)

            # --- Recurrence: ONE fused (B,2H)@(2H,8H) dot per step covering
            #     both directions; backward walks reversed time in place.
            #     Fully unrolled (static T=8) -> only static slices.
            for t in range(T):
                tr = T - 1 - t
                h_cat = jnp.concatenate([h_f, h_b], axis=1)         # (B, 2H)
                rec = jnp.dot(h_cat, whh,
                              preferred_element_type=jnp.float32)   # (B, 8H)
                # fwd gates use time t's projection, bwd use time tr's; with
                # H=32 both column slices are 128-lane (vreg) aligned.
                g_fwd = xp_ref[t * B:(t + 1) * B, 0:G] + rec[:, 0:G]
                g_bwd = xp_ref[tr * B:(tr + 1) * B, G:GG] + rec[:, G:GG]

                # sigmoid only on the [i|f|o] lanes, tanh only on g lanes.
                sig_f = jax.nn.sigmoid(g_fwd[:, 0:3 * H])
                gg_f = jnp.tanh(g_fwd[:, 3 * H:4 * H])
                sig_b = jax.nn.sigmoid(g_bwd[:, 0:3 * H])
                gg_b = jnp.tanh(g_bwd[:, 3 * H:4 * H])

                c_f = sig_f[:, H:2 * H] * c_f + sig_f[:, 0:H] * gg_f
                h_f = sig_f[:, 2 * H:3 * H] * jnp.tanh(c_f)
                c_b = sig_b[:, H:2 * H] * c_b + sig_b[:, 0:H] * gg_b
                h_b = sig_b[:, 2 * H:3 * H] * jnp.tanh(c_b)

                # hbuf column layout [fwd | bwd] == next layer's (and the FC's)
                # expected input layout -> no concatenation between layers.
                hbuf_ref[t * B:(t + 1) * B, 0:H] = h_f
                hbuf_ref[tr * B:(tr + 1) * B, H:2 * H] = h_b

        # --- Fused FC + log_softmax epilogue, lane-dense C_pad=128 output.
        #     Padded logit lanes carry a -1e30 bias -> exp underflows to 0 and
        #     they never win the max, so normalization over real classes is
        #     exact.
        logits = (jnp.dot(hbuf_ref[...], fc_w_ref[...],
                          preferred_element_type=jnp.float32) + fc_b_ref[...])
        m = jnp.max(logits, axis=-1, keepdims=True)
        shifted = logits - m
        lse = jnp.log(jnp.sum(jnp.exp(shifted), axis=-1, keepdims=True))
        out_ref[...] = (shifted - lse).astype(out_ref.dtype)

    return kernel


# -----------------------------------------------------------------------------
# Wrappers
# -----------------------------------------------------------------------------
def cnn_to_rnn(x, fixed_height, num_pooling_layers=4):
    """NCHW feature map -> (W, B, C*H) time-major sequence (pure reshape glue)."""
    batch, channels, height, width = x.shape
    expected_height = fixed_height // (2 ** num_pooling_layers)
    assert height == expected_height, (
        f"Height mismatch: Expected {expected_height}, got {height}")
    x = jnp.transpose(x, (3, 0, 1, 2))                    # (W, B, C, H)
    return x.reshape(width, batch, channels * height)     # (W, B, C*H)


def ocr_model_forward(x, packed, fixed_height, hidden, num_classes):
    seq = cnn_to_rnn(x, fixed_height)                     # (T, B, In)
    T, B, In = seq.shape
    H = hidden
    num_layers = len(packed["lstm"])
    C_pad = packed["fc_w"].shape[-1]

    # Sublane-align the batch: pad B -> multiple of 8 so every per-step row
    # block / state tile is a full vreg row group (padded rows are independent
    # junk and get sliced off; LSTM rows never mix across the batch).
    B_pad = max(8, _round_up(B, 8))
    seq_p = jnp.zeros((T, B_pad, In), jnp.float32).at[:, :B, :].set(seq)
    # bf16 MXU operands for the big layer-0 projection (f32 accumulation).
    seq_rows = seq_p.reshape(T * B_pad, In).astype(jnp.bfloat16)

    kernel = _make_fused_kernel(T, B_pad, H, num_layers)
    inputs = [seq_rows]
    for p in packed["lstm"]:
        inputs += [p["w_ih"], p["whh"], p["b"]]
    inputs += [packed["fc_w"], packed["fc_b"]]

    out = pl.pallas_call(
        kernel,
        out_shape=jax.ShapeDtypeStruct((T * B_pad, C_pad), jnp.float32),
        scratch_shapes=[
            pltpu.VMEM((T * B_pad, 2 * H), jnp.float32),   # [fwd|bwd] hiddens
            pltpu.VMEM((T * B_pad, 8 * H), jnp.float32),   # per-layer x-proj
        ],
    )(*inputs)
    return out.reshape(T, B_pad, C_pad)[:, :B, :num_classes]


# -----------------------------------------------------------------------------
# Parameter init (raw PyTorch layout) and kernel-side packing
# -----------------------------------------------------------------------------
def init_params(key, input_size, hidden, num_layers, num_classes):
    """PyTorch-style uniform(-1/sqrt(H), 1/sqrt(H)); raw nn.LSTM/Linear layout."""
    bound = 1.0 / np.sqrt(hidden)

    def u(k, shape):
        return jax.random.uniform(k, shape, jnp.float32, -bound, bound)

    layers = []
    for l in range(num_layers):
        in_l = input_size if l == 0 else 2 * hidden
        key, k1, k2, k3, k4, k5, k6, k7, k8 = jax.random.split(key, 9)
        layers.append({
            "wih_f": u(k1, (4 * hidden, in_l)),
            "whh_f": u(k2, (4 * hidden, hidden)),
            "bih_f": u(k3, (4 * hidden,)),
            "bhh_f": u(k4, (4 * hidden,)),
            "wih_r": u(k5, (4 * hidden, in_l)),
            "whh_r": u(k6, (4 * hidden, hidden)),
            "bih_r": u(k7, (4 * hidden,)),
            "bhh_r": u(k8, (4 * hidden,)),
        })
    key, kw, kb = jax.random.split(key, 3)
    fcb = 1.0 / np.sqrt(2 * hidden)
    fc_w = jax.random.uniform(kw, (num_classes, 2 * hidden), jnp.float32,
                              -fcb, fcb)
    fc_b = jax.random.uniform(kb, (num_classes,), jnp.float32, -fcb, fcb)
    return {"lstm": layers, "fc_w": fc_w, "fc_b": fc_b}


def _reorder_gates(w_t, H):
    """PyTorch gate column order [i|f|g|o] -> kernel order [i|f|o|g]."""
    return jnp.concatenate(
        [w_t[..., 0:2 * H], w_t[..., 3 * H:4 * H], w_t[..., 2 * H:3 * H]],
        axis=-1)


def pack_params(raw, hidden, num_classes):
    """Pack raw weights for the fused kernel.

    w_ih : (In_l, 8H)  = [Wih_f^T | Wih_r^T]  (gate cols [i|f|o|g] per dir,
                          bf16 for layer 0)
    whh  : (2H, 8H)    block-diagonal  [[Whh_f^T, 0], [0, Whh_r^T]]
    b    : (1, 8H)     = [bih_f+bhh_f | bih_r+bhh_r]  (same gate order)
    fc_w : (2H, 128)   fc weight^T, zero-padded classes
    fc_b : (1, 128)    fc bias, padded classes = -1e30 (masked out of softmax)
    """
    H = hidden
    layers = []
    for l, p in enumerate(raw["lstm"]):
        w_ih = jnp.concatenate([_reorder_gates(p["wih_f"].T, H),
                                _reorder_gates(p["wih_r"].T, H)], axis=1)
        if l == 0:
            w_ih = w_ih.astype(jnp.bfloat16)   # bf16 MXU operands, f32 acc
        z = jnp.zeros((H, 4 * H), jnp.float32)
        whh = jnp.concatenate([
            jnp.concatenate([_reorder_gates(p["whh_f"].T, H), z], axis=1),
            jnp.concatenate([z, _reorder_gates(p["whh_r"].T, H)], axis=1),
        ], axis=0)
        b_f = _reorder_gates((p["bih_f"] + p["bhh_f"])[None, :], H)
        b_r = _reorder_gates((p["bih_r"] + p["bhh_r"])[None, :], H)
        layers.append({"w_ih": w_ih, "whh": whh,
                       "b": jnp.concatenate([b_f, b_r], axis=1)})

    C = num_classes
    C_pad = max(128, _round_up(C, 128))
    fc_w = jnp.zeros((2 * H, C_pad), jnp.float32).at[:, :C].set(raw["fc_w"].T)
    fc_b = jnp.full((1, C_pad), -1e30, jnp.float32).at[0, :C].set(raw["fc_b"])
    return {"lstm": layers, "fc_w": fc_w, "fc_b": fc_b}


# -----------------------------------------------------------------------------
# Pure-JAX reference (verification only; mirrors the kernel's bf16 layer-0
# projection so the tolerance check stays tight)
# -----------------------------------------------------------------------------
def _ref_lstm_dir(xseq, wih, whh, bih, bhh, hidden, bf16_input):
    T, B, In = xseq.shape
    wih_t, whh_t = wih.T, whh.T
    b = (bih + bhh)[None, :]
    if bf16_input:
        xp = jnp.dot(xseq.reshape(T * B, In).astype(jnp.bfloat16),
                     wih_t.astype(jnp.bfloat16),
                     preferred_element_type=jnp.float32)
    else:
        xp = jnp.dot(xseq.reshape(T * B, In), wih_t,
                     preferred_element_type=jnp.float32)
    xp = xp.reshape(T, B, 4 * hidden) + b

    def step(carry, xp_t):
        h, c = carry
        gates = xp_t + h @ whh_t
        i = jax.nn.sigmoid(gates[:, 0:hidden])
        f = jax.nn.sigmoid(gates[:, hidden:2 * hidden])
        g = jnp.tanh(gates[:, 2 * hidden:3 * hidden])
        o = jax.nn.sigmoid(gates[:, 3 * hidden:4 * hidden])
        c = f * c + i * g
        h = o * jnp.tanh(c)
        return (h, c), h

    init = (jnp.zeros((B, hidden), jnp.float32),
            jnp.zeros((B, hidden), jnp.float32))
    _, hs = lax.scan(step, init, xp)
    return hs


def ref_forward(x, raw, fixed_height, hidden):
    seq = cnn_to_rnn(x, fixed_height)
    h = seq
    for l, p in enumerate(raw["lstm"]):
        bf16 = (l == 0)
        fwd = _ref_lstm_dir(h, p["wih_f"], p["whh_f"], p["bih_f"], p["bhh_f"],
                            hidden, bf16)
        bwd = _ref_lstm_dir(h[::-1], p["wih_r"], p["whh_r"], p["bih_r"],
                            p["bhh_r"], hidden, bf16)[::-1]
        h = jnp.concatenate([fwd, bwd], axis=-1)
    logits = h @ raw["fc_w"].T + raw["fc_b"][None, None, :]
    return jax.nn.log_softmax(logits, axis=2)


# -----------------------------------------------------------------------------
if __name__ == "__main__":
    # Shapes consistent with the module:
    #   fixed_height=16 -> CNN output height = 16 // 2**4 = 1
    #   CNN output channels = 512 (hard-coded in OCRModel) -> input_size = 512
    fixed_height = 16
    batch = 2
    width = 8                      # sequence length T
    cnn_channels = 512
    hidden = 32
    num_layers = 2
    num_classes = 16

    key = jax.random.PRNGKey(0)
    key, kx = jax.random.split(key)
    # CNN feature map (what CNNFeatureExtractor would produce), NCHW.
    x = jax.random.normal(
        kx, (batch, cnn_channels, fixed_height // (2 ** 4), width), jnp.float32)

    raw = init_params(key, cnn_channels * (fixed_height // (2 ** 4)),
                      hidden, num_layers, num_classes)
    packed = pack_params(raw, hidden, num_classes)

    fwd_fn = jax.jit(functools.partial(
        ocr_model_forward, fixed_height=fixed_height, hidden=hidden,
        num_classes=num_classes))
    out = jax.block_until_ready(fwd_fn(x, packed))

    assert out.shape == (width, batch, num_classes), out.shape

    ref = jax.block_until_ready(ref_forward(x, raw, fixed_height, hidden))
    np.testing.assert_allclose(np.asarray(out), np.asarray(ref),
                               rtol=2e-3, atol=2e-3)

    print("KERNEL_OK")
</pallas_src>

<mosaic_0001>
module attributes {stable_mosaic.version = 11 : i64} {
  func.func @kernel(%arg0: memref<64x512xbf16, #tpu.memory_space<vmem>>, %arg1: memref<512x256xbf16, #tpu.memory_space<vmem>>, %arg2: memref<64x256xf32, #tpu.memory_space<vmem>>, %arg3: memref<1x256xf32, #tpu.memory_space<vmem>>, %arg4: memref<64x256xf32, #tpu.memory_space<vmem>>, %arg5: memref<64x256xf32, #tpu.memory_space<vmem>>, %arg6: memref<1x256xf32, #tpu.memory_space<vmem>>, %arg7: memref<64x128xf32, #tpu.memory_space<vmem>>, %arg8: memref<1x128xf32, #tpu.memory_space<vmem>>, %arg9: memref<64x128xf32, #tpu.memory_space<vmem>>, %arg10: memref<64x64xf32, #tpu.memory_space<vmem>>, %arg11: memref<64x256xf32, #tpu.memory_space<vmem>>) attributes {dimension_semantics = [], scalar_prefetch = 0 : i64, scratch_operands = 2 : i64, tpu.core_type = #tpu.core_type<tc>} {
    %c0 = arith.constant 0 : index
    %c0_0 = arith.constant 0 : index
    %0 = vector.load %arg0[%c0, %c0_0] : memref<64x512xbf16, #tpu.memory_space<vmem>>, vector<64x512xbf16>
    %c0_1 = arith.constant 0 : index
    %c0_2 = arith.constant 0 : index
    %1 = vector.load %arg1[%c0_1, %c0_2] : memref<512x256xbf16, #tpu.memory_space<vmem>>, vector<512x256xbf16>
    %cst = arith.constant dense<0.000000e+00> : vector<64x256xf32>
    %2 = tpu.matmul %0, %1, %cst {dimension_numbers = #tpu.dot_dimension_numbers<[1], [0], [0], [1], [0, 0, 1, 1], [], []>} : vector<64x512xbf16>, vector<512x256xbf16>, vector<64x256xf32> -> vector<64x256xf32>
    %c0_3 = arith.constant 0 : index
    %c0_4 = arith.constant 0 : index
    %3 = vector.load %arg3[%c0_3, %c0_4] : memref<1x256xf32, #tpu.memory_space<vmem>>, vector<1x256xf32>
    %4 = vector.broadcast %3 : vector<1x256xf32> to vector<64x256xf32>
    %5 = arith.addf %2, %4 : vector<64x256xf32>
    %c0_5 = arith.constant 0 : index
    %c0_6 = arith.constant 0 : index
    %6 = vector.load %arg11[%c0_5, %c0_6] : memref<64x256xf32, #tpu.memory_space<vmem>>, vector<64x256xf32>
    tpu.vector_store %arg11[%c0_5, %c0_6], %5 {strides = array<i32>} : memref<64x256xf32, #tpu.memory_space<vmem>>, vector<64x256xf32>,
    %c0_7 = arith.constant 0 : index
    %c0_8 = arith.constant 0 : index
    %7 = vector.load %arg2[%c0_7, %c0_8] : memref<64x256xf32, #tpu.memory_space<vmem>>, vector<64x256xf32>
    %cst_9 = arith.constant 0.000000e+00 : f32
    %8 = vector.broadcast %cst_9 : f32 to vector<8x32xf32>
    %cst_10 = arith.constant 0.000000e+00 : f32
    %9 = vector.broadcast %cst_10 : f32 to vector<8x32xf32>
    %cst_11 = arith.constant 0.000000e+00 : f32
    %10 = vector.broadcast %cst_11 : f32 to vector<8x32xf32>
    %cst_12 = arith.constant 0.000000e+00 : f32
    %11 = vector.broadcast %cst_12 : f32 to vector<8x32xf32>
    %12 = tpu.concatenate %8, %10 in 1 : vector<8x32xf32>, vector<8x32xf32> -> vector<8x64xf32>
    %cst_13 = arith.constant dense<0.000000e+00> : vector<8x256xf32>
    %13 = tpu.matmul %12, %7, %cst_13 {dimension_numbers = #tpu.dot_dimension_numbers<[1], [0], [0], [1], [0, 0, 1, 1], [], []>} : vector<8x64xf32>, vector<64x256xf32>, vector<8x256xf32> -> vector<8x256xf32>
    %c0_14 = arith.constant 0 : index
    %c0_15 = arith.constant 0 : index
    %14 = vector.load %arg11[%c0_14, %c0_15] : memref<64x256xf32, #tpu.memory_space<vmem>>, vector<8x128xf32>
    %15 = vector.extract_strided_slice %13 {offsets = [0, 0], sizes = [8, 128], strides = [1, 1]} : vector<8x256xf32> to vector<8x128xf32>
    %16 = arith.addf %14, %15 : vector<8x128xf32>
    %c56 = arith.constant 56 : index
    %c128 = arith.constant 128 : index
    %17 = vector.load %arg11[%c56, %c128] : memref<64x256xf32, #tpu.memory_space<vmem>>, vector<8x128xf32>
    %18 = vector.extract_strided_slice %13 {offsets = [0, 128], sizes = [8, 128], strides = [1, 1]} : vector<8x256xf32> to vector<8x128xf32>
    %19 = arith.addf %17, %18 : vector<8x128xf32>
    %20 = vector.extract_strided_slice %16 {offsets = [0, 0], sizes = [8, 96], strides = [1, 1]} : vector<8x128xf32> to vector<8x96xf32>
    %21 = arith.negf %20 : vector<8x96xf32>
    %22 = math.exp %21 : vector<8x96xf32>
    %cst_16 = arith.constant 1.000000e+00 : f32
    %23 = vector.broadcast %cst_16 : f32 to vector<8x96xf32>
    %24 = arith.addf %23, %22 : vector<8x96xf32>
    %25 = arith.divf %23, %24 : vector<8x96xf32>
    %26 = vector.extract_strided_slice %16 {offsets = [0, 96], sizes = [8, 32], strides = [1, 1]} : vector<8x128xf32> to vector<8x32xf32>
    %27 = math.tanh %26 : vector<8x32xf32>
    %28 = vector.extract_strided_slice %19 {offsets = [0, 0], sizes = [8, 96], strides = [1, 1]} : vector<8x128xf32> to vector<8x96xf32>
    %29 = arith.negf %28 : vector<8x96xf32>
    %30 = math.exp %29 : vector<8x96xf32>
    %cst_17 = arith.constant 1.000000e+00 : f32
    %31 = vector.broadcast %cst_17 : f32 to vector<8x96xf32>
    %32 = arith.addf %31, %30 : vector<8x96xf32>
    %33 = arith.divf %31, %32 : vector<8x96xf32>
    %34 = vector.extract_strided_slice %19 {offsets = [0, 96], sizes = [8, 32], strides = [1, 1]} : vector<8x128xf32> to vector<8x32xf32>
    %35 = math.tanh %34 : vector<8x32xf32>
    %36 = vector.extract_strided_slice %25 {offsets = [0, 32], sizes = [8, 32], strides = [1, 1]} : vector<8x96xf32> to vector<8x32xf32>
    %37 = arith.mulf %36, %9 : vector<8x32xf32>
    %38 = vector.extract_strided_slice %25 {offsets = [0, 0], sizes = [8, 32], strides = [1, 1]} : vector<8x96xf32> to vector<8x32xf32>
    %39 = arith.mulf %38, %27 : vector<8x32xf32>
    %40 = arith.addf %37, %39 : vector<8x32xf32>
    %41 = vector.extract_strided_slice %25 {offsets = [0, 64], sizes = [8, 32], strides = [1, 1]} : vector<8x96xf32> to vector<8x32xf32>
    %42 = math.tanh %40 : vector<8x32xf32>
    %43 = arith.mulf %41, %42 : vector<8x32xf32>
    %44 = vector.extract_strided_slice %33 {offsets = [0, 32], sizes = [8, 32], strides = [1, 1]} : vector<8x96xf32> to vector<8x32xf32>
    %45 = arith.mulf %44, %11 : vector<8x32xf32>
    %46 = vector.extract_strided_slice %33 {offsets = [0, 0], sizes = [8, 32], strides = [1, 1]} : vector<8x96xf32> to vector<8x32xf32>
    %47 = arith.mulf %46, %35 : vector<8x32xf32>
    %48 = arith.addf %45, %47 : vector<8x32xf32>
    %49 = vector.extract_strided_slice %33 {offsets = [0, 64], sizes = [8, 32], strides = [1, 1]} : vector<8x96xf32> to vector<8x32xf32>
    %50 = math.tanh %48 : vector<8x32xf32>
    %51 = arith.mulf %49, %50 : vector<8x32xf32>
    %c0_18 = arith.constant 0 : index
    %c0_19 = arith.constant 0 : index
    %52 = vector.load %arg10[%c0_18, %c0_19] : memref<64x64xf32, #tpu.memory_space<vmem>>, vector<8x32xf32>
    tpu.vector_store %arg10[%c0_18, %c0_19], %43 {strides = array<i32>} : memref<64x64xf32, #tpu.memory_space<vmem>>, vector<8x32xf32>,
    %c56_20 = arith.constant 56 : index
    %c32 = arith.constant 32 : index
    %53 = vector.load %arg10[%c56_20, %c32] : memref<64x64xf32, #tpu.memory_space<vmem>>, vector<8x32xf32>
    tpu.vector_store %arg10[%c56_20, %c32], %51 {strides = array<i32>} : memref<64x64xf32, #tpu.memory_space<vmem>>, vector<8x32xf32>,
    %54 = tpu.concatenate %43, %51 in 1 : vector<8x32xf32>, vector<8x32xf32> -> vector<8x64xf32>
    %cst_21 = arith.constant dense<0.000000e+00> : vector<8x256xf32>
    %55 = tpu.matmul %54, %7, %cst_21 {dimension_numbers = #tpu.dot_dimension_numbers<[1], [0], [0], [1], [0, 0, 1, 1], [], []>} : vector<8x64xf32>, vector<64x256xf32>, vector<8x256xf32> -> vector<8x256xf32>
    %c8 = arith.constant 8 : index
    %c0_22 = arith.constant 0 : index
    %56 = vector.load %arg11[%c8, %c0_22] : memref<64x256xf32, #tpu.memory_space<vmem>>, vector<8x128xf32>
    %57 = vector.extract_strided_slice %55 {offsets = [0, 0], sizes = [8, 128], strides = [1, 1]} : vector<8x256xf32> to vector<8x128xf32>
    %58 = arith.addf %56, %57 : vector<8x128xf32>
    %c48 = arith.constant 48 : index
    %c128_23 = arith.constant 128 : index
    %59 = vector.load %arg11[%c48, %c128_23] : memref<64x256xf32, #tpu.memory_space<vmem>>, vector<8x128xf32>
    %60 = vector.extract_strided_slice %55 {offsets = [0, 128], sizes = [8, 128], strides = [1, 1]} : vector<8x256xf32> to vector<8x128xf32>
    %61 = arith.addf %59, %60 : vector<8x128xf32>
    %62 = vector.extract_strided_slice %58 {offsets = [0, 0], sizes = [8, 96], strides = [1, 1]} : vector<8x128xf32> to vector<8x96xf32>
    %63 = arith.negf %62 : vector<8x96xf32>
    %64 = math.exp %63 : vector<8x96xf32>
    %cst_24 = arith.constant 1.000000e+00 : f32
    %65 = vector.broadcast %cst_24 : f32 to vector<8x96xf32>
    %66 = arith.addf %65, %64 : vector<8x96xf32>
    %67 = arith.divf %65, %66 : vector<8x96xf32>
    %68 = vector.extract_strided_slice %58 {offsets = [0, 96], sizes = [8, 32], strides = [1, 1]} : vector<8x128xf32> to vector<8x32xf32>
    %69 = math.tanh %68 : vector<8x32xf32>
    %70 = vector.extract_strided_slice %61 {offsets = [0, 0], sizes = [8, 96], strides = [1, 1]} : vector<8x128xf32> to vector<8x96xf32>
    %71 = arith.negf %70 : vector<8x96xf32>
    %72 = math.exp %71 : vector<8x96xf32>
    %cst_25 = arith.constant 1.000000e+00 : f32
    %73 = vector.broadcast %cst_25 : f32 to vector<8x96xf32>
    %74 = arith.addf %73, %72 : vector<8x96xf32>
    %75 = arith.divf %73, %74 : vector<8x96xf32>
    %76 = vector.extract_strided_slice %61 {offsets = [0, 96], sizes = [8, 32], strides = [1, 1]} : vector<8x128xf32> to vector<8x32xf32>
    %77 = math.tanh %76 : vector<8x32xf32>
    %78 = vector.extract_strided_slice %67 {offsets = [0, 32], sizes = [8, 32], strides = [1, 1]} : vector<8x96xf32> to vector<8x32xf32>
    %79 = arith.mulf %78, %40 : vector<8x32xf32>
    %80 = vector.extract_strided_slice %67 {offsets = [0, 0], sizes = [8, 32], strides = [1, 1]} : vector<8x96xf32> to vector<8x32xf32>
    %81 = arith.mulf %80, %69 : vector<8x32xf32>
    %82 = arith.addf %79, %81 : vector<8x32xf32>
    %83 = vector.extract_strided_slice %67 {offsets = [0, 64], sizes = [8, 32], strides = [1, 1]} : vector<8x96xf32> to vector<8x32xf32>
    %84 = math.tanh %82 : vector<8x32xf32>
    %85 = arith.mulf %83, %84 : vector<8x32xf32>
    %86 = vector.extract_strided_slice %75 {offsets = [0, 32], sizes = [8, 32], strides = [1, 1]} : vector<8x96xf32> to vector<8x32xf32>
    %87 = arith.mulf %86, %48 : vector<8x32xf32>
    %88 = vector.extract_strided_slice %75 {offsets = [0, 0], sizes = [8, 32], strides = [1, 1]} : vector<8x96xf32> to vector<8x32xf32>
    %89 = arith.mulf %88, %77 : vector<8x32xf32>
    %90 = arith.addf %87, %89 : vector<8x32xf32>
    %91 = vector.extract_strided_slice %75 {offsets = [0, 64], sizes = [8, 32], strides = [1, 1]} : vector<8x96xf32> to vector<8x32xf32>
    %92 = math.tanh %90 : vector<8x32xf32>
    %93 = arith.mulf %91, %92 : vector<8x32xf32>
    %c8_26 = arith.constant 8 : index
    %c0_27 = arith.constant 0 : index
    %94 = vector.load %arg10[%c8_26, %c0_27] : memref<64x64xf32, #tpu.memory_space<vmem>>, vector<8x32xf32>
    tpu.vector_store %arg10[%c8_26, %c0_27], %85 {strides = array<i32>} : memref<64x64xf32, #tpu.memory_space<vmem>>, vector<8x32xf32>,
    %c48_28 = arith.constant 48 : index
    %c32_29 = arith.constant 32 : index
    %95 = vector.load %arg10[%c48_28, %c32_29] : memref<64x64xf32, #tpu.memory_space<vmem>>, vector<8x32xf32>
    tpu.vector_store %arg10[%c48_28, %c32_29], %93 {strides = array<i32>} : memref<64x64xf32, #tpu.memory_space<vmem>>, vector<8x32xf32>,
    %96 = tpu.concatenate %85, %93 in 1 : vector<8x32xf32>, vector<8x32xf32> -> vector<8x64xf32>
    %cst_30 = arith.constant dense<0.000000e+00> : vector<8x256xf32>
    %97 = tpu.matmul %96, %7, %cst_30 {dimension_numbers = #tpu.dot_dimension_numbers<[1], [0], [0], [1], [0, 0, 1, 1], [], []>} : vector<8x64xf32>, vector<64x256xf32>, vector<8x256xf32> -> vector<8x256xf32>
    %c16 = arith.constant 16 : index
    %c0_31 = arith.constant 0 : index
    %98 = vector.load %arg11[%c16, %c0_31] : memref<64x256xf32, #tpu.memory_space<vmem>>, vector<8x128xf32>
    %99 = vector.extract_strided_slice %97 {offsets = [0, 0], sizes = [8, 128], strides = [1, 1]} : vector<8x256xf32> to vector<8x128xf32>
    %100 = arith.addf %98, %99 : vector<8x128xf32>
    %c40 = arith.constant 40 : index
    %c128_32 = arith.constant 128 : index
    %101 = vector.load %arg11[%c40, %c128_32] : memref<64x256xf32, #tpu.memory_space<vmem>>, vector<8x128xf32>
    %102 = vector.extract_strided_slice %97 {offsets = [0, 128], sizes = [8, 128], strides = [1, 1]} : vector<8x256xf32> to vector<8x128xf32>
    %103 = arith.addf %101, %102 : vector<8x128xf32>
    %104 = vector.extract_strided_slice %100 {offsets = [0, 0], sizes = [8, 96], strides = [1, 1]} : vector<8x128xf32> to vector<8x96xf32>
    %105 = arith.negf %104 : vector<8x96xf32>
    %106 = math.exp %105 : vector<8x96xf32>
    %cst_33 = arith.constant 1.000000e+00 : f32
    %107 = vector.broadcast %cst_33 : f32 to vector<8x96xf32>
    %108 = arith.addf %107, %106 : vector<8x96xf32>
    %109 = arith.divf %107, %108 : vector<8x96xf32>
    %110 = vector.extract_strided_slice %100 {offsets = [0, 96], sizes = [8, 32], strides = [1, 1]} : vector<8x128xf32> to vector<8x32xf32>
    %111 = math.tanh %110 : vector<8x32xf32>
    %112 = vector.extract_strided_slice %103 {offsets = [0, 0], sizes = [8, 96], strides = [1, 1]} : vector<8x128xf32> to vector<8x96xf32>
    %113 = arith.negf %112 : vector<8x96xf32>
    %114 = math.exp %113 : vector<8x96xf32>
    %cst_34 = arith.constant 1.000000e+00 : f32
    %115 = vector.broadcast %cst_34 : f32 to vector<8x96xf32>
    %116 = arith.addf %115, %114 : vector<8x96xf32>
    %117 = arith.divf %115, %116 : vector<8x96xf32>
    %118 = vector.extract_strided_slice %103 {offsets = [0, 96], sizes = [8, 32], strides = [1, 1]} : vector<8x128xf32> to vector<8x32xf32>
    %119 = math.tanh %118 : vector<8x32xf32>
    %120 = vector.extract_strided_slice %109 {offsets = [0, 32], sizes = [8, 32], strides = [1, 1]} : vector<8x96xf32> to vector<8x32xf32>
    %121 = arith.mulf %120, %82 : vector<8x32xf32>
    %122 = vector.extract_strided_slice %109 {offsets = [0, 0], sizes = [8, 32], strides = [1, 1]} : vector<8x96xf32> to vector<8x32xf32>
    %123 = arith.mulf %122, %111 : vector<8x32xf32>
    %124 = arith.addf %121, %123 : vector<8x32xf32>
    %125 = vector.extract_strided_slice %109 {offsets = [0, 64], sizes = [8, 32], strides = [1, 1]} : vector<8x96xf32> to vector<8x32xf32>
    %126 = math.tanh %124 : vector<8x32xf32>
    %127 = arith.mulf %125, %126 : vector<8x32xf32>
    %128 = vector.extract_strided_slice %117 {offsets = [0, 32], sizes = [8, 32], strides = [1, 1]} : vector<8x96xf32> to vector<8x32xf32>
    %129 = arith.mulf %128, %90 : vector<8x32xf32>
    %130 = vector.extract_strided_slice %117 {offsets = [0, 0], sizes = [8, 32], strides = [1, 1]} : vector<8x96xf32> to vector<8x32xf32>
    %131 = arith.mulf %130, %119 : vector<8x32xf32>
    %132 = arith.addf %129, %131 : vector<8x32xf32>
    %133 = vector.extract_strided_slice %117 {offsets = [0, 64], sizes = [8, 32], strides = [1, 1]} : vector<8x96xf32> to vector<8x32xf32>
    %134 = math.tanh %132 : vector<8x32xf32>
    %135 = arith.mulf %133, %134 : vector<8x32xf32>
    %c16_35 = arith.constant 16 : index
    %c0_36 = arith.constant 0 : index
    %136 = vector.load %arg10[%c16_35, %c0_36] : memref<64x64xf32, #tpu.memory_space<vmem>>, vector<8x32xf32>
    tpu.vector_store %arg10[%c16_35, %c0_36], %127 {strides = array<i32>} : memref<64x64xf32, #tpu.memory_space<vmem>>, vector<8x32xf32>,
    %c40_37 = arith.constant 40 : index
    %c32_38 = arith.constant 32 : index
    %137 = vector.load %arg10[%c40_37, %c32_38] : memref<64x64xf32, #tpu.memory_space<vmem>>, vector<8x32xf32>
    tpu.vector_store %arg10[%c40_37, %c32_38], %135 {strides = array<i32>} : memref<64x64xf32, #tpu.memory_space<vmem>>, vector<8x32xf32>,
    %138 = tpu.concatenate %127, %135 in 1 : vector<8x32xf32>, vector<8x32xf32> -> vector<8x64xf32>
    %cst_39 = arith.constant dense<0.000000e+00> : vector<8x256xf32>
    %139 = tpu.matmul %138, %7, %cst_39 {dimension_numbers = #tpu.dot_dimension_numbers<[1], [0], [0], [1], [0, 0, 1, 1], [], []>} : vector<8x64xf32>, vector<64x256xf32>, vector<8x256xf32> -> vector<8x256xf32>
    %c24 = arith.constant 24 : index
    %c0_40 = arith.constant 0 : index
    %140 = vector.load %arg11[%c24, %c0_40] : memref<64x256xf32, #tpu.memory_space<vmem>>, vector<8x128xf32>
    %141 = vector.extract_strided_slice %139 {offsets = [0, 0], sizes = [8, 128], strides = [1, 1]} : vector<8x256xf32> to vector<8x128xf32>
    %142 = arith.addf %140, %141 : vector<8x128xf32>
    %c32_41 = arith.constant 32 : index
    %c128_42 = arith.constant 128 : index
    %143 = vector.load %arg11[%c32_41, %c128_42] : memref<64x256xf32, #tpu.memory_space<vmem>>, vector<8x128xf32>
    %144 = vector.extract_strided_slice %139 {offsets = [0, 128], sizes = [8, 128], strides = [1, 1]} : vector<8x256xf32> to vector<8x128xf32>
    %145 = arith.addf %143, %144 : vector<8x128xf32>
    %146 = vector.extract_strided_slice %142 {offsets = [0, 0], sizes = [8, 96], strides = [1, 1]} : vector<8x128xf32> to vector<8x96xf32>
    %147 = arith.negf %146 : vector<8x96xf32>
    %148 = math.exp %147 : vector<8x96xf32>
    %cst_43 = arith.constant 1.000000e+00 : f32
    %149 = vector.broadcast %cst_43 : f32 to vector<8x96xf32>
    %150 = arith.addf %149, %148 : vector<8x96xf32>
    %151 = arith.divf %149, %150 : vector<8x96xf32>
    %152 = vector.extract_strided_slice %142 {offsets = [0, 96], sizes = [8, 32], strides = [1, 1]} : vector<8x128xf32> to vector<8x32xf32>
    %153 = math.tanh %152 : vector<8x32xf32>
    %154 = vector.extract_strided_slice %145 {offsets = [0, 0], sizes = [8, 96], strides = [1, 1]} : vector<8x128xf32> to vector<8x96xf32>
    %155 = arith.negf %154 : vector<8x96xf32>
    %156 = math.exp %155 : vector<8x96xf32>
    %cst_44 = arith.constant 1.000000e+00 : f32
    %157 = vector.broadcast %cst_44 : f32 to vector<8x96xf32>
    %158 = arith.addf %157, %156 : vector<8x96xf32>
    %159 = arith.divf %157, %158 : vector<8x96xf32>
    %160 = vector.extract_strided_slice %145 {offsets = [0, 96], sizes = [8, 32], strides = [1, 1]} : vector<8x128xf32> to vector<8x32xf32>
    %161 = math.tanh %160 : vector<8x32xf32>
    %162 = vector.extract_strided_slice %151 {offsets = [0, 32], sizes = [8, 32], strides = [1, 1]} : vector<8x96xf32> to vector<8x32xf32>
    %163 = arith.mulf %162, %124 : vector<8x32xf32>
    %164 = vector.extract_strided_slice %151 {offsets = [0, 0], sizes = [8, 32], strides = [1, 1]} : vector<8x96xf32> to vector<8x32xf32>
    %165 = arith.mulf %164, %153 : vector<8x32xf32>
    %166 = arith.addf %163, %165 : vector<8x32xf32>
    %167 = vector.extract_strided_slice %151 {offsets = [0, 64], sizes = [8, 32], strides = [1, 1]} : vector<8x96xf32> to vector<8x32xf32>
    %168 = math.tanh %166 : vector<8x32xf32>
    %169 = arith.mulf %167, %168 : vector<8x32xf32>
    %170 = vector.extract_strided_slice %159 {offsets = [0, 32], sizes = [8, 32], strides = [1, 1]} : vector<8x96xf32> to vector<8x32xf32>
    %171 = arith.mulf %170, %132 : vector<8x32xf32>
    %172 = vector.extract_strided_slice %159 {offsets = [0, 0], sizes = [8, 32], strides = [1, 1]} : vector<8x96xf32> to vector<8x32xf32>
    %173 = arith.mulf %172, %161 : vector<8x32xf32>
    %174 = arith.addf %171, %173 : vector<8x32xf32>
    %175 = vector.extract_strided_slice %159 {offsets = [0, 64], sizes = [8, 32], strides = [1, 1]} : vector<8x96xf32> to vector<8x32xf32>
    %176 = math.tanh %174 : vector<8x32xf32>
    %177 = arith.mulf %175, %176 : vector<8x32xf32>
    %c24_45 = arith.constant 24 : index
    %c0_46 = arith.constant 0 : index
    %178 = vector.load %arg10[%c24_45, %c0_46] : memref<64x64xf32, #tpu.memory_space<vmem>>, vector<8x32xf32>
    tpu.vector_store %arg10[%c24_45, %c0_46], %169 {strides = array<i32>} : memref<64x64xf32, #tpu.memory_space<vmem>>, vector<8x32xf32>,
    %c32_47 = arith.constant 32 : index
    %c32_48 = arith.constant 32 : index
    %179 = vector.load %arg10[%c32_47, %c32_48] : memref<64x64xf32, #tpu.memory_space<vmem>>, vector<8x32xf32>
    tpu.vector_store %arg10[%c32_47, %c32_48], %177 {strides = array<i32>} : memref<64x64xf32, #tpu.memory_space<vmem>>, vector<8x32xf32>,
    %180 = tpu.concatenate %169, %177 in 1 : vector<8x32xf32>, vector<8x32xf32> -> vector<8x64xf32>
    %cst_49 = arith.constant dense<0.000000e+00> : vector<8x256xf32>
    %181 = tpu.matmul %180, %7, %cst_49 {dimension_numbers = #tpu.dot_dimension_numbers<[1], [0], [0], [1], [0, 0, 1, 1], [], []>} : vector<8x64xf32>, vector<64x256xf32>, vector<8x256xf32> -> vector<8x256xf32>
    %c32_50 = arith.constant 32 : index
    %c0_51 = arith.constant 0 : index
    %182 = vector.load %arg11[%c32_50, %c0_51] : memref<64x256xf32, #tpu.memory_space<vmem>>, vector<8x128xf32>
    %183 = vector.extract_strided_slice %181 {offsets = [0, 0], sizes = [8, 128], strides = [1, 1]} : vector<8x256xf32> to vector<8x128xf32>
    %184 = arith.addf %182, %183 : vector<8x128xf32>
    %c24_52 = arith.constant 24 : index
    %c128_53 = arith.constant 128 : index
    %185 = vector.load %arg11[%c24_52, %c128_53] : memref<64x256xf32, #tpu.memory_space<vmem>>, vector<8x128xf32>
    %186 = vector.extract_strided_slice %181 {offsets = [0, 128], sizes = [8, 128], strides = [1, 1]} : vector<8x256xf32> to vector<8x128xf32>
    %187 = arith.addf %185, %186 : vector<8x128xf32>
    %188 = vector.extract_strided_slice %184 {offsets = [0, 0], sizes = [8, 96], strides = [1, 1]} : vector<8x128xf32> to vector<8x96xf32>
    %189 = arith.negf %188 : vector<8x96xf32>
    %190 = math.exp %189 : vector<8x96xf32>
    %cst_54 = arith.constant 1.000000e+00 : f32
    %191 = vector.broadcast %cst_54 : f32 to vector<8x96xf32>
    %192 = arith.addf %191, %190 : vector<8x96xf32>
    %193 = arith.divf %191, %192 : vector<8x96xf32>
    %194 = vector.extract_strided_slice %184 {offsets = [0, 96], sizes = [8, 32], strides = [1, 1]} : vector<8x128xf32> to vector<8x32xf32>
    %195 = math.tanh %194 : vector<8x32xf32>
    %196 = vector.extract_strided_slice %187 {offsets = [0, 0], sizes = [8, 96], strides = [1, 1]} : vector<8x128xf32> to vector<8x96xf32>
    %197 = arith.negf %196 : vector<8x96xf32>
    %198 = math.exp %197 : vector<8x96xf32>
    %cst_55 = arith.constant 1.000000e+00 : f32
    %199 = vector.broadcast %cst_55 : f32 to vector<8x96xf32>
    %200 = arith.addf %199, %198 : vector<8x96xf32>
    %201 = arith.divf %199, %200 : vector<8x96xf32>
    %202 = vector.extract_strided_slice %187 {offsets = [0, 96], sizes = [8, 32], strides = [1, 1]} : vector<8x128xf32> to vector<8x32xf32>
    %203 = math.tanh %202 : vector<8x32xf32>
    %204 = vector.extract_strided_slice %193 {offsets = [0, 32], sizes = [8, 32], strides = [1, 1]} : vector<8x96xf32> to vector<8x32xf32>
    %205 = arith.mulf %204, %166 : vector<8x32xf32>
    %206 = vector.extract_strided_slice %193 {offsets = [0, 0], sizes = [8, 32], strides = [1, 1]} : vector<8x96xf32> to vector<8x32xf32>
    %207 = arith.mulf %206, %195 : vector<8x32xf32>
    %208 = arith.addf %205, %207 : vector<8x32xf32>
    %209 = vector.extract_strided_slice %193 {offsets = [0, 64], sizes = [8, 32], strides = [1, 1]} : vector<8x96xf32> to vector<8x32xf32>
    %210 = math.tanh %208 : vector<8x32xf32>
    %211 = arith.mulf %209, %210 : vector<8x32xf32>
    %212 = vector.extract_strided_slice %201 {offsets = [0, 32], sizes = [8, 32], strides = [1, 1]} : vector<8x96xf32> to vector<8x32xf32>
    %213 = arith.mulf %212, %174 : vector<8x32xf32>
    %214 = vector.extract_strided_slice %201 {offsets = [0, 0], sizes = [8, 32], strides = [1, 1]} : vector<8x96xf32> to vector<8x32xf32>
    %215 = arith.mulf %214, %203 : vector<8x32xf32>
    %216 = arith.addf %213, %215 : vector<8x32xf32>
    %217 = vector.extract_strided_slice %201 {offsets = [0, 64], sizes = [8, 32], strides = [1, 1]} : vector<8x96xf32> to vector<8x32xf32>
    %218 = math.tanh %216 : vector<8x32xf32>
    %219 = arith.mulf %217, %218 : vector<8x32xf32>
    %c32_56 = arith.constant 32 : index
    %c0_57 = arith.constant 0 : index
    %220 = vector.load %arg10[%c32_56, %c0_57] : memref<64x64xf32, #tpu.memory_space<vmem>>, vector<8x32xf32>
    tpu.vector_store %arg10[%c32_56, %c0_57], %211 {strides = array<i32>} : memref<64x64xf32, #tpu.memory_space<vmem>>, vector<8x32xf32>,
    %c24_58 = arith.constant 24 : index
    %c32_59 = arith.constant 32 : index
    %221 = vector.load %arg10[%c24_58, %c32_59] : memref<64x64xf32, #tpu.memory_space<vmem>>, vector<8x32xf32>
    tpu.vector_store %arg10[%c24_58, %c32_59], %219 {strides = array<i32>} : memref<64x64xf32, #tpu.memory_space<vmem>>, vector<8x32xf32>,
    %222 = tpu.concatenate %211, %219 in 1 : vector<8x32xf32>, vector<8x32xf32> -> vector<8x64xf32>
    %cst_60 = arith.constant dense<0.000000e+00> : vector<8x256xf32>
    %223 = tpu.matmul %222, %7, %cst_60 {dimension_numbers = #tpu.dot_dimension_numbers<[1], [0], [0], [1], [0, 0, 1, 1], [], []>} : vector<8x64xf32>, vector<64x256xf32>, vector<8x256xf32> -> vector<8x256xf32>
    %c40_61 = arith.constant 40 : index
    %c0_62 = arith.constant 0 : index
    %224 = vector.load %arg11[%c40_61, %c0_62] : memref<64x256xf32, #tpu.memory_space<vmem>>, vector<8x128xf32>
    %225 = vector.extract_strided_slice %223 {offsets = [0, 0], sizes = [8, 128], strides = [1, 1]} : vector<8x256xf32> to vector<8x128xf32>
    %226 = arith.addf %224, %225 : vector<8x128xf32>
    %c16_63 = arith.constant 16 : index
    %c128_64 = arith.constant 128 : index
    %227 = vector.load %arg11[%c16_63, %c128_64] : memref<64x256xf32, #tpu.memory_space<vmem>>, vector<8x128xf32>
    %228 = vector.extract_strided_slice %223 {offsets = [0, 128], sizes = [8, 128], strides = [1, 1]} : vector<8x256xf32> to vector<8x128xf32>
    %229 = arith.addf %227, %228 : vector<8x128xf32>
    %230 = vector.extract_strided_slice %226 {offsets = [0, 0], sizes = [8, 96], strides = [1, 1]} : vector<8x128xf32> to vector<8x96xf32>
    %231 = arith.negf %230 : vector<8x96xf32>
    %232 = math.exp %231 : vector<8x96xf32>
    %cst_65 = arith.constant 1.000000e+00 : f32
    %233 = vector.broadcast %cst_65 : f32 to vector<8x96xf32>
    %234 = arith.addf %233, %232 : vector<8x96xf32>
    %235 = arith.divf %233, %234 : vector<8x96xf32>
    %236 = vector.extract_strided_slice %226 {offsets = [0, 96], sizes = [8, 32], strides = [1, 1]} : vector<8x128xf32> to vector<8x32xf32>
    %237 = math.tanh %236 : vector<8x32xf32>
    %238 = vector.extract_strided_slice %229 {offsets = [0, 0], sizes = [8, 96], strides = [1, 1]} : vector<8x128xf32> to vector<8x96xf32>
    %239 = arith.negf %238 : vector<8x96xf32>
    %240 = math.exp %239 : vector<8x96xf32>
    %cst_66 = arith.constant 1.000000e+00 : f32
    %241 = vector.broadcast %cst_66 : f32 to vector<8x96xf32>
    %242 = arith.addf %241, %240 : vector<8x96xf32>
    %243 = arith.divf %241, %242 : vector<8x96xf32>
    %244 = vector.extract_strided_slice %229 {offsets = [0, 96], sizes = [8, 32], strides = [1, 1]} : vector<8x128xf32> to vector<8x32xf32>
    %245 = math.tanh %244 : vector<8x32xf32>
    %246 = vector.extract_strided_slice %235 {offsets = [0, 32], sizes = [8, 32], strides = [1, 1]} : vector<8x96xf32> to vector<8x32xf32>
    %247 = arith.mulf %246, %208 : vector<8x32xf32>
    %248 = vector.extract_strided_slice %235 {offsets = [0, 0], sizes = [8, 32], strides = [1, 1]} : vector<8x96xf32> to vector<8x32xf32>
    %249 = arith.mulf %248, %237 : vector<8x32xf32>
    %250 = arith.addf %247, %249 : vector<8x32xf32>
    %251 = vector.extract_strided_slice %235 {offsets = [0, 64], sizes = [8, 32], strides = [1, 1]} : vector<8x96xf32> to vector<8x32xf32>
    %252 = math.tanh %250 : vector<8x32xf32>
    %253 = arith.mulf %251, %252 : vector<8x32xf32>
    %254 = vector.extract_strided_slice %243 {offsets = [0, 32], sizes = [8, 32], strides = [1, 1]} : vector<8x96xf32> to vector<8x32xf32>
    %255 = arith.mulf %254, %216 : vector<8x32xf32>
    %256 = vector.extract_strided_slice %243 {offsets = [0, 0], sizes = [8, 32], strides = [1, 1]} : vector<8x96xf32> to vector<8x32xf32>
    %257 = arith.mulf %256, %245 : vector<8x32xf32>
    %258 = arith.addf %255, %257 : vector<8x32xf32>
    %259 = vector.extract_strided_slice %243 {offsets = [0, 64], sizes = [8, 32], strides = [1, 1]} : vector<8x96xf32> to vector<8x32xf32>
    %260 = math.tanh %258 : vector<8x32xf32>
    %261 = arith.mulf %259, %260 : vector<8x32xf32>
    %c40_67 = arith.constant 40 : index
    %c0_68 = arith.constant 0 : index
    %262 = vector.load %arg10[%c40_67, %c0_68] : memref<64x64xf32, #tpu.memory_space<vmem>>, vector<8x32xf32>
    tpu.vector_store %arg10[%c40_67, %c0_68], %253 {strides = array<i32>} : memref<64x64xf32, #tpu.memory_space<vmem>>, vector<8x32xf32>,
    %c16_69 = arith.constant 16 : index
    %c32_70 = arith.constant 32 : index
    %263 = vector.load %arg10[%c16_69, %c32_70] : memref<64x64xf32, #tpu.memory_space<vmem>>, vector<8x32xf32>
    tpu.vector_store %arg10[%c16_69, %c32_70], %261 {strides = array<i32>} : memref<64x64xf32, #tpu.memory_space<vmem>>, vector<8x32xf32>,
    %264 = tpu.concatenate %253, %261 in 1 : vector<8x32xf32>, vector<8x32xf32> -> vector<8x64xf32>
    %cst_71 = arith.constant dense<0.000000e+00> : vector<8x256xf32>
    %265 = tpu.matmul %264, %7, %cst_71 {dimension_numbers = #tpu.dot_dimension_numbers<[1], [0], [0], [1], [0, 0, 1, 1], [], []>} : vector<8x64xf32>, vector<64x256xf32>, vector<8x256xf32> -> vector<8x256xf32>
    %c48_72 = arith.constant 48 : index
    %c0_73 = arith.constant 0 : index
    %266 = vector.load %arg11[%c48_72, %c0_73] : memref<64x256xf32, #tpu.memory_space<vmem>>, vector<8x128xf32>
    %267 = vector.extract_strided_slice %265 {offsets = [0, 0], sizes = [8, 128], strides = [1, 1]} : vector<8x256xf32> to vector<8x128xf32>
    %268 = arith.addf %266, %267 : vector<8x128xf32>
    %c8_74 = arith.constant 8 : index
    %c128_75 = arith.constant 128 : index
    %269 = vector.load %arg11[%c8_74, %c128_75] : memref<64x256xf32, #tpu.memory_space<vmem>>, vector<8x128xf32>
    %270 = vector.extract_strided_slice %265 {offsets = [0, 128], sizes = [8, 128], strides = [1, 1]} : vector<8x256xf32> to vector<8x128xf32>
    %271 = arith.addf %269, %270 : vector<8x128xf32>
    %272 = vector.extract_strided_slice %268 {offsets = [0, 0], sizes = [8, 96], strides = [1, 1]} : vector<8x128xf32> to vector<8x96xf32>
    %273 = arith.negf %272 : vector<8x96xf32>
    %274 = math.exp %273 : vector<8x96xf32>
    %cst_76 = arith.constant 1.000000e+00 : f32
    %275 = vector.broadcast %cst_76 : f32 to vector<8x96xf32>
    %276 = arith.addf %275, %274 : vector<8x96xf32>
    %277 = arith.divf %275, %276 : vector<8x96xf32>
    %278 = vector.extract_strided_slice %268 {offsets = [0, 96], sizes = [8, 32], strides = [1, 1]} : vector<8x128xf32> to vector<8x32xf32>
    %279 = math.tanh %278 : vector<8x32xf32>
    %280 = vector.extract_strided_slice %271 {offsets = [0, 0], sizes = [8, 96], strides = [1, 1]} : vector<8x128xf32> to vector<8x96xf32>
    %281 = arith.negf %280 : vector<8x96xf32>
    %282 = math.exp %281 : vector<8x96xf32>
    %cst_77 = arith.constant 1.000000e+00 : f32
    %283 = vector.broadcast %cst_77 : f32 to vector<8x96xf32>
    %284 = arith.addf %283, %282 : vector<8x96xf32>
    %285 = arith.divf %283, %284 : vector<8x96xf32>
    %286 = vector.extract_strided_slice %271 {offsets = [0, 96], sizes = [8, 32], strides = [1, 1]} : vector<8x128xf32> to vector<8x32xf32>
    %287 = math.tanh %286 : vector<8x32xf32>
    %288 = vector.extract_strided_slice %277 {offsets = [0, 32], sizes = [8, 32], strides = [1, 1]} : vector<8x96xf32> to vector<8x32xf32>
    %289 = arith.mulf %288, %250 : vector<8x32xf32>
    %290 = vector.extract_strided_slice %277 {offsets = [0, 0], sizes = [8, 32], strides = [1, 1]} : vector<8x96xf32> to vector<8x32xf32>
    %291 = arith.mulf %290, %279 : vector<8x32xf32>
    %292 = arith.addf %289, %291 : vector<8x32xf32>
    %293 = vector.extract_strided_slice %277 {offsets = [0, 64], sizes = [8, 32], strides = [1, 1]} : vector<8x96xf32> to vector<8x32xf32>
    %294 = math.tanh %292 : vector<8x32xf32>
    %295 = arith.mulf %293, %294 : vector<8x32xf32>
    %296 = vector.extract_strided_slice %285 {offsets = [0, 32], sizes = [8, 32], strides = [1, 1]} : vector<8x96xf32> to vector<8x32xf32>
    %297 = arith.mulf %296, %258 : vector<8x32xf32>
    %298 = vector.extract_strided_slice %285 {offsets = [0, 0], sizes = [8, 32], strides = [1, 1]} : vector<8x96xf32> to vector<8x32xf32>
    %299 = arith.mulf %298, %287 : vector<8x32xf32>
    %300 = arith.addf %297, %299 : vector<8x32xf32>
    %301 = vector.extract_strided_slice %285 {offsets = [0, 64], sizes = [8, 32], strides = [1, 1]} : vector<8x96xf32> to vector<8x32xf32>
    %302 = math.tanh %300 : vector<8x32xf32>
    %303 = arith.mulf %301, %302 : vector<8x32xf32>
    %c48_78 = arith.constant 48 : index
    %c0_79 = arith.constant 0 : index
    %304 = vector.load %arg10[%c48_78, %c0_79] : memref<64x64xf32, #tpu.memory_space<vmem>>, vector<8x32xf32>
    tpu.vector_store %arg10[%c48_78, %c0_79], %295 {strides = array<i32>} : memref<64x64xf32, #tpu.memory_space<vmem>>, vector<8x32xf32>,
    %c8_80 = arith.constant 8 : index
    %c32_81 = arith.constant 32 : index
    %305 = vector.load %arg10[%c8_80, %c32_81] : memref<64x64xf32, #tpu.memory_space<vmem>>, vector<8x32xf32>
    tpu.vector_store %arg10[%c8_80, %c32_81], %303 {strides = array<i32>} : memref<64x64xf32, #tpu.memory_space<vmem>>, vector<8x32xf32>,
    %306 = tpu.concatenate %295, %303 in 1 : vector<8x32xf32>, vector<8x32xf32> -> vector<8x64xf32>
    %cst_82 = arith.constant dense<0.000000e+00> : vector<8x256xf32>
    %307 = tpu.matmul %306, %7, %cst_82 {dimension_numbers = #tpu.dot_dimension_numbers<[1], [0], [0], [1], [0, 0, 1, 1], [], []>} : vector<8x64xf32>, vector<64x256xf32>, vector<8x256xf32> -> vector<8x256xf32>
    %c56_83 = arith.constant 56 : index
    %c0_84 = arith.constant 0 : index
    %308 = vector.load %arg11[%c56_83, %c0_84] : memref<64x256xf32, #tpu.memory_space<vmem>>, vector<8x128xf32>
    %309 = vector.extract_strided_slice %307 {offsets = [0, 0], sizes = [8, 128], strides = [1, 1]} : vector<8x256xf32> to vector<8x128xf32>
    %310 = arith.addf %308, %309 : vector<8x128xf32>
    %c0_85 = arith.constant 0 : index
    %c128_86 = arith.constant 128 : index
    %311 = vector.load %arg11[%c0_85, %c128_86] : memref<64x256xf32, #tpu.memory_space<vmem>>, vector<8x128xf32>
    %312 = vector.extract_strided_slice %307 {offsets = [0, 128], sizes = [8, 128], strides = [1, 1]} : vector<8x256xf32> to vector<8x128xf32>
    %313 = arith.addf %311, %312 : vector<8x128xf32>
    %314 = vector.extract_strided_slice %310 {offsets = [0, 0], sizes = [8, 96], strides = [1, 1]} : vector<8x128xf32> to vector<8x96xf32>
    %315 = arith.negf %314 : vector<8x96xf32>
    %316 = math.exp %315 : vector<8x96xf32>
    %cst_87 = arith.constant 1.000000e+00 : f32
    %317 = vector.broadcast %cst_87 : f32 to vector<8x96xf32>
    %318 = arith.addf %317, %316 : vector<8x96xf32>
    %319 = arith.divf %317, %318 : vector<8x96xf32>
    %320 = vector.extract_strided_slice %310 {offsets = [0, 96], sizes = [8, 32], strides = [1, 1]} : vector<8x128xf32> to vector<8x32xf32>
    %321 = math.tanh %320 : vector<8x32xf32>
    %322 = vector.extract_strided_slice %313 {offsets = [0, 0], sizes = [8, 96], strides = [1, 1]} : vector<8x128xf32> to vector<8x96xf32>
    %323 = arith.negf %322 : vector<8x96xf32>
    %324 = math.exp %323 : vector<8x96xf32>
    %cst_88 = arith.constant 1.000000e+00 : f32
    %325 = vector.broadcast %cst_88 : f32 to vector<8x96xf32>
    %326 = arith.addf %325, %324 : vector<8x96xf32>
    %327 = arith.divf %325, %326 : vector<8x96xf32>
    %328 = vector.extract_strided_slice %313 {offsets = [0, 96], sizes = [8, 32], strides = [1, 1]} : vector<8x128xf32> to vector<8x32xf32>
    %329 = math.tanh %328 : vector<8x32xf32>
    %330 = vector.extract_strided_slice %319 {offsets = [0, 32], sizes = [8, 32], strides = [1, 1]} : vector<8x96xf32> to vector<8x32xf32>
    %331 = arith.mulf %330, %292 : vector<8x32xf32>
    %332 = vector.extract_strided_slice %319 {offsets = [0, 0], sizes = [8, 32], strides = [1, 1]} : vector<8x96xf32> to vector<8x32xf32>
    %333 = arith.mulf %332, %321 : vector<8x32xf32>
    %334 = arith.addf %331, %333 : vector<8x32xf32>
    %335 = vector.extract_strided_slice %319 {offsets = [0, 64], sizes = [8, 32], strides = [1, 1]} : vector<8x96xf32> to vector<8x32xf32>
    %336 = math.tanh %334 : vector<8x32xf32>
    %337 = arith.mulf %335, %336 : vector<8x32xf32>
    %338 = vector.extract_strided_slice %327 {offsets = [0, 32], sizes = [8, 32], strides = [1, 1]} : vector<8x96xf32> to vector<8x32xf32>
    %339 = arith.mulf %338, %300 : vector<8x32xf32>
    %340 = vector.extract_strided_slice %327 {offsets = [0, 0], sizes = [8, 32], strides = [1, 1]} : vector<8x96xf32> to vector<8x32xf32>
    %341 = arith.mulf %340, %329 : vector<8x32xf32>
    %342 = arith.addf %339, %341 : vector<8x32xf32>
    %343 = vector.extract_strided_slice %327 {offsets = [0, 64], sizes = [8, 32], strides = [1, 1]} : vector<8x96xf32> to vector<8x32xf32>
    %344 = math.tanh %342 : vector<8x32xf32>
    %345 = arith.mulf %343, %344 : vector<8x32xf32>
    %c56_89 = arith.constant 56 : index
    %c0_90 = arith.constant 0 : index
    %346 = vector.load %arg10[%c56_89, %c0_90] : memref<64x64xf32, #tpu.memory_space<vmem>>, vector<8x32xf32>
    tpu.vector_store %arg10[%c56_89, %c0_90], %337 {strides = array<i32>} : memref<64x64xf32, #tpu.memory_space<vmem>>, vector<8x32xf32>,
    %c0_91 = arith.constant 0 : index
    %c32_92 = arith.constant 32 : index
    %347 = vector.load %arg10[%c0_91, %c32_92] : memref<64x64xf32, #tpu.memory_space<vmem>>, vector<8x32xf32>
    tpu.vector_store %arg10[%c0_91, %c32_92], %345 {strides = array<i32>} : memref<64x64xf32, #tpu.memory_space<vmem>>, vector<8x32xf32>,
    %c0_93 = arith.constant 0 : index
    %c0_94 = arith.constant 0 : index
    %348 = vector.load %arg10[%c0_93, %c0_94] : memref<64x64xf32, #tpu.memory_space<vmem>>, vector<64x64xf32>
    %c0_95 = arith.constant 0 : index
    %c0_96 = arith.constant 0 : index
    %349 = vector.load %arg4[%c0_95, %c0_96] : memref<64x256xf32, #tpu.memory_space<vmem>>, vector<64x256xf32>
    %cst_97 = arith.constant dense<0.000000e+00> : vector<64x256xf32>
    %350 = tpu.matmul %348, %349, %cst_97 {dimension_numbers = #tpu.dot_dimension_numbers<[1], [0], [0], [1], [0, 0, 1, 1], [], []>} : vector<64x64xf32>, vector<64x256xf32>, vector<64x256xf32> -> vector<64x256xf32>
    %c0_98 = arith.constant 0 : index
    %c0_99 = arith.constant 0 : index
    %351 = vector.load %arg6[%c0_98, %c0_99] : memref<1x256xf32, #tpu.memory_space<vmem>>, vector<1x256xf32>
    %352 = vector.broadcast %351 : vector<1x256xf32> to vector<64x256xf32>
    %353 = arith.addf %350, %352 : vector<64x256xf32>
    %c0_100 = arith.constant 0 : index
    %c0_101 = arith.constant 0 : index
    %354 = vector.load %arg11[%c0_100, %c0_101] : memref<64x256xf32, #tpu.memory_space<vmem>>, vector<64x256xf32>
    tpu.vector_store %arg11[%c0_100, %c0_101], %353 {strides = array<i32>} : memref<64x256xf32, #tpu.memory_space<vmem>>, vector<64x256xf32>,
    %c0_102 = arith.constant 0 : index
    %c0_103 = arith.constant 0 : index
    %355 = vector.load %arg5[%c0_102, %c0_103] : memref<64x256xf32, #tpu.memory_space<vmem>>, vector<64x256xf32>
    %cst_104 = arith.constant 0.000000e+00 : f32
    %356 = vector.broadcast %cst_104 : f32 to vector<8x32xf32>
    %cst_105 = arith.constant 0.000000e+00 : f32
    %357 = vector.broadcast %cst_105 : f32 to vector<8x32xf32>
    %cst_106 = arith.constant 0.000000e+00 : f32
    %358 = vector.broadcast %cst_106 : f32 to vector<8x32xf32>
    %cst_107 = arith.constant 0.000000e+00 : f32
    %359 = vector.broadcast %cst_107 : f32 to vector<8x32xf32>
    %360 = tpu.concatenate %356, %358 in 1 : vector<8x32xf32>, vector<8x32xf32> -> vector<8x64xf32>
    %cst_108 = arith.constant dense<0.000000e+00> : vector<8x256xf32>
    %361 = tpu.matmul %360, %355, %cst_108 {dimension_numbers = #tpu.dot_dimension_numbers<[1], [0], [0], [1], [0, 0, 1, 1], [], []>} : vector<8x64xf32>, vector<64x256xf32>, vector<8x256xf32> -> vector<8x256xf32>
    %c0_109 = arith.constant 0 : index
    %c0_110 = arith.constant 0 : index
    %362 = vector.load %arg11[%c0_109, %c0_110] : memref<64x256xf32, #tpu.memory_space<vmem>>, vector<8x128xf32>
    %363 = vector.extract_strided_slice %361 {offsets = [0, 0], sizes = [8, 128], strides = [1, 1]} : vector<8x256xf32> to vector<8x128xf32>
    %364 = arith.addf %362, %363 : vector<8x128xf32>
    %c56_111 = arith.constant 56 : index
    %c128_112 = arith.constant 128 : index
    %365 = vector.load %arg11[%c56_111, %c128_112] : memref<64x256xf32, #tpu.memory_space<vmem>>, vector<8x128xf32>
    %366 = vector.extract_strided_slice %361 {offsets = [0, 128], sizes = [8, 128], strides = [1, 1]} : vector<8x256xf32> to vector<8x128xf32>
    %367 = arith.addf %365, %366 : vector<8x128xf32>
    %368 = vector.extract_strided_slice %364 {offsets = [0, 0], sizes = [8, 96], strides = [1, 1]} : vector<8x128xf32> to vector<8x96xf32>
    %369 = arith.negf %368 : vector<8x96xf32>
    %370 = math.exp %369 : vector<8x96xf32>
    %cst_113 = arith.constant 1.000000e+00 : f32
    %371 = vector.broadcast %cst_113 : f32 to vector<8x96xf32>
    %372 = arith.addf %371, %370 : vector<8x96xf32>
    %373 = arith.divf %371, %372 : vector<8x96xf32>
    %374 = vector.extract_strided_slice %364 {offsets = [0, 96], sizes = [8, 32], strides = [1, 1]} : vector<8x128xf32> to vector<8x32xf32>
    %375 = math.tanh %374 : vector<8x32xf32>
    %376 = vector.extract_strided_slice %367 {offsets = [0, 0], sizes = [8, 96], strides = [1, 1]} : vector<8x128xf32> to vector<8x96xf32>
    %377 = arith.negf %376 : vector<8x96xf32>
    %378 = math.exp %377 : vector<8x96xf32>
    %cst_114 = arith.constant 1.000000e+00 : f32
    %379 = vector.broadcast %cst_114 : f32 to vector<8x96xf32>
    %380 = arith.addf %379, %378 : vector<8x96xf32>
    %381 = arith.divf %379, %380 : vector<8x96xf32>
    %382 = vector.extract_strided_slice %367 {offsets = [0, 96], sizes = [8, 32], strides = [1, 1]} : vector<8x128xf32> to vector<8x32xf32>
    %383 = math.tanh %382 : vector<8x32xf32>
    %384 = vector.extract_strided_slice %373 {offsets = [0, 32], sizes = [8, 32], strides = [1, 1]} : vector<8x96xf32> to vector<8x32xf32>
    %385 = arith.mulf %384, %357 : vector<8x32xf32>
    %386 = vector.extract_strided_slice %373 {offsets = [0, 0], sizes = [8, 32], strides = [1, 1]} : vector<8x96xf32> to vector<8x32xf32>
    %387 = arith.mulf %386, %375 : vector<8x32xf32>
    %388 = arith.addf %385, %387 : vector<8x32xf32>
    %389 = vector.extract_strided_slice %373 {offsets = [0, 64], sizes = [8, 32], strides = [1, 1]} : vector<8x96xf32> to vector<8x32xf32>
    %390 = math.tanh %388 : vector<8x32xf32>
    %391 = arith.mulf %389, %390 : vector<8x32xf32>
    %392 = vector.extract_strided_slice %381 {offsets = [0, 32], sizes = [8, 32], strides = [1, 1]} : vector<8x96xf32> to vector<8x32xf32>
    %393 = arith.mulf %392, %359 : vector<8x32xf32>
    %394 = vector.extract_strided_slice %381 {offsets = [0, 0], sizes = [8, 32], strides = [1, 1]} : vector<8x96xf32> to vector<8x32xf32>
    %395 = arith.mulf %394, %383 : vector<8x32xf32>
    %396 = arith.addf %393, %395 : vector<8x32xf32>
    %397 = vector.extract_strided_slice %381 {offsets = [0, 64], sizes = [8, 32], strides = [1, 1]} : vector<8x96xf32> to vector<8x32xf32>
    %398 = math.tanh %396 : vector<8x32xf32>
    %399 = arith.mulf %397, %398 : vector<8x32xf32>
    %c0_115 = arith.constant 0 : index
    %c0_116 = arith.constant 0 : index
    %400 = vector.load %arg10[%c0_115, %c0_116] : memref<64x64xf32, #tpu.memory_space<vmem>>, vector<8x32xf32>
    tpu.vector_store %arg10[%c0_115, %c0_116], %391 {strides = array<i32>} : memref<64x64xf32, #tpu.memory_space<vmem>>, vector<8x32xf32>,
    %c56_117 = arith.constant 56 : index
    %c32_118 = arith.constant 32 : index
    %401 = vector.load %arg10[%c56_117, %c32_118] : memref<64x64xf32, #tpu.memory_space<vmem>>, vector<8x32xf32>
    tpu.vector_store %arg10[%c56_117, %c32_118], %399 {strides = array<i32>} : memref<64x64xf32, #tpu.memory_space<vmem>>, vector<8x32xf32>,
    %402 = tpu.concatenate %391, %399 in 1 : vector<8x32xf32>, vector<8x32xf32> -> vector<8x64xf32>
    %cst_119 = arith.constant dense<0.000000e+00> : vector<8x256xf32>
    %403 = tpu.matmul %402, %355, %cst_119 {dimension_numbers = #tpu.dot_dimension_numbers<[1], [0], [0], [1], [0, 0, 1, 1], [], []>} : vector<8x64xf32>, vector<64x256xf32>, vector<8x256xf32> -> vector<8x256xf32>
    %c8_120 = arith.constant 8 : index
    %c0_121 = arith.constant 0 : index
    %404 = vector.load %arg11[%c8_120, %c0_121] : memref<64x256xf32, #tpu.memory_space<vmem>>, vector<8x128xf32>
    %405 = vector.extract_strided_slice %403 {offsets = [0, 0], sizes = [8, 128], strides = [1, 1]} : vector<8x256xf32> to vector<8x128xf32>
    %406 = arith.addf %404, %405 : vector<8x128xf32>
    %c48_122 = arith.constant 48 : index
    %c128_123 = arith.constant 128 : index
    %407 = vector.load %arg11[%c48_122, %c128_123] : memref<64x256xf32, #tpu.memory_space<vmem>>, vector<8x128xf32>
    %408 = vector.extract_strided_slice %403 {offsets = [0, 128], sizes = [8, 128], strides = [1, 1]} : vector<8x256xf32> to vector<8x128xf32>
    %409 = arith.addf %407, %408 : vector<8x128xf32>
    %410 = vector.extract_strided_slice %406 {offsets = [0, 0], sizes = [8, 96], strides = [1, 1]} : vector<8x128xf32> to vector<8x96xf32>
    %411 = arith.negf %410 : vector<8x96xf32>
    %412 = math.exp %411 : vector<8x96xf32>
    %cst_124 = arith.constant 1.000000e+00 : f32
    %413 = vector.broadcast %cst_124 : f32 to vector<8x96xf32>
    %414 = arith.addf %413, %412 : vector<8x96xf32>
    %415 = arith.divf %413, %414 : vector<8x96xf32>
    %416 = vector.extract_strided_slice %406 {offsets = [0, 96], sizes = [8, 32], strides = [1, 1]} : vector<8x128xf32> to vector<8x32xf32>
    %417 = math.tanh %416 : vector<8x32xf32>
    %418 = vector.extract_strided_slice %409 {offsets = [0, 0], sizes = [8, 96], strides = [1, 1]} : vector<8x128xf32> to vector<8x96xf32>
    %419 = arith.negf %418 : vector<8x96xf32>
    %420 = math.exp %419 : vector<8x96xf32>
    %cst_125 = arith.constant 1.000000e+00 : f32
    %421 = vector.broadcast %cst_125 : f32 to vector<8x96xf32>
    %422 = arith.addf %421, %420 : vector<8x96xf32>
    %423 = arith.divf %421, %422 : vector<8x96xf32>
    %424 = vector.extract_strided_slice %409 {offsets = [0, 96], sizes = [8, 32], strides = [1, 1]} : vector<8x128xf32> to vector<8x32xf32>
    %425 = math.tanh %424 : vector<8x32xf32>
    %426 = vector.extract_strided_slice %415 {offsets = [0, 32], sizes = [8, 32], strides = [1, 1]} : vector<8x96xf32> to vector<8x32xf32>
    %427 = arith.mulf %426, %388 : vector<8x32xf32>
    %428 = vector.extract_strided_slice %415 {offsets = [0, 0], sizes = [8, 32], strides = [1, 1]} : vector<8x96xf32> to vector<8x32xf32>
    %429 = arith.mulf %428, %417 : vector<8x32xf32>
    %430 = arith.addf %427, %429 : vector<8x32xf32>
    %431 = vector.extract_strided_slice %415 {offsets = [0, 64], sizes = [8, 32], strides = [1, 1]} : vector<8x96xf32> to vector<8x32xf32>
    %432 = math.tanh %430 : vector<8x32xf32>
    %433 = arith.mulf %431, %432 : vector<8x32xf32>
    %434 = vector.extract_strided_slice %423 {offsets = [0, 32], sizes = [8, 32], strides = [1, 1]} : vector<8x96xf32> to vector<8x32xf32>
    %435 = arith.mulf %434, %396 : vector<8x32xf32>
    %436 = vector.extract_strided_slice %423 {offsets = [0, 0], sizes = [8, 32], strides = [1, 1]} : vector<8x96xf32> to vector<8x32xf32>
    %437 = arith.mulf %436, %425 : vector<8x32xf32>
    %438 = arith.addf %435, %437 : vector<8x32xf32>
    %439 = vector.extract_strided_slice %423 {offsets = [0, 64], sizes = [8, 32], strides = [1, 1]} : vector<8x96xf32> to vector<8x32xf32>
    %440 = math.tanh %438 : vector<8x32xf32>
    %441 = arith.mulf %439, %440 : vector<8x32xf32>
    %c8_126 = arith.constant 8 : index
    %c0_127 = arith.constant 0 : index
    %442 = vector.load %arg10[%c8_126, %c0_127] : memref<64x64xf32, #tpu.memory_space<vmem>>, vector<8x32xf32>
    tpu.vector_store %arg10[%c8_126, %c0_127], %433 {strides = array<i32>} : memref<64x64xf32, #tpu.memory_space<vmem>>, vector<8x32xf32>,
    %c48_128 = arith.constant 48 : index
    %c32_129 = arith.constant 32 : index
    %443 = vector.load %arg10[%c48_128, %c32_129] : memref<64x64xf32, #tpu.memory_space<vmem>>, vector<8x32xf32>
    tpu.vector_store %arg10[%c48_128, %c32_129], %441 {strides = array<i32>} : memref<64x64xf32, #tpu.memory_space<vmem>>, vector<8x32xf32>,
    %444 = tpu.concatenate %433, %441 in 1 : vector<8x32xf32>, vector<8x32xf32> -> vector<8x64xf32>
    %cst_130 = arith.constant dense<0.000000e+00> : vector<8x256xf32>
    %445 = tpu.matmul %444, %355, %cst_130 {dimension_numbers = #tpu.dot_dimension_numbers<[1], [0], [0], [1], [0, 0, 1, 1], [], []>} : vector<8x64xf32>, vector<64x256xf32>, vector<8x256xf32> -> vector<8x256xf32>
    %c16_131 = arith.constant 16 : index
    %c0_132 = arith.constant 0 : index
    %446 = vector.load %arg11[%c16_131, %c0_132] : memref<64x256xf32, #tpu.memory_space<vmem>>, vector<8x128xf32>
    %447 = vector.extract_strided_slice %445 {offsets = [0, 0], sizes = [8, 128], strides = [1, 1]} : vector<8x256xf32> to vector<8x128xf32>
    %448 = arith.addf %446, %447 : vector<8x128xf32>
    %c40_133 = arith.constant 40 : index
    %c128_134 = arith.constant 128 : index
    %449 = vector.load %arg11[%c40_133, %c128_134] : memref<64x256xf32, #tpu.memory_space<vmem>>, vector<8x128xf32>
    %450 = vector.extract_strided_slice %445 {offsets = [0, 128], sizes = [8, 128], strides = [1, 1]} : vector<8x256xf32> to vector<8x128xf32>
    %451 = arith.addf %449, %450 : vector<8x128xf32>
    %452 = vector.extract_strided_slice %448 {offsets = [0, 0], sizes = [8, 96], strides = [1, 1]} : vector<8x128xf32> to vector<8x96xf32>
    %453 = arith.negf %452 : vector<8x96xf32>
    %454 = math.exp %453 : vector<8x96xf32>
    %cst_135 = arith.constant 1.000000e+00 : f32
    %455 = vector.broadcast %cst_135 : f32 to vector<8x96xf32>
    %456 = arith.addf %455, %454 : vector<8x96xf32>
    %457 = arith.divf %455, %456 : vector<8x96xf32>
    %458 = vector.extract_strided_slice %448 {offsets = [0, 96], sizes = [8, 32], strides = [1, 1]} : vector<8x128xf32> to vector<8x32xf32>
    %459 = math.tanh %458 : vector<8x32xf32>
    %460 = vector.extract_strided_slice %451 {offsets = [0, 0], sizes = [8, 96], strides = [1, 1]} : vector<8x128xf32> to vector<8x96xf32>
    %461 = arith.negf %460 : vector<8x96xf32>
    %462 = math.exp %461 : vector<8x96xf32>
    %cst_136 = arith.constant 1.000000e+00 : f32
    %463 = vector.broadcast %cst_136 : f32 to vector<8x96xf32>
    %464 = arith.addf %463, %462 : vector<8x96xf32>
    %465 = arith.divf %463, %464 : vector<8x96xf32>
    %466 = vector.extract_strided_slice %451 {offsets = [0, 96], sizes = [8, 32], strides = [1, 1]} : vector<8x128xf32> to vector<8x32xf32>
    %467 = math.tanh %466 : vector<8x32xf32>
    %468 = vector.extract_strided_slice %457 {offsets = [0, 32], sizes = [8, 32], strides = [1, 1]} : vector<8x96xf32> to vector<8x32xf32>
    %469 = arith.mulf %468, %430 : vector<8x32xf32>
    %470 = vector.extract_strided_slice %457 {offsets = [0, 0], sizes = [8, 32], strides = [1, 1]} : vector<8x96xf32> to vector<8x32xf32>
    %471 = arith.mulf %470, %459 : vector<8x32xf32>
    %472 = arith.addf %469, %471 : vector<8x32xf32>
    %473 = vector.extract_strided_slice %457 {offsets = [0, 64], sizes = [8, 32], strides = [1, 1]} : vector<8x96xf32> to vector<8x32xf32>
    %474 = math.tanh %472 : vector<8x32xf32>
    %475 = arith.mulf %473, %474 : vector<8x32xf32>
    %476 = vector.extract_strided_slice %465 {offsets = [0, 32], sizes = [8, 32], strides = [1, 1]} : vector<8x96xf32> to vector<8x32xf32>
    %477 = arith.mulf %476, %438 : vector<8x32xf32>
    %478 = vector.extract_strided_slice %465 {offsets = [0, 0], sizes = [8, 32], strides = [1, 1]} : vector<8x96xf32> to vector<8x32xf32>
    %479 = arith.mulf %478, %467 : vector<8x32xf32>
    %480 = arith.addf %477, %479 : vector<8x32xf32>
    %481 = vector.extract_strided_slice %465 {offsets = [0, 64], sizes = [8, 32], strides = [1, 1]} : vector<8x96xf32> to vector<8x32xf32>
    %482 = math.tanh %480 : vector<8x32xf32>
    %483 = arith.mulf %481, %482 : vector<8x32xf32>
    %c16_137 = arith.constant 16 : index
    %c0_138 = arith.constant 0 : index
    %484 = vector.load %arg10[%c16_137, %c0_138] : memref<64x64xf32, #tpu.memory_space<vmem>>, vector<8x32xf32>
    tpu.vector_store %arg10[%c16_137, %c0_138], %475 {strides = array<i32>} : memref<64x64xf32, #tpu.memory_space<vmem>>, vector<8x32xf32>,
    %c40_139 = arith.constant 40 : index
    %c32_140 = arith.constant 32 : index
    %485 = vector.load %arg10[%c40_139, %c32_140] : memref<64x64xf32, #tpu.memory_space<vmem>>, vector<8x32xf32>
    tpu.vector_store %arg10[%c40_139, %c32_140], %483 {strides = array<i32>} : memref<64x64xf32, #tpu.memory_space<vmem>>, vector<8x32xf32>,
    %486 = tpu.concatenate %475, %483 in 1 : vector<8x32xf32>, vector<8x32xf32> -> vector<8x64xf32>
    %cst_141 = arith.constant dense<0.000000e+00> : vector<8x256xf32>
    %487 = tpu.matmul %486, %355, %cst_141 {dimension_numbers = #tpu.dot_dimension_numbers<[1], [0], [0], [1], [0, 0, 1, 1], [], []>} : vector<8x64xf32>, vector<64x256xf32>, vector<8x256xf32> -> vector<8x256xf32>
    %c24_142 = arith.constant 24 : index
    %c0_143 = arith.constant 0 : index
    %488 = vector.load %arg11[%c24_142, %c0_143] : memref<64x256xf32, #tpu.memory_space<vmem>>, vector<8x128xf32>
    %489 = vector.extract_strided_slice %487 {offsets = [0, 0], sizes = [8, 128], strides = [1, 1]} : vector<8x256xf32> to vector<8x128xf32>
    %490 = arith.addf %488, %489 : vector<8x128xf32>
    %c32_144 = arith.constant 32 : index
    %c128_145 = arith.constant 128 : index
    %491 = vector.load %arg11[%c32_144, %c128_145] : memref<64x256xf32, #tpu.memory_space<vmem>>, vector<8x128xf32>
    %492 = vector.extract_strided_slice %487 {offsets = [0, 128], sizes = [8, 128], strides = [1, 1]} : vector<8x256xf32> to vector<8x128xf32>
    %493 = arith.addf %491, %492 : vector<8x128xf32>
    %494 = vector.extract_strided_slice %490 {offsets = [0, 0], sizes = [8, 96], strides = [1, 1]} : vector<8x128xf32> to vector<8x96xf32>
    %495 = arith.negf %494 : vector<8x96xf32>
    %496 = math.exp %495 : vector<8x96xf32>
    %cst_146 = arith.constant 1.000000e+00 : f32
    %497 = vector.broadcast %cst_146 : f32 to vector<8x96xf32>
    %498 = arith.addf %497, %496 : vector<8x96xf32>
    %499 = arith.divf %497, %498 : vector<8x96xf32>
    %500 = vector.extract_strided_slice %490 {offsets = [0, 96], sizes = [8, 32], strides = [1, 1]} : vector<8x128xf32> to vector<8x32xf32>
    %501 = math.tanh %500 : vector<8x32xf32>
    %502 = vector.extract_strided_slice %493 {offsets = [0, 0], sizes = [8, 96], strides = [1, 1]} : vector<8x128xf32> to vector<8x96xf32>
    %503 = arith.negf %502 : vector<8x96xf32>
    %504 = math.exp %503 : vector<8x96xf32>
    %cst_147 = arith.constant 1.000000e+00 : f32
    %505 = vector.broadcast %cst_147 : f32 to vector<8x96xf32>
    %506 = arith.addf %505, %504 : vector<8x96xf32>
    %507 = arith.divf %505, %506 : vector<8x96xf32>
    %508 = vector.extract_strided_slice %493 {offsets = [0, 96], sizes = [8, 32], strides = [1, 1]} : vector<8x128xf32> to vector<8x32xf32>
    %509 = math.tanh %508 : vector<8x32xf32>
    %510 = vector.extract_strided_slice %499 {offsets = [0, 32], sizes = [8, 32], strides = [1, 1]} : vector<8x96xf32> to vector<8x32xf32>
    %511 = arith.mulf %510, %472 : vector<8x32xf32>
    %512 = vector.extract_strided_slice %499 {offsets = [0, 0], sizes = [8, 32], strides = [1, 1]} : vector<8x96xf32> to vector<8x32xf32>
    %513 = arith.mulf %512, %501 : vector<8x32xf32>
    %514 = arith.addf %511, %513 : vector<8x32xf32>
    %515 = vector.extract_strided_slice %499 {offsets = [0, 64], sizes = [8, 32], strides = [1, 1]} : vector<8x96xf32> to vector<8x32xf32>
    %516 = math.tanh %514 : vector<8x32xf32>
    %517 = arith.mulf %515, %516 : vector<8x32xf32>
    %518 = vector.extract_strided_slice %507 {offsets = [0, 32], sizes = [8, 32], strides = [1, 1]} : vector<8x96xf32> to vector<8x32xf32>
    %519 = arith.mulf %518, %480 : vector<8x32xf32>
    %520 = vector.extract_strided_slice %507 {offsets = [0, 0], sizes = [8, 32], strides = [1, 1]} : vector<8x96xf32> to vector<8x32xf32>
    %521 = arith.mulf %520, %509 : vector<8x32xf32>
    %522 = arith.addf %519, %521 : vector<8x32xf32>
    %523 = vector.extract_strided_slice %507 {offsets = [0, 64], sizes = [8, 32], strides = [1, 1]} : vector<8x96xf32> to vector<8x32xf32>
    %524 = math.tanh %522 : vector<8x32xf32>
    %525 = arith.mulf %523, %524 : vector<8x32xf32>
    %c24_148 = arith.constant 24 : index
    %c0_149 = arith.constant 0 : index
    %526 = vector.load %arg10[%c24_148, %c0_149] : memref<64x64xf32, #tpu.memory_space<vmem>>, vector<8x32xf32>
    tpu.vector_store %arg10[%c24_148, %c0_149], %517 {strides = array<i32>} : memref<64x64xf32, #tpu.memory_space<vmem>>, vector<8x32xf32>,
    %c32_150 = arith.constant 32 : index
    %c32_151 = arith.constant 32 : index
    %527 = vector.load %arg10[%c32_150, %c32_151] : memref<64x64xf32, #tpu.memory_space<vmem>>, vector<8x32xf32>
    tpu.vector_store %arg10[%c32_150, %c32_151], %525 {strides = array<i32>} : memref<64x64xf32, #tpu.memory_space<vmem>>, vector<8x32xf32>,
    %528 = tpu.concatenate %517, %525 in 1 : vector<8x32xf32>, vector<8x32xf32> -> vector<8x64xf32>
    %cst_152 = arith.constant dense<0.000000e+00> : vector<8x256xf32>
    %529 = tpu.matmul %528, %355, %cst_152 {dimension_numbers = #tpu.dot_dimension_numbers<[1], [0], [0], [1], [0, 0, 1, 1], [], []>} : vector<8x64xf32>, vector<64x256xf32>, vector<8x256xf32> -> vector<8x256xf32>
    %c32_153 = arith.constant 32 : index
    %c0_154 = arith.constant 0 : index
    %530 = vector.load %arg11[%c32_153, %c0_154] : memref<64x256xf32, #tpu.memory_space<vmem>>, vector<8x128xf32>
    %531 = vector.extract_strided_slice %529 {offsets = [0, 0], sizes = [8, 128], strides = [1, 1]} : vector<8x256xf32> to vector<8x128xf32>
    %532 = arith.addf %530, %531 : vector<8x128xf32>
    %c24_155 = arith.constant 24 : index
    %c128_156 = arith.constant 128 : index
    %533 = vector.load %arg11[%c24_155, %c128_156] : memref<64x256xf32, #tpu.memory_space<vmem>>, vector<8x128xf32>
    %534 = vector.extract_strided_slice %529 {offsets = [0, 128], sizes = [8, 128], strides = [1, 1]} : vector<8x256xf32> to vector<8x128xf32>
    %535 = arith.addf %533, %534 : vector<8x128xf32>
    %536 = vector.extract_strided_slice %532 {offsets = [0, 0], sizes = [8, 96], strides = [1, 1]} : vector<8x128xf32> to vector<8x96xf32>
    %537 = arith.negf %536 : vector<8x96xf32>
    %538 = math.exp %537 : vector<8x96xf32>
    %cst_157 = arith.constant 1.000000e+00 : f32
    %539 = vector.broadcast %cst_157 : f32 to vector<8x96xf32>
    %540 = arith.addf %539, %538 : vector<8x96xf32>
    %541 = arith.divf %539, %540 : vector<8x96xf32>
    %542 = vector.extract_strided_slice %532 {offsets = [0, 96], sizes = [8, 32], strides = [1, 1]} : vector<8x128xf32> to vector<8x32xf32>
    %543 = math.tanh %542 : vector<8x32xf32>
    %544 = vector.extract_strided_slice %535 {offsets = [0, 0], sizes = [8, 96], strides = [1, 1]} : vector<8x128xf32> to vector<8x96xf32>
    %545 = arith.negf %544 : vector<8x96xf32>
    %546 = math.exp %545 : vector<8x96xf32>
    %cst_158 = arith.constant 1.000000e+00 : f32
    %547 = vector.broadcast %cst_158 : f32 to vector<8x96xf32>
    %548 = arith.addf %547, %546 : vector<8x96xf32>
    %549 = arith.divf %547, %548 : vector<8x96xf32>
    %550 = vector.extract_strided_slice %535 {offsets = [0, 96], sizes = [8, 32], strides = [1, 1]} : vector<8x128xf32> to vector<8x32xf32>
    %551 = math.tanh %550 : vector<8x32xf32>
    %552 = vector.extract_strided_slice %541 {offsets = [0, 32], sizes = [8, 32], strides = [1, 1]} : vector<8x96xf32> to vector<8x32xf32>
    %553 = arith.mulf %552, %514 : vector<8x32xf32>
    %554 = vector.extract_strided_slice %541 {offsets = [0, 0], sizes = [8, 32], strides = [1, 1]} : vector<8x96xf32> to vector<8x32xf32>
    %555 = arith.mulf %554, %543 : vector<8x32xf32>
    %556 = arith.addf %553, %555 : vector<8x32xf32>
    %557 = vector.extract_strided_slice %541 {offsets = [0, 64], sizes = [8, 32], strides = [1, 1]} : vector<8x96xf32> to vector<8x32xf32>
    %558 = math.tanh %556 : vector<8x32xf32>
    %559 = arith.mulf %557, %558 : vector<8x32xf32>
    %560 = vector.extract_strided_slice %549 {offsets = [0, 32], sizes = [8, 32], strides = [1, 1]} : vector<8x96xf32> to vector<8x32xf32>
    %561 = arith.mulf %560, %522 : vector<8x32xf32>
    %562 = vector.extract_strided_slice %549 {offsets = [0, 0], sizes = [8, 32], strides = [1, 1]} : vector<8x96xf32> to vector<8x32xf32>
    %563 = arith.mulf %562, %551 : vector<8x32xf32>
    %564 = arith.addf %561, %563 : vector<8x32xf32>
    %565 = vector.extract_strided_slice %549 {offsets = [0, 64], sizes = [8, 32], strides = [1, 1]} : vector<8x96xf32> to vector<8x32xf32>
    %566 = math.tanh %564 : vector<8x32xf32>
    %567 = arith.mulf %565, %566 : vector<8x32xf32>
    %c32_159 = arith.constant 32 : index
    %c0_160 = arith.constant 0 : index
    %568 = vector.load %arg10[%c32_159, %c0_160] : memref<64x64xf32, #tpu.memory_space<vmem>>, vector<8x32xf32>
    tpu.vector_store %arg10[%c32_159, %c0_160], %559 {strides = array<i32>} : memref<64x64xf32, #tpu.memory_space<vmem>>, vector<8x32xf32>,
    %c24_161 = arith.constant 24 : index
    %c32_162 = arith.constant 32 : index
    %569 = vector.load %arg10[%c24_161, %c32_162] : memref<64x64xf32, #tpu.memory_space<vmem>>, vector<8x32xf32>
    tpu.vector_store %arg10[%c24_161, %c32_162], %567 {strides = array<i32>} : memref<64x64xf32, #tpu.memory_space<vmem>>, vector<8x32xf32>,
    %570 = tpu.concatenate %559, %567 in 1 : vector<8x32xf32>, vector<8x32xf32> -> vector<8x64xf32>
    %cst_163 = arith.constant dense<0.000000e+00> : vector<8x256xf32>
    %571 = tpu.matmul %570, %355, %cst_163 {dimension_numbers = #tpu.dot_dimension_numbers<[1], [0], [0], [1], [0, 0, 1, 1], [], []>} : vector<8x64xf32>, vector<64x256xf32>, vector<8x256xf32> -> vector<8x256xf32>
    %c40_164 = arith.constant 40 : index
    %c0_165 = arith.constant 0 : index
    %572 = vector.load %arg11[%c40_164, %c0_165] : memref<64x256xf32, #tpu.memory_space<vmem>>, vector<8x128xf32>
    %573 = vector.extract_strided_slice %571 {offsets = [0, 0], sizes = [8, 128], strides = [1, 1]} : vector<8x256xf32> to vector<8x128xf32>
    %574 = arith.addf %572, %573 : vector<8x128xf32>
    %c16_166 = arith.constant 16 : index
    %c128_167 = arith.constant 128 : index
    %575 = vector.load %arg11[%c16_166, %c128_167] : memref<64x256xf32, #tpu.memory_space<vmem>>, vector<8x128xf32>
    %576 = vector.extract_strided_slice %571 {offsets = [0, 128], sizes = [8, 128], strides = [1, 1]} : vector<8x256xf32> to vector<8x128xf32>
    %577 = arith.addf %575, %576 : vector<8x128xf32>
    %578 = vector.extract_strided_slice %574 {offsets = [0, 0], sizes = [8, 96], strides = [1, 1]} : vector<8x128xf32> to vector<8x96xf32>
    %579 = arith.negf %578 : vector<8x96xf32>
    %580 = math.exp %579 : vector<8x96xf32>
    %cst_168 = arith.constant 1.000000e+00 : f32
    %581 = vector.broadcast %cst_168 : f32 to vector<8x96xf32>
    %582 = arith.addf %581, %580 : vector<8x96xf32>
    %583 = arith.divf %581, %582 : vector<8x96xf32>
    %584 = vector.extract_strided_slice %574 {offsets = [0, 96], sizes = [8, 32], strides = [1, 1]} : vector<8x128xf32> to vector<8x32xf32>
    %585 = math.tanh %584 : vector<8x32xf32>
    %586 = vector.extract_strided_slice %577 {offsets = [0, 0], sizes = [8, 96], strides = [1, 1]} : vector<8x128xf32> to vector<8x96xf32>
    %587 = arith.negf %586 : vector<8x96xf32>
    %588 = math.exp %587 : vector<8x96xf32>
    %cst_169 = arith.constant 1.000000e+00 : f32
    %589 = vector.broadcast %cst_169 : f32 to vector<8x96xf32>
    %590 = arith.addf %589, %588 : vector<8x96xf32>
    %591 = arith.divf %589, %590 : vector<8x96xf32>
    %592 = vector.extract_strided_slice %577 {offsets = [0, 96], sizes = [8, 32], strides = [1, 1]} : vector<8x128xf32> to vector<8x32xf32>
    %593 = math.tanh %592 : vector<8x32xf32>
    %594 = vector.extract_strided_slice %583 {offsets = [0, 32], sizes = [8, 32], strides = [1, 1]} : vector<8x96xf32> to vector<8x32xf32>
    %595 = arith.mulf %594, %556 : vector<8x32xf32>
    %596 = vector.extract_strided_slice %583 {offsets = [0, 0], sizes = [8, 32], strides = [1, 1]} : vector<8x96xf32> to vector<8x32xf32>
    %597 = arith.mulf %596, %585 : vector<8x32xf32>
    %598 = arith.addf %595, %597 : vector<8x32xf32>
    %599 = vector.extract_strided_slice %583 {offsets = [0, 64], sizes = [8, 32], strides = [1, 1]} : vector<8x96xf32> to vector<8x32xf32>
    %600 = math.tanh %598 : vector<8x32xf32>
    %601 = arith.mulf %599, %600 : vector<8x32xf32>
    %602 = vector.extract_strided_slice %591 {offsets = [0, 32], sizes = [8, 32], strides = [1, 1]} : vector<8x96xf32> to vector<8x32xf32>
    %603 = arith.mulf %602, %564 : vector<8x32xf32>
    %604 = vector.extract_strided_slice %591 {offsets = [0, 0], sizes = [8, 32], strides = [1, 1]} : vector<8x96xf32> to vector<8x32xf32>
    %605 = arith.mulf %604, %593 : vector<8x32xf32>
    %606 = arith.addf %603, %605 : vector<8x32xf32>
    %607 = vector.extract_strided_slice %591 {offsets = [0, 64], sizes = [8, 32], strides = [1, 1]} : vector<8x96xf32> to vector<8x32xf32>
    %608 = math.tanh %606 : vector<8x32xf32>
    %609 = arith.mulf %607, %608 : vector<8x32xf32>
    %c40_170 = arith.constant 40 : index
    %c0_171 = arith.constant 0 : index
    %610 = vector.load %arg10[%c40_170, %c0_171] : memref<64x64xf32, #tpu.memory_space<vmem>>, vector<8x32xf32>
    tpu.vector_store %arg10[%c40_170, %c0_171], %601 {strides = array<i32>} : memref<64x64xf32, #tpu.memory_space<vmem>>, vector<8x32xf32>,
    %c16_172 = arith.constant 16 : index
    %c32_173 = arith.constant 32 : index
    %611 = vector.load %arg10[%c16_172, %c32_173] : memref<64x64xf32, #tpu.memory_space<vmem>>, vector<8x32xf32>
    tpu.vector_store %arg10[%c16_172, %c32_173], %609 {strides = array<i32>} : memref<64x64xf32, #tpu.memory_space<vmem>>, vector<8x32xf32>,
    %612 = tpu.concatenate %601, %609 in 1 : vector<8x32xf32>, vector<8x32xf32> -> vector<8x64xf32>
    %cst_174 = arith.constant dense<0.000000e+00> : vector<8x256xf32>
    %613 = tpu.matmul %612, %355, %cst_174 {dimension_numbers = #tpu.dot_dimension_numbers<[1], [0], [0], [1], [0, 0, 1, 1], [], []>} : vector<8x64xf32>, vector<64x256xf32>, vector<8x256xf32> -> vector<8x256xf32>
    %c48_175 = arith.constant 48 : index
    %c0_176 = arith.constant 0 : index
    %614 = vector.load %arg11[%c48_175, %c0_176] : memref<64x256xf32, #tpu.memory_space<vmem>>, vector<8x128xf32>
    %615 = vector.extract_strided_slice %613 {offsets = [0, 0], sizes = [8, 128], strides = [1, 1]} : vector<8x256xf32> to vector<8x128xf32>
    %616 = arith.addf %614, %615 : vector<8x128xf32>
    %c8_177 = arith.constant 8 : index
    %c128_178 = arith.constant 128 : index
    %617 = vector.load %arg11[%c8_177, %c128_178] : memref<64x256xf32, #tpu.memory_space<vmem>>, vector<8x128xf32>
    %618 = vector.extract_strided_slice %613 {offsets = [0, 128], sizes = [8, 128], strides = [1, 1]} : vector<8x256xf32> to vector<8x128xf32>
    %619 = arith.addf %617, %618 : vector<8x128xf32>
    %620 = vector.extract_strided_slice %616 {offsets = [0, 0], sizes = [8, 96], strides = [1, 1]} : vector<8x128xf32> to vector<8x96xf32>
    %621 = arith.negf %620 : vector<8x96xf32>
    %622 = math.exp %621 : vector<8x96xf32>
    %cst_179 = arith.constant 1.000000e+00 : f32
    %623 = vector.broadcast %cst_179 : f32 to vector<8x96xf32>
    %624 = arith.addf %623, %622 : vector<8x96xf32>
    %625 = arith.divf %623, %624 : vector<8x96xf32>
    %626 = vector.extract_strided_slice %616 {offsets = [0, 96], sizes = [8, 32], strides = [1, 1]} : vector<8x128xf32> to vector<8x32xf32>
    %627 = math.tanh %626 : vector<8x32xf32>
    %628 = vector.extract_strided_slice %619 {offsets = [0, 0], sizes = [8, 96], strides = [1, 1]} : vector<8x128xf32> to vector<8x96xf32>
    %629 = arith.negf %628 : vector<8x96xf32>
    %630 = math.exp %629 : vector<8x96xf32>
    %cst_180 = arith.constant 1.000000e+00 : f32
    %631 = vector.broadcast %cst_180 : f32 to vector<8x96xf32>
    %632 = arith.addf %631, %630 : vector<8x96xf32>
    %633 = arith.divf %631, %632 : vector<8x96xf32>
    %634 = vector.extract_strided_slice %619 {offsets = [0, 96], sizes = [8, 32], strides = [1, 1]} : vector<8x128xf32> to vector<8x32xf32>
    %635 = math.tanh %634 : vector<8x32xf32>
    %636 = vector.extract_strided_slice %625 {offsets = [0, 32], sizes = [8, 32], strides = [1, 1]} : vector<8x96xf32> to vector<8x32xf32>
    %637 = arith.mulf %636, %598 : vector<8x32xf32>
    %638 = vector.extract_strided_slice %625 {offsets = [0, 0], sizes = [8, 32], strides = [1, 1]} : vector<8x96xf32> to vector<8x32xf32>
    %639 = arith.mulf %638, %627 : vector<8x32xf32>
    %640 = arith.addf %637, %639 : vector<8x32xf32>
    %641 = vector.extract_strided_slice %625 {offsets = [0, 64], sizes = [8, 32], strides = [1, 1]} : vector<8x96xf32> to vector<8x32xf32>
    %642 = math.tanh %640 : vector<8x32xf32>
    %643 = arith.mulf %641, %642 : vector<8x32xf32>
    %644 = vector.extract_strided_slice %633 {offsets = [0, 32], sizes = [8, 32], strides = [1, 1]} : vector<8x96xf32> to vector<8x32xf32>
    %645 = arith.mulf %644, %606 : vector<8x32xf32>
    %646 = vector.extract_strided_slice %633 {offsets = [0, 0], sizes = [8, 32], strides = [1, 1]} : vector<8x96xf32> to vector<8x32xf32>
    %647 = arith.mulf %646, %635 : vector<8x32xf32>
    %648 = arith.addf %645, %647 : vector<8x32xf32>
    %649 = vector.extract_strided_slice %633 {offsets = [0, 64], sizes = [8, 32], strides = [1, 1]} : vector<8x96xf32> to vector<8x32xf32>
    %650 = math.tanh %648 : vector<8x32xf32>
    %651 = arith.mulf %649, %650 : vector<8x32xf32>
    %c48_181 = arith.constant 48 : index
    %c0_182 = arith.constant 0 : index
    %652 = vector.load %arg10[%c48_181, %c0_182] : memref<64x64xf32, #tpu.memory_space<vmem>>, vector<8x32xf32>
    tpu.vector_store %arg10[%c48_181, %c0_182], %643 {strides = array<i32>} : memref<64x64xf32, #tpu.memory_space<vmem>>, vector<8x32xf32>,
    %c8_183 = arith.constant 8 : index
    %c32_184 = arith.constant 32 : index
    %653 = vector.load %arg10[%c8_183, %c32_184] : memref<64x64xf32, #tpu.memory_space<vmem>>, vector<8x32xf32>
    tpu.vector_store %arg10[%c8_183, %c32_184], %651 {strides = array<i32>} : memref<64x64xf32, #tpu.memory_space<vmem>>, vector<8x32xf32>,
    %654 = tpu.concatenate %643, %651 in 1 : vector<8x32xf32>, vector<8x32xf32> -> vector<8x64xf32>
    %cst_185 = arith.constant dense<0.000000e+00> : vector<8x256xf32>
    %655 = tpu.matmul %654, %355, %cst_185 {dimension_numbers = #tpu.dot_dimension_numbers<[1], [0], [0], [1], [0, 0, 1, 1], [], []>} : vector<8x64xf32>, vector<64x256xf32>, vector<8x256xf32> -> vector<8x256xf32>
    %c56_186 = arith.constant 56 : index
    %c0_187 = arith.constant 0 : index
    %656 = vector.load %arg11[%c56_186, %c0_187] : memref<64x256xf32, #tpu.memory_space<vmem>>, vector<8x128xf32>
    %657 = vector.extract_strided_slice %655 {offsets = [0, 0], sizes = [8, 128], strides = [1, 1]} : vector<8x256xf32> to vector<8x128xf32>
    %658 = arith.addf %656, %657 : vector<8x128xf32>
    %c0_188 = arith.constant 0 : index
    %c128_189 = arith.constant 128 : index
    %659 = vector.load %arg11[%c0_188, %c128_189] : memref<64x256xf32, #tpu.memory_space<vmem>>, vector<8x128xf32>
    %660 = vector.extract_strided_slice %655 {offsets = [0, 128], sizes = [8, 128], strides = [1, 1]} : vector<8x256xf32> to vector<8x128xf32>
    %661 = arith.addf %659, %660 : vector<8x128xf32>
    %662 = vector.extract_strided_slice %658 {offsets = [0, 0], sizes = [8, 96], strides = [1, 1]} : vector<8x128xf32> to vector<8x96xf32>
    %663 = arith.negf %662 : vector<8x96xf32>
    %664 = math.exp %663 : vector<8x96xf32>
    %cst_190 = arith.constant 1.000000e+00 : f32
    %665 = vector.broadcast %cst_190 : f32 to vector<8x96xf32>
    %666 = arith.addf %665, %664 : vector<8x96xf32>
    %667 = arith.divf %665, %666 : vector<8x96xf32>
    %668 = vector.extract_strided_slice %658 {offsets = [0, 96], sizes = [8, 32], strides = [1, 1]} : vector<8x128xf32> to vector<8x32xf32>
    %669 = math.tanh %668 : vector<8x32xf32>
    %670 = vector.extract_strided_slice %661 {offsets = [0, 0], sizes = [8, 96], strides = [1, 1]} : vector<8x128xf32> to vector<8x96xf32>
    %671 = arith.negf %670 : vector<8x96xf32>
    %672 = math.exp %671 : vector<8x96xf32>
    %cst_191 = arith.constant 1.000000e+00 : f32
    %673 = vector.broadcast %cst_191 : f32 to vector<8x96xf32>
    %674 = arith.addf %673, %672 : vector<8x96xf32>
    %675 = arith.divf %673, %674 : vector<8x96xf32>
    %676 = vector.extract_strided_slice %661 {offsets = [0, 96], sizes = [8, 32], strides = [1, 1]} : vector<8x128xf32> to vector<8x32xf32>
    %677 = math.tanh %676 : vector<8x32xf32>
    %678 = vector.extract_strided_slice %667 {offsets = [0, 32], sizes = [8, 32], strides = [1, 1]} : vector<8x96xf32> to vector<8x32xf32>
    %679 = arith.mulf %678, %640 : vector<8x32xf32>
    %680 = vector.extract_strided_slice %667 {offsets = [0, 0], sizes = [8, 32], strides = [1, 1]} : vector<8x96xf32> to vector<8x32xf32>
    %681 = arith.mulf %680, %669 : vector<8x32xf32>
    %682 = arith.addf %679, %681 : vector<8x32xf32>
    %683 = vector.extract_strided_slice %667 {offsets = [0, 64], sizes = [8, 32], strides = [1, 1]} : vector<8x96xf32> to vector<8x32xf32>
    %684 = math.tanh %682 : vector<8x32xf32>
    %685 = arith.mulf %683, %684 : vector<8x32xf32>
    %686 = vector.extract_strided_slice %675 {offsets = [0, 32], sizes = [8, 32], strides = [1, 1]} : vector<8x96xf32> to vector<8x32xf32>
    %687 = arith.mulf %686, %648 : vector<8x32xf32>
    %688 = vector.extract_strided_slice %675 {offsets = [0, 0], sizes = [8, 32], strides = [1, 1]} : vector<8x96xf32> to vector<8x32xf32>
    %689 = arith.mulf %688, %677 : vector<8x32xf32>
    %690 = arith.addf %687, %689 : vector<8x32xf32>
    %691 = vector.extract_strided_slice %675 {offsets = [0, 64], sizes = [8, 32], strides = [1, 1]} : vector<8x96xf32> to vector<8x32xf32>
    %692 = math.tanh %690 : vector<8x32xf32>
    %693 = arith.mulf %691, %692 : vector<8x32xf32>
    %c56_192 = arith.constant 56 : index
    %c0_193 = arith.constant 0 : index
    %694 = vector.load %arg10[%c56_192, %c0_193] : memref<64x64xf32, #tpu.memory_space<vmem>>, vector<8x32xf32>
    tpu.vector_store %arg10[%c56_192, %c0_193], %685 {strides = array<i32>} : memref<64x64xf32, #tpu.memory_space<vmem>>, vector<8x32xf32>,
    %c0_194 = arith.constant 0 : index
    %c32_195 = arith.constant 32 : index
    %695 = vector.load %arg10[%c0_194, %c32_195] : memref<64x64xf32, #tpu.memory_space<vmem>>, vector<8x32xf32>
    tpu.vector_store %arg10[%c0_194, %c32_195], %693 {strides = array<i32>} : memref<64x64xf32, #tpu.memory_space<vmem>>, vector<8x32xf32>,
    %c0_196 = arith.constant 0 : index
    %c0_197 = arith.constant 0 : index
    %696 = vector.load %arg10[%c0_196, %c0_197] : memref<64x64xf32, #tpu.memory_space<vmem>>, vector<64x64xf32>
    %c0_198 = arith.constant 0 : index
    %c0_199 = arith.constant 0 : index
    %697 = vector.load %arg7[%c0_198, %c0_199] : memref<64x128xf32, #tpu.memory_space<vmem>>, vector<64x128xf32>
    %cst_200 = arith.constant dense<0.000000e+00> : vector<64x128xf32>
    %698 = tpu.matmul %696, %697, %cst_200 {dimension_numbers = #tpu.dot_dimension_numbers<[1], [0], [0], [1], [0, 0, 1, 1], [], []>} : vector<64x64xf32>, vector<64x128xf32>, vector<64x128xf32> -> vector<64x128xf32>
    %c0_201 = arith.constant 0 : index
    %c0_202 = arith.constant 0 : index
    %699 = vector.load %arg8[%c0_201, %c0_202] : memref<1x128xf32, #tpu.memory_space<vmem>>, vector<1x128xf32>
    %700 = vector.broadcast %699 : vector<1x128xf32> to vector<64x128xf32>
    %701 = arith.addf %698, %700 : vector<64x128xf32>
    %cst_203 = arith.constant dense<0xFF800000> : vector<64xf32>
    %702 = vector.multi_reduction <maximumf>, %701, %cst_203 [1] : vector<64x128xf32> to vector<64xf32>
    %703 = vector.shape_cast %702 : vector<64xf32> to vector<64x1xf32>
    %704 = vector.broadcast %703 : vector<64x1xf32> to vector<64x128xf32>
    %705 = arith.subf %701, %704 : vector<64x128xf32>
    %706 = math.exp %705 : vector<64x128xf32>
    %cst_204 = arith.constant dense<0.000000e+00> : vector<64xf32>
    %707 = vector.multi_reduction <add>, %706, %cst_204 [1] : vector<64x128xf32> to vector<64xf32>
    %708 = vector.shape_cast %707 : vector<64xf32> to vector<64x1xf32>
    %709 = math.log %708 : vector<64x1xf32>
    %710 = vector.broadcast %709 : vector<64x1xf32> to vector<64x128xf32>
    %711 = arith.subf %705, %710 : vector<64x128xf32>
    %c0_205 = arith.constant 0 : index
    %c0_206 = arith.constant 0 : index
    %712 = vector.load %arg9[%c0_205, %c0_206] : memref<64x128xf32, #tpu.memory_space<vmem>>, vector<64x128xf32>
    tpu.vector_store %arg9[%c0_205, %c0_206], %711 {strides = array<i32>} : memref<64x128xf32, #tpu.memory_space<vmem>>, vector<64x128xf32>,
    return
  }
}

</mosaic_0001>

<bundles_post_ra>
// kernel: ocr_model_forward.1
= control target key start
LH: loop header
LB: loop body
LE: loop exit
PB: predicated region body
PF: predicated region fallthrough
CT: control target
= control target key end

     0   :  { %14 = vsyncpa [#allocation5], 0  ;;  %s5098_s0 = inlined_call_operand.vmem [shape: bf16[64,512], index: 0, kind: input, shape index: {}]   ;;  %s5099_s1 = inlined_call_operand.hbm [shape: bf16[512,256], index: 1, kind: input, shape index: {}]   ;;  %s5100_s2 = inlined_call_operand.vmem [shape: f32[64,256], index: 2, kind: input, shape index: {}]   ;;  %s5101_s3 = inlined_call_operand.vmem [shape: f32[1,256], index: 3, kind: input, shape index: {}]   ;;  %s5102_s4 = inlined_call_operand.vmem [shape: f32[64,256], index: 4, kind: input, shape index: {}]   ;;  %s5103_s5 = inlined_call_operand.hbm [shape: f32[64,256], index: 5, kind: input, shape index: {}]   ;;  %s5104_s6 = inlined_call_operand.vmem [shape: f32[1,256], index: 6, kind: input, shape index: {}]   ;;  %s5105_s7 = inlined_call_operand.vmem [shape: f32[64,128], index: 7, kind: input, shape index: {}]   ;;  %s5106_s8 = inlined_call_operand.hbm [shape: f32[1,128], index: 8, kind: input, shape index: {}]   ;;  %s5107_s9 = inlined_call_operand.vmem [shape: f32[64,128], index: 9, kind: output, shape index: {}]  }
   0x1   :  { %15 = vsyncpa [#allocation7], 0  ;;  %s4052_s30 = smov [#allocation6]  }
   0x2   :  { %s41_s10 = sshll.u32 %s4052_s30, 4  ;;  %s42_s10 = int_to_ptr.vmem [resolvable:$true] %s41_s10 }
   0x3   :  { %s3996_s11 = scalar_lea.vmem %s42_s10, 2048  ;;  %p4001_p1 = scmp.lt.s32.totalorder %s42_s10, %s42_s10 }
   0x4   :  { %p3997_p0 = scmp.ne.s32.totalorder %s42_s10, %s3996_s11  ;;  %p4002_p2 = scmp.lt.s32.totalorder %s3996_s11, %s3996_s11 }
   0x6   :  { %p4003_p3 = por %p4002_p2, %p4001_p1 }
   0x8   :  { %p4004_p4 = pnand %p4003_p3, %p3997_p0 }
   0xa   :  { %4007 = shalt.err (!%p4004_p4)
}
   0xb   :  { %s4053_s12 = smov 256   ;;  %s4054_s13 = smov 16  }
   0xc   :  { %47 = dma.hbm_to_vmem [thread:$0]  %s5103_s5, 2048, %s42_s10, [#allocation7], %s4053_s12, %s4053_s12, %s4054_s13  }
   0xd   :  { %s4055_s16 = smov [#allocation4]  }
   0xe   :  { %s23_s17 = sshll.u32 %s4055_s16, 4  ;;  %s24_s17 = int_to_ptr.vmem [resolvable:$true] %s23_s17 }
   0xf   :  { %s4016_s18 = scalar_lea.vmem %s24_s17, 8192  ;;  %p4021_p6 = scmp.lt.s32.totalorder %s24_s17, %s24_s17 }
  0x10   :  { %p4017_p5 = scmp.ne.s32.totalorder %s24_s17, %s4016_s18  ;;  %p4022_p7 = scmp.lt.s32.totalorder %s4016_s18, %s4016_s18 }
  0x12   :  { %p4023_p8 = por %p4022_p7, %p4021_p6 }
  0x14   :  { %p4024_p9 = pnand %p4023_p8, %p4017_p5 }
  0x16   :  { %4027 = shalt.err (!%p4024_p9)
}
  0x17   :  { %s4056_s19 = smov 128   ;;  %s4057_s20 = smov 8  }
  0x18   :  { %29 = dma.hbm_to_vmem [thread:$0]  %s5099_s1, 8192, %s24_s17, [#allocation5], %s4056_s19, %s4056_s19, %s4057_s20  }
  0x19   :  { %s4058_s23 = smov [#allocation8]  }
  0x1a   :  { %s58_s24 = sshll.u32 %s4058_s23, 4  ;;  %s59_s24 = int_to_ptr.vmem [resolvable:$true] %s58_s24 }
  0x1b   :  { %s4036_s5 = scalar_lea.vmem %s59_s24, 16  ;;  %s4040_s25 = scalar_lea.vmem %s59_s24, 32 }
  0x1c   :  { %p4037_p10 = scmp.ne.s32.totalorder %s59_s24, %s4036_s5  ;;  %p4041_p11 = scmp.lt.s32.totalorder %s59_s24, %s59_s24 }
  0x1d   :  { %p4042_p12 = scmp.lt.s32.totalorder %s4040_s25, %s4036_s5 }
  0x1f   :  { %p4043_p13 = por %p4042_p12, %p4041_p11 }
  0x21   :  { %p4044_p0 = pnand %p4043_p13, %p4037_p10 }
  0x23   :  { %4047 = shalt.err (!%p4044_p0)
}
  0x24   :  { %61 = dma.hbm_to_vmem [thread:$0]  %s5106_s8, 16, %s59_s24, [#allocation7]  }
  0x25   :  { %4048 = dma.done.wait [#allocation5], 8192  }
  0x26   :  { %4049 = vsyncadd [#allocation5], 4294959104 }
  0x27   :  { %4050 = dma.done.wait [#allocation7], 2064  }
  0x28   :  { %4051 = vsyncadd [#allocation7], 4294965232  ;;  %v3580_v0 = vld [vmem:[#allocation4 + $0x74] ss:$8 sps:$4 sm:$0xff]   ;;  %v3584_v2 = vld [vmem:[#allocation4 + $0x70] ss:$8 sps:$4 sm:$0xff]  }
  0x29   :  { %v3582_v1 = vld [vmem:[#allocation4 + $0x174] ss:$8 sps:$4 sm:$0xff]   ;;  %563 = vmatprep.subr.bf16.mxu0 %v3580_v0  ;;  %v3585_v3 = vld [vmem:[#allocation4 + $0x170] ss:$8 sps:$4 sm:$0xff]   ;;  %v3586_v4 = vld [vmem:[#allocation4 + $0x64] ss:$8 sps:$4 sm:$0xff]  }
  0x2a   :  { %636 = vmatprep.subr.bf16.mxu1 %v3582_v1  ;;  %564 = vmatpush1.bf16.msra.mxu0 %v3584_v2  ;;  %v3588_v5 = vld [vmem:[#allocation4 + $0x164] ss:$8 sps:$4 sm:$0xff]   ;;  %v3590_v6 = vld [vmem:[#allocation4 + $0x60] ss:$8 sps:$4 sm:$0xff]   ;;  %v3592_v8 = vld [vmem:[#allocation4 + $0x54] ss:$8 sps:$4 sm:$0xff]  }
  0x2b   :  { %637 = vmatpush1.bf16.msra.mxu1 %v3585_v3  ;;  %565 = vmatprep.subr.bf16.mxu0 %v3586_v4  ;;  %v3591_v7 = vld [vmem:[#allocation4 + $0x160] ss:$8 sps:$4 sm:$0xff]   ;;  %v3594_v9 = vld [vmem:[#allocation4 + $0x154] ss:$8 sps:$4 sm:$0xff]   ;;  %v3596_v10 = vld [vmem:[#allocation4 + $0x50] ss:$8 sps:$4 sm:$0xff]  }
  0x2c   :  { %638 = vmatprep.subr.bf16.mxu1 %v3588_v5  ;;  %v3597_v11 = vld [vmem:[#allocation4 + $0x150] ss:$8 sps:$4 sm:$0xff]   ;;  %v3598_v12 = vld [vmem:[#allocation4 + $0x44] ss:$8 sps:$4 sm:$0xff]   ;;  %v3602_v14 = vld [vmem:[#allocation4 + $0x40] ss:$8 sps:$4 sm:$0xff]  }
  0x2d   :  { %v3600_v13 = vld [vmem:[#allocation4 + $0x144] ss:$8 sps:$4 sm:$0xff]   ;;  %v3603_v15 = vld [vmem:[#allocation4 + $0x140] ss:$8 sps:$4 sm:$0xff]   ;;  %v3604_v16 = vld [vmem:[#allocation4 + $0x34] ss:$8 sps:$4 sm:$0xff]  }
  0x2e   :  { %566 = vmatpush1.bf16.msra.mxu0 %v3590_v6  ;;  %v3606_v17 = vld [vmem:[#allocation4 + $0x134] ss:$8 sps:$4 sm:$0xff]   ;;  %v3608_v18 = vld [vmem:[#allocation4 + $0x30] ss:$8 sps:$4 sm:$0xff]   ;;  %v3610_v20 = vld [vmem:[#allocation4 + $0x24] ss:$8 sps:$4 sm:$0xff]  }
  0x2f   :  { %639 = vmatpush1.bf16.msra.mxu1 %v3591_v7  ;;  %567 = vmatprep.subr.bf16.mxu0 %v3592_v8  ;;  %v3609_v19 = vld [vmem:[#allocation4 + $0x130] ss:$8 sps:$4 sm:$0xff]   ;;  %v3612_v21 = vld [vmem:[#allocation4 + $0x124] ss:$8 sps:$4 sm:$0xff]   ;;  %v3614_v22 = vld [vmem:[#allocation4 + $0x20] ss:$8 sps:$4 sm:$0xff]  }
  0x30   :  { %640 = vmatprep.subr.bf16.mxu1 %v3594_v9  ;;  %v3615_v23 = vld [vmem:[#allocation4 + $0x120] ss:$8 sps:$4 sm:$0xff]   ;;  %v3616_v24 = vld [vmem:[#allocation4 + $0x14] ss:$8 sps:$4 sm:$0xff]   ;;  %v3620_v26 = vld [vmem:[#allocation4 + $0x10] ss:$8 sps:$4 sm:$0xff]  }
  0x31   :  { %v3618_v25 = vld [vmem:[#allocation4 + $0x114] ss:$8 sps:$4 sm:$0xff]   ;;  %v3621_v27 = vld [vmem:[#allocation4 + $0x110] ss:$8 sps:$4 sm:$0xff]   ;;  %v3622_v28 = vld [vmem:[#allocation4 + $0x4] ss:$8 sps:$4 sm:$0xff]  }
  0x32   :  { %568 = vmatpush1.bf16.msra.mxu0 %v3596_v10  ;;  %v3624_v29 = vld [vmem:[#allocation4 + $0x104] ss:$8 sps:$4 sm:$0xff]   ;;  %v3626_v30 = vld [vmem:[#allocation4] ss:$8 sps:$4 sm:$0xff]   ;;  %v3628_v32 = vld [vmem:[#allocation4 + $0xf4] ss:$8 sps:$4 sm:$0xff]  }
  0x33   :  { %641 = vmatpush1.bf16.msra.mxu1 %v3597_v11  ;;  %569 = vmatprep.subr.bf16.mxu0 %v3598_v12  ;;  %v3627_v31 = vld [vmem:[#allocation4 + $0x100] ss:$8 sps:$4 sm:$0xff]   ;;  %v3630_v33 = vld [vmem:[#allocation4 + $0x1f4] ss:$8 sps:$4 sm:$0xff]   ;;  %v3632_v34 = vld [vmem:[#allocation4 + $0xf0] ss:$8 sps:$4 sm:$0xff]  }
  0x34   :  { %642 = vmatprep.subr.bf16.mxu1 %v3600_v13  ;;  %v3633_v35 = vld [vmem:[#allocation4 + $0x1f0] ss:$8 sps:$4 sm:$0xff]   ;;  %v3634_v36 = vld [vmem:[#allocation4 + $0xe4] ss:$8 sps:$4 sm:$0xff]   ;;  %v3638_v38 = vld [vmem:[#allocation4 + $0xe0] ss:$8 sps:$4 sm:$0xff]  }
  0x35   :  { %v3636_v37 = vld [vmem:[#allocation4 + $0x1e4] ss:$8 sps:$4 sm:$0xff]   ;;  %v3639_v39 = vld [vmem:[#allocation4 + $0x1e0] ss:$8 sps:$4 sm:$0xff]   ;;  %v3640_v40 = vld [vmem:[#allocation4 + $0xd4] ss:$8 sps:$4 sm:$0xff]  }
  0x36   :  { %570 = vmatpush1.bf16.msra.mxu0 %v3602_v14  ;;  %v3642_v41 = vld [vmem:[#allocation4 + $0x1d4] ss:$8 sps:$4 sm:$0xff]   ;;  %v3644_v42 = vld [vmem:[#allocation4 + $0xd0] ss:$8 sps:$4 sm:$0xff]   ;;  %v3646_v44 = vld [vmem:[#allocation4 + $0xc4] ss:$8 sps:$4 sm:$0xff]  }
  0x37   :  { %643 = vmatpush1.bf16.msra.mxu1 %v3603_v15  ;;  %571 = vmatprep.subr.bf16.mxu0 %v3604_v16  ;;  %v3645_v43 = vld [vmem:[#allocation4 + $0x1d0] ss:$8 sps:$4 sm:$0xff]   ;;  %v3648_v45 = vld [vmem:[#allocation4 + $0x1c4] ss:$8 sps:$4 sm:$0xff]   ;;  %v3650_v46 = vld [vmem:[#allocation4 + $0xc0] ss:$8 sps:$4 sm:$0xff]  }
  0x38   :  { %644 = vmatprep.subr.bf16.mxu1 %v3606_v17  ;;  %v3678_v47 = vld [vmem:[%s5098_s0 + $0x4] ss:$16 sps:$4 sm:$0xff]   ;;  %v3651_v48 = vld [vmem:[#allocation4 + $0x1c0] ss:$8 sps:$4 sm:$0xff]   ;;  %v3681_v51 = vld [vmem:[%s5098_s0 + $0xc] ss:$16 sps:$4 sm:$0xff]  }
  0x39   :  { %v3652_v49 = vld [vmem:[#allocation4 + $0xb4] ss:$8 sps:$4 sm:$0xff]   ;;  %595 = vmatprep.mubr.bf16.mxu0 %v3678_v47  ;;  %668 = vmatprep.mubr.bf16.mxu1 %v3681_v51  ;;  %v3656_v52 = vld [vmem:[#allocation4 + $0xb0] ss:$8 sps:$4 sm:$0xff]   ;;  %v3658_v54 = vld [vmem:[#allocation4 + $0xa4] ss:$8 sps:$4 sm:$0xff]  }
  0x3a   :  { %572 = vmatpush1.bf16.msra.mxu0 %v3608_v18  ;;  %v3654_v50 = vld [vmem:[#allocation4 + $0x1b4] ss:$8 sps:$4 sm:$0xff]   ;;  %v3657_v53 = vld [vmem:[#allocation4 + $0x1b0] ss:$8 sps:$4 sm:$0xff]   ;;  %v3660_v55 = vld [vmem:[#allocation4 + $0x1a4] ss:$8 sps:$4 sm:$0xff]  }
  0x3b   :  { %645 = vmatpush1.bf16.msra.mxu1 %v3609_v19  ;;  %573 = vmatprep.subr.bf16.mxu0 %v3610_v20  ;;  %v3662_v56 = vld [vmem:[#allocation4 + $0xa0] ss:$8 sps:$4 sm:$0xff]   ;;  %v3664_v58 = vld [vmem:[#allocation4 + $0x94] ss:$8 sps:$4 sm:$0xff]   ;;  %v3668_v60 = vld [vmem:[#allocation4 + $0x90] ss:$8 sps:$4 sm:$0xff]  }
  0x3c   :  { %646 = vmatprep.subr.bf16.mxu1 %v3612_v21  ;;  %v3663_v57 = vld [vmem:[#allocation4 + $0x1a0] ss:$8 sps:$4 sm:$0xff]   ;;  %v3666_v59 = vld [vmem:[#allocation4 + $0x194] ss:$8 sps:$4 sm:$0xff]   ;;  %v3669_v61 = vld [vmem:[#allocation4 + $0x190] ss:$8 sps:$4 sm:$0xff]  }
  0x3d   :  { %v3670_v62 = vld [vmem:[#allocation4 + $0x84] ss:$8 sps:$4 sm:$0xff]   ;;  %v3674_v0 = vld [vmem:[#allocation4 + $0x80] ss:$8 sps:$4 sm:$0xff]   ;;  %v4131_v2 = vld [vmem:[%s5100_s2 + $0x78] sm:$0xff]  ;;  %s4061_s21 = smov 64  }
  0x3e   :  { %574 = vmatpush1.bf16.msra.mxu0 %v3614_v22  ;;  %v3672_v63 = vld [vmem:[#allocation4 + $0x184] ss:$8 sps:$4 sm:$0xff]   ;;  %v3675_v1 = vld [vmem:[#allocation4 + $0x180] ss:$8 sps:$4 sm:$0xff]   ;;  %v4146_v6 = vld [vmem:[%s5100_s2 + $0x70] sm:$0xff]  ;;  %s4062_s22 = smov 96  }
  0x3f   :  { %647 = vmatpush1.bf16.msra.mxu1 %v3615_v23  ;;  %575 = vmatprep.subr.bf16.mxu0 %v3616_v24  ;;  %v3676_v3 = vld [vmem:[%s5098_s0] ss:$16 sps:$4 sm:$0xff]   ;;  %v3679_v4 = vld [vmem:[%s5098_s0 + $0x8] ss:$16 sps:$4 sm:$0xff]   ;;  %v3682_v5 = vld [vmem:[%s5098_s0 + $0x24] ss:$16 sps:$4 sm:$0xff]  }
  0x40   :  { %648 = vmatprep.subr.bf16.mxu1 %v3618_v25  ;;  %v3684_v7 = vld [vmem:[%s5098_s0 + $0x2c] ss:$16 sps:$4 sm:$0xff]   ;;  %v4160_v9 = vld [vmem:[%s5100_s2 + $0x60] sm:$0xff]  ;;  %v4172_v11 = vld [vmem:[%s5100_s2 + $0x50] sm:$0xff]  ;;  %vm872_vm0 = vcmask 261120   ;;  %vm878_vm1 = vcmask 523520  }
  0x41   :  { %v4155_v8 = vld [vmem:[%s5100_s2 + $0x68] sm:$0xff]  ;;  %v4166_v10 = vld [vmem:[%s5100_s2 + $0x58] sm:$0xff]  ;;  %v3686_v13 = vld [vmem:[%s5098_s0 + $0x20] ss:$16 sps:$4 sm:$0xff]   ;;  %vm741_vm2 = vcmask 523264  }
  0x42   :  { %576 = vmatpush1.bf16.msra.mxu0 %v3620_v26  ;;  %v4178_v12 = vld [vmem:[%s5100_s2 + $0x48] sm:$0xff]  ;;  %v4191_v15 = vld [vmem:[%s5100_s2 + $0x40] sm:$0xff]  ;;  %v4208_v18 = vld [vmem:[%s5100_s2 + $0x38] sm:$0xff] }
  0x43   :  { %649 = vmatpush1.bf16.msra.mxu1 %v3621_v27  ;;  %577 = vmatprep.subr.bf16.mxu0 %v3622_v28  ;;  %v3687_v14 = vld [vmem:[%s5098_s0 + $0x28] ss:$16 sps:$4 sm:$0xff]   ;;  %v3688_v16 = vld [vmem:[%s5098_s0 + $0x44] ss:$16 sps:$4 sm:$0xff]   ;;  %v3690_v17 = vld [vmem:[%s5098_s0 + $0x4c] ss:$16 sps:$4 sm:$0xff]  }
  0x44   :  { %650 = vmatprep.subr.bf16.mxu1 %v3624_v29  ;;  %v4214_v19 = vld [vmem:[%s5100_s2 + $0x30] sm:$0xff]  ;;  %v4219_v20 = vld [vmem:[%s5100_s2 + $0x28] sm:$0xff]  ;;  %v4225_v21 = vld [vmem:[%s5100_s2 + $0x20] sm:$0xff] }
  0x45   :  { %v4232_v22 = vld [vmem:[%s5100_s2 + $0x18] sm:$0xff]  ;;  %v3692_v23 = vld [vmem:[%s5098_s0 + $0x40] ss:$16 sps:$4 sm:$0xff]   ;;  %v3694_v26 = vld [vmem:[%s5098_s0 + $0x64] ss:$16 sps:$4 sm:$0xff]  }
  0x46   :  { %578 = vmatpush1.bf16.msra.mxu0 %v3626_v30  ;;  %v3693_v24 = vld [vmem:[%s5098_s0 + $0x48] ss:$16 sps:$4 sm:$0xff]   ;;  %v4245_v25 = vld [vmem:[%s5100_s2 + $0x10] sm:$0xff]  ;;  %v3696_v27 = vld [vmem:[%s5098_s0 + $0x6c] ss:$16 sps:$4 sm:$0xff]  }
  0x47   :  { %651 = vmatpush1.bf16.msra.mxu1 %v3627_v31  ;;  %579 = vmatprep.subr.bf16.mxu0 %v3628_v32  ;;  %v4262_v28 = vld [vmem:[%s5100_s2 + $0x8] sm:$0xff]  ;;  %v4268_v29 = vld [vmem:[%s5100_s2] sm:$0xff]  ;;  %v4059_v32 = vmov 0.0  }
  0x48   :  { %652 = vmatprep.subr.bf16.mxu1 %v3630_v33  ;;  %v3698_v30 = vld [vmem:[%s5098_s0 + $0x60] ss:$16 sps:$4 sm:$0xff]   ;;  %v3699_v31 = vld [vmem:[%s5098_s0 + $0x68] ss:$16 sps:$4 sm:$0xff]   ;;  %v153_v33 = vlaneseq }
  0x4a   :  { %580 = vmatpush2.bf16.msra.mxu0 %v3632_v34  ;;  %v4304_v34 = vshrl.u32 %v153_v33, 7 }
  0x4b   :  { %653 = vmatpush2.bf16.msra.mxu1 %v3633_v35  ;;  %581 = vmatprep.subr.bf16.mxu0 %v3634_v36  ;;  %v151_v36 = vld [vmem:[%s5101_s3] sm:$0x3]  ;;  %s4060_s3 = smov 32  }
  0x4c   :  { %654 = vmatprep.subr.bf16.mxu1 %v3636_v37  ;;  %v159_v35 = vsub.s32 1, %v4304_v34  ;;  %v155_v37 = vsub.s32 0, %v4304_v34 }
  0x4e   :  { %582 = vmatpush2.bf16.msra.mxu0 %v3638_v38  ;;  %v4313_v38 = vrot.slane %v151_v36, %v159_v35 }
  0x4f   :  { %655 = vmatpush2.bf16.msra.mxu1 %v3639_v39  ;;  %583 = vmatprep.subr.bf16.mxu0 %v3640_v40 }
  0x50   :  { %656 = vmatprep.subr.bf16.mxu1 %v3642_v41 }
  0x52   :  { %584 = vmatpush2.bf16.msra.mxu0 %v3644_v42 }
  0x53   :  { %657 = vmatpush2.bf16.msra.mxu1 %v3645_v43  ;;  %585 = vmatprep.subr.bf16.mxu0 %v3646_v44  ;;  %v156_v43 = vrot.slane %v151_v36, %v155_v37 }
  0x54   :  { %658 = vmatprep.subr.bf16.mxu1 %v3648_v45 }
  0x56   :  { %586 = vmatpush2.bf16.msra.mxu0 %v3650_v46 }
  0x57   :  { %659 = vmatpush2.bf16.msra.mxu1 %v3651_v48  ;;  %587 = vmatprep.subr.bf16.mxu0 %v3652_v49 }
  0x58   :  { %660 = vmatprep.subr.bf16.mxu1 %v3654_v50 }
  0x5a   :  { %588 = vmatpush2.bf16.msra.mxu0 %v3656_v52 }
  0x5b   :  { %661 = vmatpush2.bf16.msra.mxu1 %v3657_v53  ;;  %589 = vmatprep.subr.bf16.mxu0 %v3658_v54 }
  0x5c   :  { %662 = vmatprep.subr.bf16.mxu1 %v3660_v55 }
  0x5e   :  { %590 = vmatpush2.bf16.msra.mxu0 %v3662_v56 }
  0x5f   :  { %663 = vmatpush2.bf16.msra.mxu1 %v3663_v57  ;;  %591 = vmatprep.subr.bf16.mxu0 %v3664_v58 }
  0x60   :  { %664 = vmatprep.subr.bf16.mxu1 %v3666_v59 }
  0x62   :  { %592 = vmatpush2.bf16.msra.mxu0 %v3668_v60 }
  0x63   :  { %665 = vmatpush2.bf16.msra.mxu1 %v3669_v61  ;;  %593 = vmatprep.subr.bf16.mxu0 %v3670_v62 }
  0x64   :  { %666 = vmatprep.subr.bf16.mxu1 %v3672_v63 }
  0x66   :  { %594 = vmatpush2.bf16.msra.mxu0 %v3674_v0 }
  0x67   :  { %667 = vmatpush2.bf16.msra.mxu1 %v3675_v1  ;;  %1037 = vmatprep.subr.mxu0 %v4131_v2 }
  0x68   :  { %761 = vmatprep.subr.mxu1 %v4131_v2 }
  0x69   :  { %596 = vmatmul.mubr.bf16.vlgmr.msra.gmra.mxu0 %v3676_v3 }
  0x6a   :  { %669 = vmatmul.mubr.bf16.vlgmr.msra.gmra.mxu1 %v3679_v4  ;;  %605 = vmatprep.mubr.bf16.mxu0 %v3682_v5 }
  0x6b   :  { %762 = vmatpush1.msra.mxu1 %v4146_v6  ;;  %678 = vmatprep.mubr.bf16.mxu1 %v3684_v7 }
  0x6c   :  { %763 = vmatprep.subr.mxu1 %v4155_v8  ;;  %1038 = vmatpush1.msra.mxu0 %v4146_v6 }
  0x6d   :  { %764 = vmatpush1.msra.mxu1 %v4160_v9  ;;  %1039 = vmatprep.subr.mxu0 %v4155_v8 }
  0x6e   :  { %765 = vmatprep.subr.mxu1 %v4166_v10  ;;  %1040 = vmatpush1.msra.mxu0 %v4160_v9 }
  0x6f   :  { %766 = vmatpush1.msra.mxu1 %v4172_v11  ;;  %1041 = vmatprep.subr.mxu0 %v4166_v10 }
  0x70   :  { %767 = vmatprep.subr.mxu1 %v4178_v12  ;;  %1042 = vmatpush1.msra.mxu0 %v4172_v11 }
  0x71   :  { %768 = vmatpush1.msra.mxu1 %v4191_v15  ;;  %606 = vmatmul.mubr.bf16.gmra.mxu0 %v3686_v13 }
  0x72   :  { %679 = vmatmul.mubr.bf16.gmra.mxu1 %v3687_v14  ;;  %615 = vmatprep.mubr.bf16.mxu0 %v3688_v16 }
  0x73   :  { %688 = vmatprep.mubr.bf16.mxu1 %v3690_v17  ;;  %769 = vmatprep.subr.mxu1 %v4208_v18 }
  0x74   :  { %1043 = vmatprep.subr.mxu0 %v4178_v12  ;;  %770 = vmatpush1.msra.mxu1 %v4214_v19 }
  0x75   :  { %1044 = vmatpush1.msra.mxu0 %v4191_v15  ;;  %771 = vmatprep.subr.mxu1 %v4219_v20 }
  0x76   :  { %1045 = vmatprep.subr.mxu0 %v4208_v18  ;;  %772 = vmatpush1.msra.mxu1 %v4225_v21 }
  0x77   :  { %1046 = vmatpush1.msra.mxu0 %v4214_v19  ;;  %773 = vmatprep.subr.mxu1 %v4232_v22 }
  0x78   :  { %1047 = vmatprep.subr.mxu0 %v4219_v20  ;;  %774 = vmatpush1.msra.mxu1 %v4245_v25 }
  0x79   :  { %1048 = vmatpush1.msra.mxu0 %v4225_v21  ;;  %775 = vmatprep.subr.mxu1 %v4262_v28 }
  0x7a   :  { %616 = vmatmul.mubr.bf16.gmra.mxu0 %v3692_v23  ;;  %689 = vmatmul.mubr.bf16.gmra.mxu1 %v3693_v24 }
  0x7b   :  { %625 = vmatprep.mubr.bf16.mxu0 %v3694_v26  ;;  %698 = vmatprep.mubr.bf16.mxu1 %v3696_v27 }
  0x7c   :  { %1049 = vmatprep.subr.mxu0 %v4232_v22  ;;  %776 = vmatpush1.msra.mxu1 %v4268_v29 }
  0x7d   :  { %1050 = vmatpush1.msra.mxu0 %v4245_v25  ;;  %900 = vmatprep.subr.mxu1 %v4131_v2 }
  0x7e   :  { %1051 = vmatprep.subr.mxu0 %v4262_v28 }
  0x7f   :  { %1052 = vmatpush1.msra.mxu0 %v4268_v29 }
  0x80   :  { %1311 = vmatprep.subr.mxu0 %v4131_v2 }
  0x82   :  { %626 = vmatmul.mubr.bf16.gmra.mxu0 %v3698_v30  ;;  %699 = vmatmul.mubr.bf16.gmra.mxu1 %v3699_v31 }
  0x83   :  { %809 = vmatprep.mubr.f32.mxu1 %v4059_v32  ;;  %1085 = vmatprep.mubr.f32.mxu0 %v4059_v32 }
  0x8a   :  { %810 = vmatmul.mubr.f32.vlgmr.msra.gmra.mxu1 %v4059_v32 }
  0x8b   :  { %901 = vmatpush1.msra.mxu1 %v4146_v6  ;;  %948 = vmatprep.mubr.f32.mxu1 %v4059_v32 }
  0x8c   :  { %902 = vmatprep.subr.mxu1 %v4155_v8 }
  0x8d   :  { %903 = vmatpush1.msra.mxu1 %v4160_v9 }
  0x8e   :  { %904 = vmatprep.subr.mxu1 %v4166_v10 }
  0x8f   :  { %905 = vmatpush1.msra.mxu1 %v4172_v11 }
  0x90   :  { %906 = vmatprep.subr.mxu1 %v4178_v12 }
  0x91   :  { %907 = vmatpush1.msra.mxu1 %v4191_v15 }
  0x92   :  { %908 = vmatprep.subr.mxu1 %v4208_v18 }
  0x93   :  { %909 = vmatpush1.msra.mxu1 %v4214_v19 }
  0x94   :  { %910 = vmatprep.subr.mxu1 %v4219_v20 }
  0x95   :  { %911 = vmatpush1.msra.mxu1 %v4225_v21 }
  0x96   :  { %912 = vmatprep.subr.mxu1 %v4232_v22 }
  0x97   :  { %913 = vmatpush1.msra.mxu1 %v4245_v25 }
  0x98   :  { %914 = vmatprep.subr.mxu1 %v4262_v28 }
  0x99   :  { %915 = vmatpush1.msra.mxu1 %v4268_v29 }
  0x9a   :  { %1174 = vmatprep.subr.mxu1 %v4131_v2 }
 0x129   :  { %v597_v39 = vpop.f32.mrf.mxu0 }
 0x12a   :  { %v670_v40 = vpop.f32.mrf.mxu1 }
 0x12b   :  { %v599_v41 = vpop.f32.mrf.mxu0 }
 0x12c   :  { %v672_v42 = vpop.f32.mrf.mxu1  ;;  %v600_v44 = vadd.f32 %v599_v41, %v4313_v38 }
 0x12d   :  { %v601_v45 = vpop.f32.mrf.mxu0 }
 0x12e   :  { %v674_v46 = vpop.f32.mrf.mxu1  ;;  %v4318_v47 = vadd.f32 %v672_v42, %v600_v44  ;;  %v602_v48 = vadd.f32 %v601_v45, %v156_v43 }
 0x12f   :  { %v603_v49 = vpop.f32.mrf.mxu0 }
 0x130   :  { %v676_v50 = vpop.f32.mrf.mxu1  ;;  %v4320_v51 = vadd.f32 %v674_v46, %v602_v48  ;;  %v604_v52 = vadd.f32 %v603_v49, %v4313_v38 }
 0x131   :  { %v607_v53 = vpop.f32.mrf.mxu0 }
 0x132   :  { %v680_v54 = vpop.f32.mrf.mxu1  ;;  %v4323_v55 = vadd.f32 %v676_v50, %v604_v52  ;;  %v608_v56 = vadd.f32 %v607_v53, %v156_v43  ;;  %v598_v53 = vadd.f32 %v597_v39, %v156_v43 }
 0x133   :  { %v609_v57 = vpop.f32.mrf.mxu0 }
 0x134   :  { %v682_v58 = vpop.f32.mrf.mxu1  ;;  %v4325_v59 = vadd.f32 %v680_v54, %v608_v56  ;;  %v610_v60 = vadd.f32 %v609_v57, %v4313_v38 }
 0x135   :  { %v611_v61 = vpop.f32.mrf.mxu0 }
 0x136   :  { %v684_v62 = vpop.f32.mrf.mxu1  ;;  %v4328_v63 = vadd.f32 %v682_v58, %v610_v60  ;;  %v612_v0 = vadd.f32 %v611_v61, %v156_v43 }
 0x137   :  { %v613_v1 = vpop.f32.mrf.mxu0 }
 0x138   :  { %v686_v3 = vpop.f32.mrf.mxu1  ;;  %v4330_v4 = vadd.f32 %v684_v62, %v612_v0  ;;  %v614_v5 = vadd.f32 %v613_v1, %v4313_v38  ;;  %v671_v1 = vadd.f32 %v670_v40, %v598_v53 }
 0x13a   :  { %v617_v7 = vpop.f32.mrf.mxu0  ;;  %v690_v13 = vpop.f32.mrf.mxu1  ;;  %v4333_v14 = vadd.f32 %v686_v3, %v614_v5 }
 0x13b   :  { %v618_v16 = vadd.f32 %v617_v7, %v156_v43 }
 0x13c   :  { %v619_v17 = vpop.f32.mrf.mxu0  ;;  %v692_v23 = vpop.f32.mrf.mxu1 }
 0x13d   :  { %v4335_v24 = vadd.f32 %v690_v13, %v618_v16  ;;  %v620_v26 = vadd.f32 %v619_v17, %v4313_v38 }
 0x13e   :  { %v621_v27 = vpop.f32.mrf.mxu0  ;;  %v694_v30 = vpop.f32.mrf.mxu1 }
 0x13f   :  { %v4338_v31 = vadd.f32 %v692_v23, %v620_v26  ;;  %v622_v33 = vadd.f32 %v621_v27, %v156_v43 }
 0x140   :  { %v623_v36 = vpop.f32.mrf.mxu0  ;;  %v696_v41 = vpop.f32.mrf.mxu1 }
 0x141   :  { %v4340_v42 = vadd.f32 %v694_v30, %v622_v33  ;;  %v624_v44 = vadd.f32 %v623_v36, %v4313_v38 }
 0x142   :  { %v627_v45 = vpop.f32.mrf.mxu0  ;;  %v700_v46 = vpop.f32.mrf.mxu1 }
 0x143   :  { %v4343_v48 = vadd.f32 %v696_v41, %v624_v44  ;;  %v628_v49 = vadd.f32 %v627_v45, %v156_v43 }
 0x144   :  { %v629_v50 = vpop.f32.mrf.mxu0  ;;  %v702_v52 = vpop.f32.mrf.mxu1 }
 0x145   :  { %v4345_v54 = vadd.f32 %v700_v46, %v628_v49  ;;  %v630_v56 = vadd.f32 %v629_v50, %v4313_v38 }
 0x146   :  { %v631_v57 = vpop.f32.mrf.mxu0  ;;  %v704_v58 = vpop.f32.mrf.mxu1 }
 0x147   :  { %v4348_v60 = vadd.f32 %v702_v52, %v630_v56  ;;  %v632_v61 = vadd.f32 %v631_v57, %v156_v43 }
 0x148   :  { %v633_v62 = vpop.f32.mrf.mxu0  ;;  %v706_v0 = vpop.f32.mrf.mxu1 }
 0x149   :  { %v4350_v3 = vadd.f32 %v704_v58, %v632_v61  ;;  %v634_v5 = vadd.f32 %v633_v62, %v4313_v38 }
 0x14a   :  { %v811_v7 = vpop.f32.mrf.mxu1 }
 0x14b   :  { %v707_v13 = vadd.f32 %v706_v0, %v634_v5  ;;  %v817_v16 = vadd.f32 %v811_v7, %v671_v1 }
 0x14c   :  { %v813_v39 = vpop.f32.mrf.mxu1 }
 0x14d   :  { %3700 = vtanh.f32 %v817_v16  ;;  %v819_v17 = vadd.f32 %v813_v39, %v707_v13  ;;  %v3462_v43 = vmul.f32 -1.442695, %v817_v16 }
 0x14f   :  { %3702 = vtanh.f32 %v819_v17  ;;  %v3463_v40 = vmul.f32 -1.442695, %v819_v17 }
 0x150   :  { %3704 = vpow2.f32 %v3462_v43 }
 0x151   :  { %3706 = vpow2.f32 %v3463_v40 }
 0x15a   :  { %v3701_v23 = vpop.eup %3700 }
 0x15b   :  { %836 = vrot.lane.b32.xlu0 %v3701_v23, %s4060_s3 }
 0x15c   :  { %v3703_v26 = vpop.eup %3702 }
 0x15d   :  { %v3705_v27 = vpop.eup %3704 }
 0x15e   :  { %v823_v38 = vadd.f32 1.0, %v3705_v27  ;;  %v3707_v30 = vpop.eup %3706 }
 0x15f   :  { %853 = vrot.lane.b32.xlu0 %v3703_v26, %s4060_s3  ;;  %v830_v33 = vadd.f32 1.0, %v3707_v30 }
 0x160   :  { %3708 = vrcp.f32 %v823_v38 }
 0x161   :  { %3710 = vrcp.f32 %v830_v33 }
 0x16d   :  { %v3709_v36 = vpop.eup %3708 }
 0x16e   :  { %v3711_v45 = vpop.eup %3710  ;;  %v834_v50 = vmul.f32 0.0, %v3709_v36 }
 0x16f   :  { %v851_v56 = vmul.f32 0.0, %v3711_v45 }
 0x1cd   :  { %v837_v41 = vpop.permute.xlu0 %836 }
 0x1ce   :  { %v839_v44 = vmul.f32 %v3709_v36, %v837_v41 }
 0x1d0   :  { %841 = vrot.lane.b32.xlu1 %v839_v44, %s4060_s3 }
 0x1d1   :  { %v854_v46 = vpop.permute.xlu0 %853 }
 0x1d2   :  { %v856_v49 = vmul.f32 %v3711_v45, %v854_v46 }
 0x1d4   :  { %858 = vrot.lane.b32.xlu1 %v856_v49, %s4060_s3 }
 0x242   :  { %v842_v52 = vpop.permute.xlu1 %841 }
 0x243   :  { %v4357_v53 = vadd.f32 %v842_v52, %v834_v50 }
 0x245   :  { %3712 = vtanh.f32 %v4357_v53 }
 0x246   :  { %v859_v57 = vpop.permute.xlu1 %858 }
 0x247   :  { %v4360_v58 = vadd.f32 %v859_v57, %v851_v56 }
 0x249   :  { %3714 = vtanh.f32 %v4360_v58 }
 0x252   :  { %v3713_v61 = vpop.eup %3712 }
 0x253   :  { %847 = vrot.lane.b32.xlu0 %v3713_v61, %s4060_s3 }
 0x256   :  { %v3715_v62 = vpop.eup %3714 }
 0x257   :  { %864 = vrot.lane.b32.xlu1 %v3715_v62, %s4060_s3 }
 0x2c5   :  { %v848_v0 = vpop.permute.xlu0 %847 }
 0x2c6   :  { %v850_v1 = vmul.f32 %v3709_v36, %v848_v0 }
 0x2c8   :  { %869 = vrot.lane.b32.xlu0 %v850_v1, %s4061_s21 }
 0x2c9   :  { %v865_v5 = vpop.permute.xlu1 %864 }
 0x2ca   :  { %v867_v7 = vmul.f32 %v3711_v45, %v865_v5 }
 0x2cc   :  { %875 = vrot.lane.b32.xlu1 %v867_v7, %s4062_s22 }
 0x33a   :  { %v870_v13 = vpop.permute.xlu0 %869 }
 0x33b   :  { %873 = vst.msk [vmem:[#allocation2] sm:$0xff] %vm872_vm0, %v870_v13 }
 0x33e   :  { %v876_v16 = vpop.permute.xlu1 %875 }
 0x33f   :  { %879 = vst.msk [vmem:[#allocation2 + $0x38] sm:$0xff] %vm878_vm1, %v876_v16  ;;  %v880_v39 = vsel %vm872_vm0, %v870_v13, %v876_v16 }
 0x340   :  { %3464 = vmatmul.mubr.msk.f32.vlgmr.msra.gmra.mxu1 %vm741_vm2, %v880_v39 }
 0x341   :  { %1175 = vmatpush1.msra.mxu1 %v4146_v6  ;;  %1222 = vmatprep.mubr.f32.mxu1 %v4059_v32 }
 0x342   :  { %1176 = vmatprep.subr.mxu1 %v4155_v8 }
 0x343   :  { %1177 = vmatpush1.msra.mxu1 %v4160_v9 }
 0x344   :  { %1178 = vmatprep.subr.mxu1 %v4166_v10 }
 0x345   :  { %1179 = vmatpush1.msra.mxu1 %v4172_v11 }
 0x346   :  { %1180 = vmatprep.subr.mxu1 %v4178_v12 }
 0x347   :  { %1181 = vmatpush1.msra.mxu1 %v4191_v15 }
 0x348   :  { %1182 = vmatprep.subr.mxu1 %v4208_v18 }
 0x349   :  { %1183 = vmatpush1.msra.mxu1 %v4214_v19 }
 0x34a   :  { %1184 = vmatprep.subr.mxu1 %v4219_v20 }
 0x34b   :  { %1185 = vmatpush1.msra.mxu1 %v4225_v21 }
 0x34c   :  { %1186 = vmatprep.subr.mxu1 %v4232_v22 }
 0x34d   :  { %1187 = vmatpush1.msra.mxu1 %v4245_v25 }
 0x34e   :  { %1188 = vmatprep.subr.mxu1 %v4262_v28 }
 0x34f   :  { %1189 = vmatpush1.msra.mxu1 %v4268_v29 }
 0x350   :  { %1448 = vmatprep.subr.mxu1 %v4131_v2 }
 0x400   :  { %v950_v17 = vpop.f32.mrf.mxu1 }
 0x401   :  { %v956_v23 = vadd.f32 %v950_v17, %v4320_v51 }
 0x402   :  { %v952_v26 = vpop.f32.mrf.mxu1 }
 0x403   :  { %3716 = vtanh.f32 %v956_v23  ;;  %v958_v43 = vadd.f32 %v952_v26, %v4348_v60  ;;  %v3465_v38 = vmul.f32 -1.442695, %v956_v23 }
 0x405   :  { %3718 = vtanh.f32 %v958_v43  ;;  %v3466_v30 = vmul.f32 -1.442695, %v958_v43 }
 0x406   :  { %3720 = vpow2.f32 %v3465_v38 }
 0x407   :  { %3722 = vpow2.f32 %v3466_v30 }
 0x410   :  { %v3717_v40 = vpop.eup %3716 }
 0x411   :  { %975 = vrot.lane.b32.xlu0 %v3717_v40, %s4060_s3 }
 0x412   :  { %v3719_v27 = vpop.eup %3718 }
 0x413   :  { %992 = vrot.lane.b32.xlu1 %v3719_v27, %s4060_s3  ;;  %v3721_v33 = vpop.eup %3720 }
 0x414   :  { %v3723_v36 = vpop.eup %3722  ;;  %v962_v41 = vadd.f32 1.0, %v3721_v33 }
 0x415   :  { %v969_v44 = vadd.f32 1.0, %v3723_v36 }
 0x416   :  { %3724 = vrcp.f32 %v962_v41 }
 0x417   :  { %3726 = vrcp.f32 %v969_v44 }
 0x423   :  { %v3725_v51 = vpop.eup %3724 }
 0x424   :  { %v3727_v46 = vpop.eup %3726  ;;  %v973_v52 = vmul.f32 %v3725_v51, %v4357_v53 }
 0x425   :  { %v990_v61 = vmul.f32 %v3727_v46, %v4360_v58 }
 0x483   :  { %v976_v45 = vpop.permute.xlu0 %975 }
 0x484   :  { %v978_v60 = vmul.f32 %v3725_v51, %v976_v45 }
 0x485   :  { %v993_v49 = vpop.permute.xlu1 %992 }
 0x486   :  { %980 = vrot.lane.b32.xlu0 %v978_v60, %s4060_s3  ;;  %v995_v50 = vmul.f32 %v3727_v46, %v993_v49 }
 0x488   :  { %997 = vrot.lane.b32.xlu1 %v995_v50, %s4060_s3 }
 0x4f8   :  { %v981_v56 = vpop.permute.xlu0 %980 }
 0x4f9   :  { %v4395_v57 = vadd.f32 %v981_v56, %v973_v52 }
 0x4fa   :  { %v998_v62 = vpop.permute.xlu1 %997 }
 0x4fb   :  { %3728 = vtanh.f32 %v4395_v57  ;;  %v4399_v0 = vadd.f32 %v998_v62, %v990_v61 }
 0x4fd   :  { %3730 = vtanh.f32 %v4399_v0 }
 0x508   :  { %v3729_v1 = vpop.eup %3728 }
 0x509   :  { %986 = vrot.lane.b32.xlu0 %v3729_v1, %s4060_s3 }
 0x50a   :  { %v3731_v5 = vpop.eup %3730 }
 0x50b   :  { %1003 = vrot.lane.b32.xlu1 %v3731_v5, %s4060_s3 }
 0x57b   :  { %v987_v7 = vpop.permute.xlu0 %986 }
 0x57c   :  { %v989_v53 = vmul.f32 %v3725_v51, %v987_v7 }
 0x57d   :  { %v1004_v13 = vpop.permute.xlu1 %1003 }
 0x57e   :  { %1008 = vrot.lane.b32.xlu0 %v989_v53, %s4061_s21  ;;  %v1006_v16 = vmul.f32 %v3727_v46, %v1004_v13 }
 0x580   :  { %1013 = vrot.lane.b32.xlu1 %v1006_v16, %s4062_s22 }
 0x5f0   :  { %v1009_v58 = vpop.permute.xlu0 %1008 }
 0x5f1   :  { %1011 = vst.msk [vmem:[#allocation2 + $0x8] sm:$0xff] %vm872_vm0, %v1009_v58 }
 0x5f2   :  { %v1014_v39 = vpop.permute.xlu1 %1013 }
 0x5f3   :  { %1016 = vst.msk [vmem:[#allocation2 + $0x30] sm:$0xff] %vm878_vm1, %v1014_v39  ;;  %v1017_v17 = vsel %vm872_vm0, %v1009_v58, %v1014_v39 }
 0x5f4   :  { %3467 = vmatmul.mubr.msk.f32.vlgmr.msra.gmra.mxu0 %vm741_vm2, %v1017_v17 }
 0x5f5   :  { %1312 = vmatpush1.msra.mxu0 %v4146_v6  ;;  %1359 = vmatprep.mubr.f32.mxu0 %v4059_v32 }
 0x5f6   :  { %1313 = vmatprep.subr.mxu0 %v4155_v8 }
 0x5f7   :  { %1314 = vmatpush1.msra.mxu0 %v4160_v9 }
 0x5f8   :  { %1315 = vmatprep.subr.mxu0 %v4166_v10 }
 0x5f9   :  { %1316 = vmatpush1.msra.mxu0 %v4172_v11 }
 0x5fa   :  { %1317 = vmatprep.subr.mxu0 %v4178_v12 }
 0x5fb   :  { %1318 = vmatpush1.msra.mxu0 %v4191_v15 }
 0x5fc   :  { %1319 = vmatprep.subr.mxu0 %v4208_v18 }
 0x5fd   :  { %1320 = vmatpush1.msra.mxu0 %v4214_v19 }
 0x5fe   :  { %1321 = vmatprep.subr.mxu0 %v4219_v20 }
 0x5ff   :  { %1322 = vmatpush1.msra.mxu0 %v4225_v21 }
 0x600   :  { %1323 = vmatprep.subr.mxu0 %v4232_v22 }
 0x601   :  { %1324 = vmatpush1.msra.mxu0 %v4245_v25 }
 0x602   :  { %1325 = vmatprep.subr.mxu0 %v4262_v28 }
 0x603   :  { %1326 = vmatpush1.msra.mxu0 %v4268_v29 }
 0x604   :  { %1585 = vmatprep.subr.mxu0 %v4131_v2 }
 0x6b4   :  { %v1087_v23 = vpop.f32.mrf.mxu0 }
 0x6b5   :  { %v1093_v26 = vadd.f32 %v1087_v23, %v4325_v59 }
 0x6b6   :  { %v1089_v43 = vpop.f32.mrf.mxu0 }
 0x6b7   :  { %3732 = vtanh.f32 %v1093_v26  ;;  %v1095_v40 = vadd.f32 %v1089_v43, %v4343_v48  ;;  %v3468_v30 = vmul.f32 -1.442695, %v1093_v26 }
 0x6b9   :  { %3734 = vtanh.f32 %v1095_v40  ;;  %v3469_v33 = vmul.f32 -1.442695, %v1095_v40 }
 0x6ba   :  { %3736 = vpow2.f32 %v3468_v30 }
 0x6bb   :  { %3738 = vpow2.f32 %v3469_v33 }
 0x6c4   :  { %v3733_v27 = vpop.eup %3732 }
 0x6c5   :  { %1112 = vrot.lane.b32.xlu0 %v3733_v27, %s4060_s3 }
 0x6c6   :  { %v3735_v38 = vpop.eup %3734 }
 0x6c7   :  { %1129 = vrot.lane.b32.xlu1 %v3735_v38, %s4060_s3  ;;  %v3737_v36 = vpop.eup %3736 }
 0x6c8   :  { %v3739_v41 = vpop.eup %3738  ;;  %v1099_v44 = vadd.f32 1.0, %v3737_v36 }
 0x6c9   :  { %v1106_v51 = vadd.f32 1.0, %v3739_v41 }
 0x6ca   :  { %3740 = vrcp.f32 %v1099_v44 }
 0x6cb   :  { %3742 = vrcp.f32 %v1106_v51 }
 0x6d7   :  { %v3741_v59 = vpop.eup %3740 }
 0x6d8   :  { %v3743_v60 = vpop.eup %3742  ;;  %v1110_v50 = vmul.f32 %v3741_v59, %v4395_v57 }
 0x6d9   :  { %v1127_v61 = vmul.f32 %v3743_v60, %v4399_v0 }
 0x737   :  { %v1113_v45 = vpop.permute.xlu0 %1112 }
 0x738   :  { %v1115_v48 = vmul.f32 %v3741_v59, %v1113_v45 }
 0x739   :  { %v1130_v46 = vpop.permute.xlu1 %1129 }
 0x73a   :  { %1117 = vrot.lane.b32.xlu0 %v1115_v48, %s4060_s3  ;;  %v1132_v49 = vmul.f32 %v3743_v60, %v1130_v46 }
 0x73c   :  { %1134 = vrot.lane.b32.xlu1 %v1132_v49, %s4060_s3 }
 0x7ac   :  { %v1118_v52 = vpop.permute.xlu0 %1117 }
 0x7ad   :  { %v4434_v56 = vadd.f32 %v1118_v52, %v1110_v50 }
 0x7ae   :  { %v1135_v62 = vpop.permute.xlu1 %1134 }
 0x7af   :  { %3744 = vtanh.f32 %v4434_v56  ;;  %v4438_v1 = vadd.f32 %v1135_v62, %v1127_v61 }
 0x7b1   :  { %3746 = vtanh.f32 %v4438_v1 }
 0x7bc   :  { %v3745_v5 = vpop.eup %3744 }
 0x7bd   :  { %1123 = vrot.lane.b32.xlu0 %v3745_v5, %s4060_s3 }
 0x7be   :  { %v3747_v7 = vpop.eup %3746 }
 0x7bf   :  { %1140 = vrot.lane.b32.xlu1 %v3747_v7, %s4060_s3 }
 0x82f   :  { %v1124_v53 = vpop.permute.xlu0 %1123 }
 0x830   :  { %v1126_v57 = vmul.f32 %v3741_v59, %v1124_v53 }
 0x831   :  { %v1141_v13 = vpop.permute.xlu1 %1140 }
 0x832   :  { %1145 = vrot.lane.b32.xlu0 %v1126_v57, %s4061_s21  ;;  %v1143_v16 = vmul.f32 %v3743_v60, %v1141_v13 }
 0x834   :  { %1150 = vrot.lane.b32.xlu1 %v1143_v16, %s4062_s22 }
 0x8a4   :  { %v1146_v0 = vpop.permute.xlu0 %1145 }
 0x8a5   :  { %1148 = vst.msk [vmem:[#allocation2 + $0x10] sm:$0xff] %vm872_vm0, %v1146_v0 }
 0x8a6   :  { %v1151_v58 = vpop.permute.xlu1 %1150 }
 0x8a7   :  { %1153 = vst.msk [vmem:[#allocation2 + $0x28] sm:$0xff] %vm878_vm1, %v1151_v58  ;;  %v1154_v39 = vsel %vm872_vm0, %v1146_v0, %v1151_v58 }
 0x8a8   :  { %3470 = vmatmul.mubr.msk.f32.vlgmr.msra.gmra.mxu1 %vm741_vm2, %v1154_v39 }
 0x8a9   :  { %1449 = vmatpush1.msra.mxu1 %v4146_v6  ;;  %1496 = vmatprep.mubr.f32.mxu1 %v4059_v32 }
 0x8aa   :  { %1450 = vmatprep.subr.mxu1 %v4155_v8 }
 0x8ab   :  { %1451 = vmatpush1.msra.mxu1 %v4160_v9 }
 0x8ac   :  { %1452 = vmatprep.subr.mxu1 %v4166_v10 }
 0x8ad   :  { %1453 = vmatpush1.msra.mxu1 %v4172_v11 }
 0x8ae   :  { %1454 = vmatprep.subr.mxu1 %v4178_v12 }
 0x8af   :  { %1455 = vmatpush1.msra.mxu1 %v4191_v15 }
 0x8b0   :  { %1456 = vmatprep.subr.mxu1 %v4208_v18 }
 0x8b1   :  { %1457 = vmatpush1.msra.mxu1 %v4214_v19 }
 0x8b2   :  { %1458 = vmatprep.subr.mxu1 %v4219_v20 }
 0x8b3   :  { %1459 = vmatpush1.msra.mxu1 %v4225_v21 }
 0x8b4   :  { %1460 = vmatprep.subr.mxu1 %v4232_v22 }
 0x8b5   :  { %1461 = vmatpush1.msra.mxu1 %v4245_v25 }
 0x8b6   :  { %1462 = vmatprep.subr.mxu1 %v4262_v28 }
 0x8b7   :  { %1463 = vmatpush1.msra.mxu1 %v4268_v29 }
 0x8b8   :  { %1722 = vmatprep.subr.mxu1 %v4131_v2 }
 0x968   :  { %v1224_v17 = vpop.f32.mrf.mxu1 }
 0x969   :  { %v1230_v23 = vadd.f32 %v1224_v17, %v4330_v4 }
 0x96a   :  { %v1226_v26 = vpop.f32.mrf.mxu1 }
 0x96b   :  { %3748 = vtanh.f32 %v1230_v23  ;;  %v1232_v43 = vadd.f32 %v1226_v26, %v4338_v31  ;;  %v3471_v38 = vmul.f32 -1.442695, %v1230_v23 }
 0x96d   :  { %3750 = vtanh.f32 %v1232_v43  ;;  %v3472_v30 = vmul.f32 -1.442695, %v1232_v43 }
 0x96e   :  { %3752 = vpow2.f32 %v3471_v38 }
 0x96f   :  { %3754 = vpow2.f32 %v3472_v30 }
 0x978   :  { %v3749_v40 = vpop.eup %3748 }
 0x979   :  { %1249 = vrot.lane.b32.xlu0 %v3749_v40, %s4060_s3 }
 0x97a   :  { %v3751_v27 = vpop.eup %3750 }
 0x97b   :  { %1266 = vrot.lane.b32.xlu1 %v3751_v27, %s4060_s3  ;;  %v3753_v33 = vpop.eup %3752 }
 0x97c   :  { %v3755_v2 = vpop.eup %3754  ;;  %v1236_v36 = vadd.f32 1.0, %v3753_v33 }
 0x97d   :  { %v1243_v41 = vadd.f32 1.0, %v3755_v2 }
 0x97e   :  { %3756 = vrcp.f32 %v1236_v36 }
 0x97f   :  { %3758 = vrcp.f32 %v1243_v41 }
 0x98b   :  { %v3757_v4 = vpop.eup %3756 }
 0x98c   :  { %v3759_v51 = vpop.eup %3758  ;;  %v1247_v48 = vmul.f32 %v3757_v4, %v4434_v56 }
 0x98d   :  { %v1264_v49 = vmul.f32 %v3759_v51, %v4438_v1 }
 0x9eb   :  { %v1250_v44 = vpop.permute.xlu0 %1249 }
 0x9ec   :  { %v1252_v31 = vmul.f32 %v3757_v4, %v1250_v44 }
 0x9ed   :  { %v1267_v59 = vpop.permute.xlu1 %1266 }
 0x9ee   :  { %1254 = vrot.lane.b32.xlu0 %v1252_v31, %s4060_s3  ;;  %v1269_v45 = vmul.f32 %v3759_v51, %v1267_v59 }
 0x9f0   :  { %1271 = vrot.lane.b32.xlu1 %v1269_v45, %s4060_s3 }
 0xa60   :  { %v1255_v60 = vpop.permute.xlu0 %1254 }
 0xa61   :  { %v4473_v46 = vadd.f32 %v1255_v60, %v1247_v48 }
 0xa62   :  { %v1272_v50 = vpop.permute.xlu1 %1271 }
 0xa63   :  { %3760 = vtanh.f32 %v4473_v46  ;;  %v4477_v52 = vadd.f32 %v1272_v50, %v1264_v49 }
 0xa65   :  { %3762 = vtanh.f32 %v4477_v52 }
 0xa70   :  { %v3761_v61 = vpop.eup %3760 }
 0xa71   :  { %1260 = vrot.lane.b32.xlu0 %v3761_v61, %s4060_s3 }
 0xa72   :  { %v3763_v62 = vpop.eup %3762 }
 0xa73   :  { %1277 = vrot.lane.b32.xlu1 %v3763_v62, %s4060_s3 }
 0xae3   :  { %v1261_v5 = vpop.permute.xlu0 %1260 }
 0xae4   :  { %v1263_v56 = vmul.f32 %v3757_v4, %v1261_v5 }
 0xae5   :  { %v1278_v7 = vpop.permute.xlu1 %1277 }
 0xae6   :  { %1282 = vrot.lane.b32.xlu0 %v1263_v56, %s4061_s21  ;;  %v1280_v53 = vmul.f32 %v3759_v51, %v1278_v7 }
 0xae8   :  { %1287 = vrot.lane.b32.xlu1 %v1280_v53, %s4062_s22 }
 0xb58   :  { %v1283_v1 = vpop.permute.xlu0 %1282 }
 0xb59   :  { %1285 = vst.msk [vmem:[#allocation2 + $0x18] sm:$0xff] %vm872_vm0, %v1283_v1 }
 0xb5a   :  { %v1288_v57 = vpop.permute.xlu1 %1287 }
 0xb5b   :  { %1290 = vst.msk [vmem:[#allocation2 + $0x20] sm:$0xff] %vm878_vm1, %v1288_v57  ;;  %v1291_v13 = vsel %vm872_vm0, %v1283_v1, %v1288_v57 }
 0xb5c   :  { %3473 = vmatmul.mubr.msk.f32.vlgmr.msra.gmra.mxu0 %vm741_vm2, %v1291_v13 }
 0xb5d   :  { %1586 = vmatpush1.msra.mxu0 %v4146_v6  ;;  %1633 = vmatprep.mubr.f32.mxu0 %v4059_v32 }
 0xb5e   :  { %1587 = vmatprep.subr.mxu0 %v4155_v8 }
 0xb5f   :  { %1588 = vmatpush1.msra.mxu0 %v4160_v9 }
 0xb60   :  { %1589 = vmatprep.subr.mxu0 %v4166_v10 }
 0xb61   :  { %1590 = vmatpush1.msra.mxu0 %v4172_v11 }
 0xb62   :  { %1591 = vmatprep.subr.mxu0 %v4178_v12 }
 0xb63   :  { %1592 = vmatpush1.msra.mxu0 %v4191_v15 }
 0xb64   :  { %1593 = vmatprep.subr.mxu0 %v4208_v18 }
 0xb65   :  { %1594 = vmatpush1.msra.mxu0 %v4214_v19 }
 0xb66   :  { %1595 = vmatprep.subr.mxu0 %v4219_v20 }
 0xb67   :  { %1596 = vmatpush1.msra.mxu0 %v4225_v21 }
 0xb68   :  { %1597 = vmatprep.subr.mxu0 %v4232_v22 }
 0xb69   :  { %1598 = vmatpush1.msra.mxu0 %v4245_v25 }
 0xb6a   :  { %1599 = vmatprep.subr.mxu0 %v4262_v28 }
 0xb6b   :  { %1600 = vmatpush1.msra.mxu0 %v4268_v29 }
 0xc1c   :  { %v1361_v16 = vpop.f32.mrf.mxu0 }
 0xc1d   :  { %v1367_v0 = vadd.f32 %v1361_v16, %v4335_v24 }
 0xc1e   :  { %v1363_v58 = vpop.f32.mrf.mxu0 }
 0xc1f   :  { %3764 = vtanh.f32 %v1367_v0  ;;  %v1369_v39 = vadd.f32 %v1363_v58, %v4333_v14  ;;  %v3474_v26 = vmul.f32 -1.442695, %v1367_v0 }
 0xc21   :  { %3766 = vtanh.f32 %v1369_v39  ;;  %v3475_v43 = vmul.f32 -1.442695, %v1369_v39 }
 0xc22   :  { %3768 = vpow2.f32 %v3474_v26 }
 0xc23   :  { %3770 = vpow2.f32 %v3475_v43 }
 0xc2c   :  { %v3765_v17 = vpop.eup %3764 }
 0xc2d   :  { %1386 = vrot.lane.b32.xlu0 %v3765_v17, %s4060_s3 }
 0xc2e   :  { %v3767_v23 = vpop.eup %3766 }
 0xc2f   :  { %1403 = vrot.lane.b32.xlu1 %v3767_v23, %s4060_s3  ;;  %v3769_v40 = vpop.eup %3768 }
 0xc30   :  { %v3771_v27 = vpop.eup %3770  ;;  %v1373_v38 = vadd.f32 1.0, %v3769_v40 }
 0xc31   :  { %v1380_v30 = vadd.f32 1.0, %v3771_v27 }
 0xc32   :  { %3772 = vrcp.f32 %v1373_v38 }
 0xc33   :  { %3774 = vrcp.f32 %v1380_v30 }
 0xc3f   :  { %v3773_v24 = vpop.eup %3772 }
 0xc40   :  { %v3775_v2 = vpop.eup %3774  ;;  %v1384_v4 = vmul.f32 %v3773_v24, %v4473_v46 }
 0xc41   :  { %v1401_v51 = vmul.f32 %v3775_v2, %v4477_v52 }
 0xc9f   :  { %v1387_v33 = vpop.permute.xlu0 %1386 }
 0xca0   :  { %v1389_v14 = vmul.f32 %v3773_v24, %v1387_v33 }
 0xca1   :  { %v1404_v36 = vpop.permute.xlu1 %1403 }
 0xca2   :  { %1391 = vrot.lane.b32.xlu0 %v1389_v14, %s4060_s3  ;;  %v1406_v41 = vmul.f32 %v3775_v2, %v1404_v36 }
 0xca4   :  { %1408 = vrot.lane.b32.xlu1 %v1406_v41, %s4060_s3 }
 0xd14   :  { %v1392_v44 = vpop.permute.xlu0 %1391 }
 0xd15   :  { %v4511_v31 = vadd.f32 %v1392_v44, %v1384_v4 }
 0xd16   :  { %v1409_v59 = vpop.permute.xlu1 %1408 }
 0xd17   :  { %3776 = vtanh.f32 %v4511_v31  ;;  %v4515_v45 = vadd.f32 %v1409_v59, %v1401_v51 }
 0xd19   :  { %3778 = vtanh.f32 %v4515_v45 }
 0xd24   :  { %v3777_v48 = vpop.eup %3776 }
 0xd25   :  { %1397 = vrot.lane.b32.xlu0 %v3777_v48, %s4060_s3 }
 0xd26   :  { %v3779_v60 = vpop.eup %3778 }
 0xd27   :  { %1414 = vrot.lane.b32.xlu1 %v3779_v60, %s4060_s3 }
 0xd97   :  { %v1398_v49 = vpop.permute.xlu0 %1397 }
 0xd98   :  { %v1400_v46 = vmul.f32 %v3773_v24, %v1398_v49 }
 0xd99   :  { %v1415_v50 = vpop.permute.xlu1 %1414 }
 0xd9a   :  { %1419 = vrot.lane.b32.xlu0 %v1400_v46, %s4061_s21  ;;  %v1417_v61 = vmul.f32 %v3775_v2, %v1415_v50 }
 0xd9c   :  { %1424 = vrot.lane.b32.xlu1 %v1417_v61, %s4062_s22 }
 0xe0c   :  { %v1420_v52 = vpop.permute.xlu0 %1419 }
 0xe0d   :  { %1422 = vst.msk [vmem:[#allocation2 + $0x20] sm:$0xff] %vm872_vm0, %v1420_v52 }
 0xe0e   :  { %v1425_v62 = vpop.permute.xlu1 %1424 }
 0xe0f   :  { %1427 = vst.msk [vmem:[#allocation2 + $0x18] sm:$0xff] %vm878_vm1, %v1425_v62  ;;  %v1428_v5 = vsel %vm872_vm0, %v1420_v52, %v1425_v62 }
 0xe10   :  { %3476 = vmatmul.mubr.msk.f32.vlgmr.msra.gmra.mxu1 %vm741_vm2, %v1428_v5 }
 0xe11   :  { %1723 = vmatpush1.msra.mxu1 %v4146_v6  ;;  %1770 = vmatprep.mubr.f32.mxu1 %v4059_v32 }
 0xe12   :  { %1724 = vmatprep.subr.mxu1 %v4155_v8 }
 0xe13   :  { %1725 = vmatpush1.msra.mxu1 %v4160_v9 }
 0xe14   :  { %1726 = vmatprep.subr.mxu1 %v4166_v10 }
 0xe15   :  { %1727 = vmatpush1.msra.mxu1 %v4172_v11 }
 0xe16   :  { %1728 = vmatprep.subr.mxu1 %v4178_v12 }
 0xe17   :  { %1729 = vmatpush1.msra.mxu1 %v4191_v15 }
 0xe18   :  { %1730 = vmatprep.subr.mxu1 %v4208_v18 }
 0xe19   :  { %1731 = vmatpush1.msra.mxu1 %v4214_v19 }
 0xe1a   :  { %1732 = vmatprep.subr.mxu1 %v4219_v20 }
 0xe1b   :  { %1733 = vmatpush1.msra.mxu1 %v4225_v21 }
 0xe1c   :  { %1734 = vmatprep.subr.mxu1 %v4232_v22 }
 0xe1d   :  { %1735 = vmatpush1.msra.mxu1 %v4245_v25 }
 0xe1e   :  { %1736 = vmatprep.subr.mxu1 %v4262_v28 }
 0xe1f   :  { %1737 = vmatpush1.msra.mxu1 %v4268_v29 }
 0xed0   :  { %v1498_v6 = vpop.f32.mrf.mxu1 }
 0xed1   :  { %v1504_v8 = vadd.f32 %v1498_v6, %v4340_v42 }
 0xed2   :  { %v1500_v9 = vpop.f32.mrf.mxu1 }
 0xed3   :  { %3780 = vtanh.f32 %v1504_v8  ;;  %v1506_v10 = vadd.f32 %v1500_v9, %v4328_v63  ;;  %v3477_v15 = vmul.f32 -1.442695, %v1504_v8 }
 0xed5   :  { %3782 = vtanh.f32 %v1506_v10  ;;  %v3478_v18 = vmul.f32 -1.442695, %v1506_v10 }
 0xed6   :  { %3784 = vpow2.f32 %v3477_v15 }
 0xed7   :  { %3786 = vpow2.f32 %v3478_v18 }
 0xee0   :  { %v3781_v11 = vpop.eup %3780 }
 0xee1   :  { %1523 = vrot.lane.b32.xlu0 %v3781_v11, %s4060_s3 }
 0xee2   :  { %v3783_v12 = vpop.eup %3782 }
 0xee3   :  { %1540 = vrot.lane.b32.xlu1 %v3783_v12, %s4060_s3  ;;  %v3785_v19 = vpop.eup %3784 }
 0xee4   :  { %v3787_v20 = vpop.eup %3786  ;;  %v1510_v21 = vadd.f32 1.0, %v3785_v19 }
 0xee5   :  { %v1517_v22 = vadd.f32 1.0, %v3787_v20 }
 0xee6   :  { %3788 = vrcp.f32 %v1510_v21 }
 0xee7   :  { %3790 = vrcp.f32 %v1517_v22 }
 0xef3   :  { %v3789_v25 = vpop.eup %3788 }
 0xef4   :  { %v3791_v63 = vpop.eup %3790  ;;  %v1521_v7 = vmul.f32 %v3789_v25, %v4511_v31 }
 0xef5   :  { %v1538_v57 = vmul.f32 %v3791_v63, %v4515_v45 }
 0xf53   :  { %v1524_v28 = vpop.permute.xlu0 %1523 }
 0xf54   :  { %v1526_v29 = vmul.f32 %v3789_v25, %v1524_v28 }
 0xf55   :  { %v1541_v42 = vpop.permute.xlu1 %1540 }
 0xf56   :  { %1528 = vrot.lane.b32.xlu0 %v1526_v29, %s4060_s3  ;;  %v1543_v56 = vmul.f32 %v3791_v63, %v1541_v42 }
 0xf58   :  { %1545 = vrot.lane.b32.xlu1 %v1543_v56, %s4060_s3 }
 0xfc8   :  { %v1529_v53 = vpop.permute.xlu0 %1528 }
 0xfc9   :  { %v1531_v1 = vadd.f32 %v1529_v53, %v1521_v7 }
 0xfca   :  { %v1546_v13 = vpop.permute.xlu1 %1545 }
 0xfcb   :  { %3792 = vtanh.f32 %v1531_v1  ;;  %v1548_v16 = vadd.f32 %v1546_v13, %v1538_v57 }
 0xfcd   :  { %3794 = vtanh.f32 %v1548_v16 }
 0xfd8   :  { %v3793_v0 = vpop.eup %3792 }
 0xfd9   :  { %1534 = vrot.lane.b32.xlu0 %v3793_v0, %s4060_s3 }
 0xfda   :  { %v3795_v58 = vpop.eup %3794 }
 0xfdb   :  { %1551 = vrot.lane.b32.xlu1 %v3795_v58, %s4060_s3 }
0x104b   :  { %v1535_v39 = vpop.permute.xlu0 %1534 }
0x104c   :  { %v1537_v17 = vmul.f32 %v3789_v25, %v1535_v39 }
0x104d   :  { %v1552_v23 = vpop.permute.xlu1 %1551 }
0x104e   :  { %1556 = vrot.lane.b32.xlu0 %v1537_v17, %s4061_s21  ;;  %v1554_v26 = vmul.f32 %v3791_v63, %v1552_v23 }
0x1050   :  { %1561 = vrot.lane.b32.xlu1 %v1554_v26, %s4062_s22 }
0x10c0   :  { %v1557_v43 = vpop.permute.xlu0 %1556 }
0x10c1   :  { %1559 = vst.msk [vmem:[#allocation2 + $0x28] sm:$0xff] %vm872_vm0, %v1557_v43 }
0x10c2   :  { %v1562_v40 = vpop.permute.xlu1 %1561 }
0x10c3   :  { %1564 = vst.msk [vmem:[#allocation2 + $0x10] sm:$0xff] %vm878_vm1, %v1562_v40  ;;  %v1565_v27 = vsel %vm872_vm0, %v1557_v43, %v1562_v40  ;;  %v1862_v43 = vld [vmem:[%s5102_s4 + $0x78] sm:$0xff]  ;;  %v1861_v40 = vld [vmem:[%s5102_s4 + $0x70] sm:$0xff] }
0x10c4   :  { %3479 = vmatmul.mubr.msk.f32.vlgmr.msra.gmra.mxu0 %vm741_vm2, %v1565_v27  ;;  %v1860_v27 = vld [vmem:[%s5102_s4 + $0x68] sm:$0xff]  ;;  %1915 = vmatprep.subr.mxu0 %v1862_v43 }
0x10c5   :  { %1963 = vmatprep.mubr.f32.mxu0 %v4059_v32  ;;  %1916 = vmatpush1.msra.mxu0 %v1861_v40 }
0x10c6   :  { %1917 = vmatprep.subr.mxu0 %v1860_v27 }
0x1184   :  { %v1635_v38 = vpop.f32.mrf.mxu0 }
0x1185   :  { %v1641_v30 = vadd.f32 %v1635_v38, %v4345_v54  ;;  %v4597_v38 = vld [vmem:[#allocation6 + $0x78] sm:$0xff] }
0x1186   :  { %v1637_v24 = vpop.f32.mrf.mxu0  ;;  %2060 = vmatprep.subr.mxu1 %v4597_v38 }
0x1187   :  { %3796 = vtanh.f32 %v1641_v30  ;;  %v1643_v33 = vadd.f32 %v1637_v24, %v4323_v55  ;;  %v3480_v36 = vmul.f32 -1.442695, %v1641_v30  ;;  %v1859_v30 = vld [vmem:[%s5102_s4 + $0x60] sm:$0xff]  ;;  %v4602_v24 = vld [vmem:[#allocation6 + $0x70] sm:$0xff] }
0x1188   :  { %1918 = vmatpush1.msra.mxu0 %v1859_v30 }
0x1189   :  { %3798 = vtanh.f32 %v1643_v33  ;;  %v3481_v41 = vmul.f32 -1.442695, %v1643_v33  ;;  %v1858_v33 = vld [vmem:[%s5102_s4 + $0x58] sm:$0xff] }
0x118a   :  { %3800 = vpow2.f32 %v3480_v36  ;;  %v4614_v36 = vld [vmem:[#allocation6 + $0x60] sm:$0xff]  ;;  %1919 = vmatprep.subr.mxu0 %v1858_v33 }
0x118b   :  { %3802 = vpow2.f32 %v3481_v41 }
0x1194   :  { %v3797_v14 = vpop.eup %3796 }
0x1195   :  { %1660 = vrot.lane.b32.xlu0 %v3797_v14, %s4060_s3  ;;  %v4608_v14 = vld [vmem:[#allocation6 + $0x68] sm:$0xff] }
0x1196   :  { %v3799_v2 = vpop.eup %3798 }
0x1197   :  { %1677 = vrot.lane.b32.xlu1 %v3799_v2, %s4060_s3  ;;  %v3801_v4 = vpop.eup %3800  ;;  %v1857_v2 = vld [vmem:[%s5102_s4 + $0x50] sm:$0xff] }
0x1198   :  { %v3803_v44 = vpop.eup %3802  ;;  %v1647_v31 = vadd.f32 1.0, %v3801_v4  ;;  %1920 = vmatpush1.msra.mxu0 %v1857_v2 }
0x1199   :  { %v1654_v51 = vadd.f32 1.0, %v3803_v44  ;;  %v1856_v44 = vld [vmem:[%s5102_s4 + $0x48] sm:$0xff] }
0x119a   :  { %3804 = vrcp.f32 %v1647_v31  ;;  %v4623_v31 = vld [vmem:[#allocation6 + $0x58] sm:$0xff]  ;;  %1921 = vmatprep.subr.mxu0 %v1856_v44 }
0x119b   :  { %3806 = vrcp.f32 %v1654_v51  ;;  %v1855_v51 = vld [vmem:[%s5102_s4 + $0x40] sm:$0xff] }
0x119c   :  { %1922 = vmatpush1.msra.mxu0 %v1855_v51 }
0x11a7   :  { %v3805_v54 = vpop.eup %3804 }
0x11a8   :  { %v3807_v45 = vpop.eup %3806  ;;  %v1658_v49 = vmul.f32 %v3805_v54, %v1531_v1 }
0x11a9   :  { %v1675_v61 = vmul.f32 %v3807_v45, %v1548_v16 }
0x1207   :  { %v1661_v59 = vpop.permute.xlu0 %1660 }
0x1208   :  { %v1663_v55 = vmul.f32 %v3805_v54, %v1661_v59  ;;  %v1854_v59 = vld [vmem:[%s5102_s4 + $0x38] sm:$0xff] }
0x1209   :  { %v1678_v48 = vpop.permute.xlu1 %1677  ;;  %1923 = vmatprep.subr.mxu0 %v1854_v59 }
0x120a   :  { %1665 = vrot.lane.b32.xlu0 %v1663_v55, %s4060_s3  ;;  %v1680_v60 = vmul.f32 %v3807_v45, %v1678_v48  ;;  %v4635_v55 = vld [vmem:[#allocation6 + $0x48] sm:$0xff]  ;;  %v4641_v48 = vld [vmem:[#allocation6 + $0x40] sm:$0xff] }
0x120c   :  { %1682 = vrot.lane.b32.xlu1 %v1680_v60, %s4060_s3  ;;  %v1852_v60 = vld [vmem:[%s5102_s4 + $0x28] sm:$0xff] }
0x127c   :  { %v1666_v46 = vpop.permute.xlu0 %1665 }
0x127d   :  { %v1668_v50 = vadd.f32 %v1666_v46, %v1658_v49  ;;  %v4647_v49 = vld [vmem:[#allocation6 + $0x38] sm:$0xff]  ;;  %v1851_v46 = vld [vmem:[%s5102_s4 + $0x20] sm:$0xff] }
0x127e   :  { %v1683_v52 = vpop.permute.xlu1 %1682 }
0x127f   :  { %3808 = vtanh.f32 %v1668_v50  ;;  %v1685_v62 = vadd.f32 %v1683_v52, %v1675_v61  ;;  %v1850_v61 = vld [vmem:[%s5102_s4 + $0x18] sm:$0xff]  ;;  %v4658_v52 = vld [vmem:[#allocation6 + $0x28] sm:$0xff] }
0x1281   :  { %3810 = vtanh.f32 %v1685_v62 }
0x128c   :  { %v3809_v5 = vpop.eup %3808 }
0x128d   :  { %1671 = vrot.lane.b32.xlu0 %v3809_v5, %s4060_s3  ;;  %v4664_v5 = vld [vmem:[#allocation6 + $0x20] sm:$0xff] }
0x128e   :  { %v3811_v6 = vpop.eup %3810 }
0x128f   :  { %1688 = vrot.lane.b32.xlu1 %v3811_v6, %s4060_s3  ;;  %v1848_v6 = vld [vmem:[%s5102_s4 + $0x8] sm:$0xff] }
0x12ff   :  { %v1672_v8 = vpop.permute.xlu0 %1671 }
0x1300   :  { %v1674_v9 = vmul.f32 %v3805_v54, %v1672_v8  ;;  %v4629_v54 = vld [vmem:[#allocation6 + $0x50] sm:$0xff]  ;;  %v4669_v8 = vld [vmem:[#allocation6 + $0x18] sm:$0xff] }
0x1301   :  { %v1689_v10 = vpop.permute.xlu1 %1688 }
0x1302   :  { %1693 = vrot.lane.b32.xlu0 %v1674_v9, %s4061_s21  ;;  %v1691_v11 = vmul.f32 %v3807_v45, %v1689_v10  ;;  %v1853_v45 = vld [vmem:[%s5102_s4 + $0x30] sm:$0xff]  ;;  %v1847_v9 = vld [vmem:[%s5102_s4] sm:$0xff] }
0x1303   :  { %1924 = vmatpush1.msra.mxu0 %v1853_v45  ;;  %v4675_v10 = vld [vmem:[#allocation6 + $0x10] sm:$0xff] }
0x1304   :  { %1698 = vrot.lane.b32.xlu1 %v1691_v11, %s4062_s22  ;;  %1925 = vmatprep.subr.mxu0 %v1852_v60 }
0x1305   :  { %1926 = vmatpush1.msra.mxu0 %v1851_v46 }
0x1306   :  { %1927 = vmatprep.subr.mxu0 %v1850_v61 }
0x1374   :  { %v1694_v12 = vpop.permute.xlu0 %1693 }
0x1375   :  { %1696 = vst.msk [vmem:[#allocation2 + $0x30] sm:$0xff] %vm872_vm0, %v1694_v12 }
0x1376   :  { %v1699_v15 = vpop.permute.xlu1 %1698 }
0x1377   :  { %1701 = vst.msk [vmem:[#allocation2 + $0x8] sm:$0xff] %vm878_vm1, %v1699_v15  ;;  %v1702_v18 = vsel %vm872_vm0, %v1694_v12, %v1699_v15  ;;  %v4680_v12 = vld [vmem:[#allocation6 + $0x8] sm:$0xff] }
0x1378   :  { %3482 = vmatmul.mubr.msk.f32.vlgmr.msra.gmra.mxu1 %vm741_vm2, %v1702_v18  ;;  %v4684_v18 = vld [vmem:[#allocation6] sm:$0xff] }
0x1379   :  { %2108 = vmatprep.mubr.f32.mxu1 %v4059_v32  ;;  %2061 = vmatpush1.msra.mxu1 %v4602_v24 }
0x137a   :  { %2062 = vmatprep.subr.mxu1 %v4608_v14 }
0x137b   :  { %2063 = vmatpush1.msra.mxu1 %v4614_v36 }
0x137c   :  { %2064 = vmatprep.subr.mxu1 %v4623_v31 }
0x137d   :  { %2065 = vmatpush1.msra.mxu1 %v4629_v54 }
0x137e   :  { %2066 = vmatprep.subr.mxu1 %v4635_v55 }
0x137f   :  { %2067 = vmatpush1.msra.mxu1 %v4641_v48 }
0x1380   :  { %2068 = vmatprep.subr.mxu1 %v4647_v49 }
0x1438   :  { %v1772_v19 = vpop.f32.mrf.mxu1 }
0x1439   :  { %v1778_v20 = vadd.f32 %v1772_v19, %v4350_v3 }
0x143a   :  { %v1774_v21 = vpop.f32.mrf.mxu1 }
0x143b   :  { %3812 = vtanh.f32 %v1778_v20  ;;  %v1780_v22 = vadd.f32 %v1774_v21, %v4318_v47  ;;  %v3483_v29 = vmul.f32 -1.442695, %v1778_v20 }
0x143d   :  { %3814 = vtanh.f32 %v1780_v22  ;;  %v3484_v63 = vmul.f32 -1.442695, %v1780_v22 }
0x143e   :  { %3816 = vpow2.f32 %v3483_v29  ;;  %v1841_v29 = vld [vmem:[#allocation2 + $0x10] sm:$0xff] }
0x143f   :  { %3818 = vpow2.f32 %v3484_v63  ;;  %v1842_v63 = vld [vmem:[#allocation2 + $0x18] sm:$0xff] }
0x1448   :  { %v3813_v25 = vpop.eup %3812 }
0x1449   :  { %1797 = vrot.lane.b32.xlu1 %v3813_v25, %s4060_s3 }
0x144a   :  { %v3815_v28 = vpop.eup %3814 }
0x144b   :  { %1814 = vrot.lane.b32.xlu0 %v3815_v28, %s4060_s3  ;;  %v3817_v42 = vpop.eup %3816  ;;  %v1840_v28 = vld [vmem:[#allocation2 + $0x8] sm:$0xff] }
0x144c   :  { %v3819_v56 = vpop.eup %3818  ;;  %v1784_v7 = vadd.f32 1.0, %v3817_v42  ;;  %v1843_v42 = vld [vmem:[#allocation2 + $0x20] sm:$0xff] }
0x144d   :  { %v1791_v53 = vadd.f32 1.0, %v3819_v56  ;;  %v1844_v56 = vld [vmem:[#allocation2 + $0x28] sm:$0xff] }
0x144e   :  { %3820 = vrcp.f32 %v1784_v7  ;;  %v1845_v7 = vld [vmem:[#allocation2 + $0x30] sm:$0xff] }
0x144f   :  { %3822 = vrcp.f32 %v1791_v53 }
0x145b   :  { %v4578_v3 = vpop.eup %3820 }
0x145c   :  { %v4581_v57 = vpop.eup %3822  ;;  %v1795_v0 = vmul.f32 %v4578_v3, %v1668_v50  ;;  %v4652_v50 = vld [vmem:[#allocation6 + $0x30] sm:$0xff] }
0x145d   :  { %v1812_v17 = vmul.f32 %v4581_v57, %v1685_v62  ;;  %v1849_v62 = vld [vmem:[%s5102_s4 + $0x10] sm:$0xff]  ;;  %2069 = vmatpush1.msra.mxu1 %v4652_v50 }
0x145e   :  { %2070 = vmatprep.subr.mxu1 %v4658_v52  ;;  %1928 = vmatpush1.msra.mxu0 %v1849_v62 }
0x145f   :  { %2071 = vmatpush1.msra.mxu1 %v4664_v5  ;;  %1929 = vmatprep.subr.mxu0 %v1848_v6 }
0x1460   :  { %2072 = vmatprep.subr.mxu1 %v4669_v8  ;;  %1930 = vmatpush1.msra.mxu0 %v1847_v9 }
0x1461   :  { %2073 = vmatpush1.msra.mxu1 %v4675_v10  ;;  %2334 = vmatprep.subr.mxu0 %v4597_v38 }
0x1462   :  { %2074 = vmatprep.subr.mxu1 %v4680_v12 }
0x1463   :  { %2075 = vmatpush1.msra.mxu1 %v4684_v18 }
0x1464   :  { %2109 = vmatmul.mubr.f32.vlgmr.msra.gmra.mxu1 %v4059_v32  ;;  %2197 = vmatprep.subr.mxu1 %v4597_v38 }
0x1465   :  { %2245 = vmatprep.mubr.f32.mxu1 %v4059_v32  ;;  %2198 = vmatpush1.msra.mxu1 %v4602_v24 }
0x1466   :  { %2199 = vmatprep.subr.mxu1 %v4608_v14 }
0x1467   :  { %2200 = vmatpush1.msra.mxu1 %v4614_v36 }
0x1468   :  { %2201 = vmatprep.subr.mxu1 %v4623_v31 }
0x1469   :  { %2202 = vmatpush1.msra.mxu1 %v4629_v54 }
0x146a   :  { %2203 = vmatprep.subr.mxu1 %v4635_v55 }
0x146b   :  { %2204 = vmatpush1.msra.mxu1 %v4641_v48 }
0x146c   :  { %2205 = vmatprep.subr.mxu1 %v4647_v49 }
0x146d   :  { %2206 = vmatpush1.msra.mxu1 %v4652_v50 }
0x146e   :  { %2207 = vmatprep.subr.mxu1 %v4658_v52 }
0x146f   :  { %2208 = vmatpush1.msra.mxu1 %v4664_v5 }
0x1470   :  { %2209 = vmatprep.subr.mxu1 %v4669_v8 }
0x1471   :  { %2210 = vmatpush1.msra.mxu1 %v4675_v10 }
0x1472   :  { %2211 = vmatprep.subr.mxu1 %v4680_v12 }
0x1473   :  { %2212 = vmatpush1.msra.mxu1 %v4684_v18 }
0x1474   :  { %2471 = vmatprep.subr.mxu1 %v4597_v38 }
0x14bb   :  { %v1798_v47 = vpop.permute.xlu1 %1797 }
0x14bc   :  { %v1800_v1 = vmul.f32 %v4578_v3, %v1798_v47 }
0x14bd   :  { %v1815_v13 = vpop.permute.xlu0 %1814 }
0x14be   :  { %1802 = vrot.lane.b32.xlu1 %v1800_v1, %s4060_s3  ;;  %v1817_v16 = vmul.f32 %v4581_v57, %v1815_v13 }
0x14c0   :  { %1819 = vrot.lane.b32.xlu0 %v1817_v16, %s4060_s3 }
0x1524   :  { %v2110_v13 = vpop.f32.mrf.mxu1 }
0x1530   :  { %v1803_v58 = vpop.permute.xlu1 %1802 }
0x1531   :  { %v1805_v39 = vadd.f32 %v1803_v58, %v1795_v0 }
0x1532   :  { %v1820_v23 = vpop.permute.xlu0 %1819 }
0x1533   :  { %3824 = vtanh.f32 %v1805_v39  ;;  %v1822_v26 = vadd.f32 %v1820_v23, %v1812_v17 }
0x1535   :  { %3826 = vtanh.f32 %v1822_v26 }
0x1540   :  { %v3825_v41 = vpop.eup %3824 }
0x1541   :  { %1808 = vrot.lane.b32.xlu1 %v3825_v41, %s4060_s3 }
0x1542   :  { %v3827_v4 = vpop.eup %3826 }
0x1543   :  { %1825 = vrot.lane.b32.xlu0 %v3827_v4, %s4060_s3 }
0x15b3   :  { %v1809_v11 = vpop.permute.xlu1 %1808 }
0x15b4   :  { %v1811_v15 = vmul.f32 %v4578_v3, %v1809_v11  ;;  %v1863_v3 = vld [vmem:[%s5104_s6] sm:$0x3] }
0x15b5   :  { %v1826_v19 = vpop.permute.xlu0 %1825  ;;  %v1868_v47 = vrot.slane %v1863_v3, %v155_v37  ;;  %v1872_v1 = vrot.slane %v1863_v3, %v159_v35 }
0x15b6   :  { %1830 = vrot.lane.b32.xlu1 %v1811_v15, %s4061_s21  ;;  %v1828_v20 = vmul.f32 %v4581_v57, %v1826_v19 }
0x15b8   :  { %1835 = vrot.lane.b32.xlu0 %v1828_v20, %s4062_s22 }
0x1628   :  { %v1831_v21 = vpop.permute.xlu1 %1830 }
0x1629   :  { %1833 = vst.msk [vmem:[#allocation2 + $0x38] sm:$0xff] %vm872_vm0, %v1831_v21 }
0x162a   :  { %v1836_v22 = vpop.permute.xlu0 %1835 }
0x162b   :  { %1838 = vst.msk [vmem:[#allocation2] sm:$0xff] %vm878_vm1, %v1836_v22  ;;  %v2112_v22 = vpop.f32.mrf.mxu1 }
0x1630   :  { %v1846_v53 = vld [vmem:[#allocation2 + $0x38] sm:$0xff] }
0x1632   :  { %v1839_v25 = vld [vmem:[#allocation2] sm:$0xff] }
0x1633   :  { %3485 = vmatmul.mubr.msk.f32.vlgmr.msra.gmra.mxu0 %vm741_vm2, %v1839_v25 }
0x1634   :  { %1969 = vmatprep.mubr.f32.mxu0 %v4059_v32  ;;  %2335 = vmatpush1.msra.mxu0 %v4602_v24 }
0x1635   :  { %2336 = vmatprep.subr.mxu0 %v4608_v14 }
0x1636   :  { %2337 = vmatpush1.msra.mxu0 %v4614_v36 }
0x1637   :  { %3486 = vmatmul.mubr.msk.f32.gmra.mxu0 %vm741_vm2, %v1840_v28  ;;  %2338 = vmatprep.subr.mxu0 %v4623_v31 }
0x1638   :  { %1975 = vmatprep.mubr.f32.mxu0 %v4059_v32  ;;  %2339 = vmatpush1.msra.mxu0 %v4629_v54 }
0x1639   :  { %2340 = vmatprep.subr.mxu0 %v4635_v55 }
0x163a   :  { %2341 = vmatpush1.msra.mxu0 %v4641_v48 }
0x163b   :  { %3487 = vmatmul.mubr.msk.f32.gmra.mxu0 %vm741_vm2, %v1841_v29  ;;  %2342 = vmatprep.subr.mxu0 %v4647_v49 }
0x163c   :  { %1981 = vmatprep.mubr.f32.mxu0 %v4059_v32  ;;  %2343 = vmatpush1.msra.mxu0 %v4652_v50 }
0x163d   :  { %2344 = vmatprep.subr.mxu0 %v4658_v52 }
0x163e   :  { %2345 = vmatpush1.msra.mxu0 %v4664_v5 }
0x163f   :  { %3488 = vmatmul.mubr.msk.f32.gmra.mxu0 %vm741_vm2, %v1842_v63  ;;  %2346 = vmatprep.subr.mxu0 %v4669_v8 }
0x1640   :  { %1987 = vmatprep.mubr.f32.mxu0 %v4059_v32  ;;  %2347 = vmatpush1.msra.mxu0 %v4675_v10 }
0x1641   :  { %2348 = vmatprep.subr.mxu0 %v4680_v12 }
0x1642   :  { %2349 = vmatpush1.msra.mxu0 %v4684_v18 }
0x1643   :  { %3489 = vmatmul.mubr.msk.f32.gmra.mxu0 %vm741_vm2, %v1843_v42  ;;  %2608 = vmatprep.subr.mxu0 %v4597_v38 }
0x1644   :  { %1993 = vmatprep.mubr.f32.mxu0 %v4059_v32 }
0x1647   :  { %3490 = vmatmul.mubr.msk.f32.gmra.mxu0 %vm741_vm2, %v1844_v56 }
0x1648   :  { %1999 = vmatprep.mubr.f32.mxu0 %v4059_v32 }
0x164b   :  { %3491 = vmatmul.mubr.msk.f32.gmra.mxu0 %vm741_vm2, %v1845_v7 }
0x164c   :  { %2005 = vmatprep.mubr.f32.mxu0 %v4059_v32 }
0x164f   :  { %3492 = vmatmul.mubr.msk.f32.gmra.mxu0 %vm741_vm2, %v1846_v53 }
0x1650   :  { %2382 = vmatprep.mubr.f32.mxu0 %v4059_v32 }
0x16f3   :  { %v1965_v57 = vpop.f32.mrf.mxu0 }
0x16f4   :  { %v1966_v16 = vadd.f32 %v1965_v57, %v1868_v47 }
0x16f5   :  { %v1967_v0 = vpop.f32.mrf.mxu0 }
0x16f6   :  { %v4751_v58 = vadd.f32 %v1967_v0, %v1872_v1  ;;  %v2116_v39 = vadd.f32 %v2110_v13, %v1966_v16 }
0x16f7   :  { %v1971_v17 = vpop.f32.mrf.mxu0 }
0x16f8   :  { %3828 = vtanh.f32 %v2116_v39  ;;  %v4753_v23 = vadd.f32 %v1971_v17, %v1868_v47  ;;  %v3493_v29 = vmul.f32 -1.442695, %v2116_v39 }
0x16f9   :  { %v1973_v26 = vpop.f32.mrf.mxu0 }
0x16fa   :  { %v4755_v43 = vadd.f32 %v1973_v26, %v1872_v1 }
0x16fb   :  { %v1977_v40 = vpop.f32.mrf.mxu0 }
0x16fc   :  { %v4757_v27 = vadd.f32 %v1977_v40, %v1868_v47 }
0x16fd   :  { %v1979_v37 = vpop.f32.mrf.mxu0 }
0x16fe   :  { %v4759_v34 = vadd.f32 %v1979_v37, %v1872_v1 }
0x16ff   :  { %v1983_v35 = vpop.f32.mrf.mxu0 }
0x1700   :  { %v4761_v30 = vadd.f32 %v1983_v35, %v1868_v47 }
0x1701   :  { %v1985_v33 = vpop.f32.mrf.mxu0 }
0x1702   :  { %v4763_v2 = vadd.f32 %v1985_v33, %v1872_v1 }
0x1703   :  { %v1989_v41 = vpop.f32.mrf.mxu0 }
0x1704   :  { %v4765_v4 = vadd.f32 %v1989_v41, %v1868_v47 }
0x1705   :  { %v3829_v44 = vpop.eup %3828  ;;  %v1991_v51 = vpop.f32.mrf.mxu0 }
0x1706   :  { %v4767_v59 = vadd.f32 %v1991_v51, %v1872_v1  ;;  %2135 = vrot.lane.b32.xlu0 %v3829_v44, %s4060_s3 }
0x1707   :  { %v1995_v45 = vpop.f32.mrf.mxu0 }
0x1708   :  { %v4770_v60 = vadd.f32 %v1995_v45, %v1868_v47 }
0x1709   :  { %v1997_v46 = vpop.f32.mrf.mxu0 }
0x170a   :  { %v4772_v61 = vadd.f32 %v1997_v46, %v1872_v1 }
0x170b   :  { %v2001_v62 = vpop.f32.mrf.mxu0 }
0x170c   :  { %v4774_v6 = vadd.f32 %v2001_v62, %v1868_v47 }
0x170d   :  { %v2003_v9 = vpop.f32.mrf.mxu0 }
0x170e   :  { %v4776_v11 = vadd.f32 %v2003_v9, %v1872_v1 }
0x170f   :  { %v2007_v15 = vpop.f32.mrf.mxu0 }
0x1710   :  { %v4778_v19 = vadd.f32 %v2007_v15, %v1868_v47 }
0x1711   :  { %v2009_v20 = vpop.f32.mrf.mxu0 }
0x1712   :  { %v2010_v21 = vadd.f32 %v2009_v20, %v1872_v1 }
0x1714   :  { %v2118_v25 = vadd.f32 %v2112_v22, %v2010_v21 }
0x1716   :  { %3830 = vtanh.f32 %v2118_v25  ;;  %v3494_v56 = vmul.f32 -1.442695, %v2118_v25 }
0x1717   :  { %3832 = vpow2.f32 %v3493_v29 }
0x1723   :  { %v3831_v28 = vpop.eup %3830 }
0x1724   :  { %2152 = vrot.lane.b32.xlu1 %v3831_v28, %s4060_s3  ;;  %v3833_v63 = vpop.eup %3832 }
0x1725   :  { %v2122_v42 = vadd.f32 1.0, %v3833_v63 }
0x1727   :  { %3834 = vrcp.f32 %v2122_v42 }
0x1728   :  { %3836 = vpow2.f32 %v3494_v56 }
0x1734   :  { %v3835_v7 = vpop.eup %3834 }
0x1735   :  { %v3837_v47 = vpop.eup %3836  ;;  %v2133_v0 = vmul.f32 0.0, %v3835_v7 }
0x1736   :  { %v2129_v1 = vadd.f32 1.0, %v3837_v47 }
0x1738   :  { %3838 = vrcp.f32 %v2129_v1 }
0x1745   :  { %v3839_v57 = vpop.eup %3838 }
0x1746   :  { %v2150_v40 = vmul.f32 0.0, %v3839_v57 }
0x1778   :  { %v2136_v53 = vpop.permute.xlu0 %2135 }
0x1779   :  { %v2138_v3 = vmul.f32 %v3835_v7, %v2136_v53 }
0x177b   :  { %2140 = vrot.lane.b32.xlu0 %v2138_v3, %s4060_s3 }
0x1796   :  { %v2153_v13 = vpop.permute.xlu1 %2152 }
0x1797   :  { %v2155_v16 = vmul.f32 %v3839_v57, %v2153_v13 }
0x1799   :  { %2157 = vrot.lane.b32.xlu1 %v2155_v16, %s4060_s3 }
0x17ed   :  { %v2141_v39 = vpop.permute.xlu0 %2140 }
0x17ee   :  { %v4783_v17 = vadd.f32 %v2141_v39, %v2133_v0 }
0x17f0   :  { %3840 = vtanh.f32 %v4783_v17 }
0x17fd   :  { %v3841_v26 = vpop.eup %3840 }
0x17fe   :  { %2146 = vrot.lane.b32.xlu0 %v3841_v26, %s4060_s3 }
0x180b   :  { %v2158_v37 = vpop.permute.xlu1 %2157 }
0x180c   :  { %v4787_v35 = vadd.f32 %v2158_v37, %v2150_v40 }
0x180e   :  { %3842 = vtanh.f32 %v4787_v35 }
0x181b   :  { %v3843_v33 = vpop.eup %3842 }
0x181c   :  { %2163 = vrot.lane.b32.xlu1 %v3843_v33, %s4060_s3 }
0x1870   :  { %v2147_v41 = vpop.permute.xlu0 %2146 }
0x1871   :  { %v2149_v44 = vmul.f32 %v3835_v7, %v2147_v41 }
0x1873   :  { %2168 = vrot.lane.b32.xlu0 %v2149_v44, %s4061_s21 }
0x188e   :  { %v2164_v51 = vpop.permute.xlu1 %2163 }
0x188f   :  { %v2166_v45 = vmul.f32 %v3839_v57, %v2164_v51 }
0x1891   :  { %2173 = vrot.lane.b32.xlu1 %v2166_v45, %s4062_s22 }
0x18e5   :  { %v2169_v46 = vpop.permute.xlu0 %2168 }
0x18e6   :  { %2171 = vst.msk [vmem:[#allocation2] sm:$0xff] %vm872_vm0, %v2169_v46 }
0x1903   :  { %v2174_v62 = vpop.permute.xlu1 %2173 }
0x1904   :  { %2176 = vst.msk [vmem:[#allocation2 + $0x38] sm:$0xff] %vm878_vm1, %v2174_v62  ;;  %v2177_v9 = vsel %vm872_vm0, %v2169_v46, %v2174_v62 }
0x1905   :  { %3495 = vmatmul.mubr.msk.f32.vlgmr.msra.gmra.mxu1 %vm741_vm2, %v2177_v9 }
0x1906   :  { %2472 = vmatpush1.msra.mxu1 %v4602_v24  ;;  %2519 = vmatprep.mubr.f32.mxu1 %v4059_v32 }
0x1907   :  { %2473 = vmatprep.subr.mxu1 %v4608_v14 }
0x1908   :  { %2474 = vmatpush1.msra.mxu1 %v4614_v36 }
0x1909   :  { %2475 = vmatprep.subr.mxu1 %v4623_v31 }
0x190a   :  { %2476 = vmatpush1.msra.mxu1 %v4629_v54 }
0x190b   :  { %2477 = vmatprep.subr.mxu1 %v4635_v55 }
0x190c   :  { %2478 = vmatpush1.msra.mxu1 %v4641_v48 }
0x190d   :  { %2479 = vmatprep.subr.mxu1 %v4647_v49 }
0x190e   :  { %2480 = vmatpush1.msra.mxu1 %v4652_v50 }
0x190f   :  { %2481 = vmatprep.subr.mxu1 %v4658_v52 }
0x1910   :  { %2482 = vmatpush1.msra.mxu1 %v4664_v5 }
0x1911   :  { %2483 = vmatprep.subr.mxu1 %v4669_v8 }
0x1912   :  { %2484 = vmatpush1.msra.mxu1 %v4675_v10 }
0x1913   :  { %2485 = vmatprep.subr.mxu1 %v4680_v12 }
0x1914   :  { %2486 = vmatpush1.msra.mxu1 %v4684_v18 }
0x1915   :  { %2745 = vmatprep.subr.mxu1 %v4597_v38 }
0x19c5   :  { %v2247_v15 = vpop.f32.mrf.mxu1 }
0x19c6   :  { %v2253_v20 = vadd.f32 %v2247_v15, %v4753_v23 }
0x19c7   :  { %v2249_v21 = vpop.f32.mrf.mxu1 }
0x19c8   :  { %3844 = vtanh.f32 %v2253_v20  ;;  %v2255_v22 = vadd.f32 %v2249_v21, %v4776_v11  ;;  %v3496_v29 = vmul.f32 -1.442695, %v2253_v20 }
0x19ca   :  { %3846 = vtanh.f32 %v2255_v22  ;;  %v3497_v63 = vmul.f32 -1.442695, %v2255_v22 }
0x19cb   :  { %3848 = vpow2.f32 %v3496_v29 }
0x19cc   :  { %3850 = vpow2.f32 %v3497_v63 }
0x19d5   :  { %v3845_v25 = vpop.eup %3844 }
0x19d6   :  { %2272 = vrot.lane.b32.xlu0 %v3845_v25, %s4060_s3 }
0x19d7   :  { %v3847_v28 = vpop.eup %3846 }
0x19d8   :  { %2289 = vrot.lane.b32.xlu1 %v3847_v28, %s4060_s3  ;;  %v3849_v42 = vpop.eup %3848 }
0x19d9   :  { %v3851_v56 = vpop.eup %3850  ;;  %v2259_v7 = vadd.f32 1.0, %v3849_v42 }
0x19da   :  { %v2266_v53 = vadd.f32 1.0, %v3851_v56 }
0x19db   :  { %3852 = vrcp.f32 %v2259_v7 }
0x19dc   :  { %3854 = vrcp.f32 %v2266_v53 }
0x19e8   :  { %v3853_v23 = vpop.eup %3852 }
0x19e9   :  { %v3855_v47 = vpop.eup %3854  ;;  %v2270_v13 = vmul.f32 %v3853_v23, %v4783_v17 }
0x19ea   :  { %v2287_v39 = vmul.f32 %v3855_v47, %v4787_v35 }
0x1a48   :  { %v2273_v3 = vpop.permute.xlu0 %2272 }
0x1a49   :  { %v2275_v11 = vmul.f32 %v3853_v23, %v2273_v3 }
0x1a4a   :  { %v2290_v1 = vpop.permute.xlu1 %2289 }
0x1a4b   :  { %2277 = vrot.lane.b32.xlu0 %v2275_v11, %s4060_s3  ;;  %v2292_v57 = vmul.f32 %v3855_v47, %v2290_v1 }
0x1a4d   :  { %2294 = vrot.lane.b32.xlu1 %v2292_v57, %s4060_s3 }
0x1abd   :  { %v2278_v16 = vpop.permute.xlu0 %2277 }
0x1abe   :  { %v4821_v0 = vadd.f32 %v2278_v16, %v2270_v13 }
0x1abf   :  { %v2295_v26 = vpop.permute.xlu1 %2294 }
0x1ac0   :  { %3856 = vtanh.f32 %v4821_v0  ;;  %v4825_v40 = vadd.f32 %v2295_v26, %v2287_v39 }
0x1ac2   :  { %3858 = vtanh.f32 %v4825_v40 }
0x1acd   :  { %v3857_v37 = vpop.eup %3856 }
0x1ace   :  { %2283 = vrot.lane.b32.xlu0 %v3857_v37, %s4060_s3 }
0x1acf   :  { %v3859_v33 = vpop.eup %3858 }
0x1ad0   :  { %2300 = vrot.lane.b32.xlu1 %v3859_v33, %s4060_s3 }
0x1b40   :  { %v2284_v41 = vpop.permute.xlu0 %2283 }
0x1b41   :  { %v2286_v17 = vmul.f32 %v3853_v23, %v2284_v41 }
0x1b42   :  { %v2301_v44 = vpop.permute.xlu1 %2300 }
0x1b43   :  { %2305 = vrot.lane.b32.xlu0 %v2286_v17, %s4061_s21  ;;  %v2303_v51 = vmul.f32 %v3855_v47, %v2301_v44 }
0x1b45   :  { %2310 = vrot.lane.b32.xlu1 %v2303_v51, %s4062_s22 }
0x1bb5   :  { %v2306_v35 = vpop.permute.xlu0 %2305 }
0x1bb6   :  { %2308 = vst.msk [vmem:[#allocation2 + $0x8] sm:$0xff] %vm872_vm0, %v2306_v35 }
0x1bb7   :  { %v2311_v45 = vpop.permute.xlu1 %2310 }
0x1bb8   :  { %2313 = vst.msk [vmem:[#allocation2 + $0x30] sm:$0xff] %vm878_vm1, %v2311_v45  ;;  %v2314_v46 = vsel %vm872_vm0, %v2306_v35, %v2311_v45 }
0x1bb9   :  { %3498 = vmatmul.mubr.msk.f32.vlgmr.msra.gmra.mxu0 %vm741_vm2, %v2314_v46 }
0x1bba   :  { %2609 = vmatpush1.msra.mxu0 %v4602_v24  ;;  %2656 = vmatprep.mubr.f32.mxu0 %v4059_v32 }
0x1bbb   :  { %2610 = vmatprep.subr.mxu0 %v4608_v14 }
0x1bbc   :  { %2611 = vmatpush1.msra.mxu0 %v4614_v36 }
0x1bbd   :  { %2612 = vmatprep.subr.mxu0 %v4623_v31 }
0x1bbe   :  { %2613 = vmatpush1.msra.mxu0 %v4629_v54 }
0x1bbf   :  { %2614 = vmatprep.subr.mxu0 %v4635_v55 }
0x1bc0   :  { %2615 = vmatpush1.msra.mxu0 %v4641_v48 }
0x1bc1   :  { %2616 = vmatprep.subr.mxu0 %v4647_v49 }
0x1bc2   :  { %2617 = vmatpush1.msra.mxu0 %v4652_v50 }
0x1bc3   :  { %2618 = vmatprep.subr.mxu0 %v4658_v52 }
0x1bc4   :  { %2619 = vmatpush1.msra.mxu0 %v4664_v5 }
0x1bc5   :  { %2620 = vmatprep.subr.mxu0 %v4669_v8 }
0x1bc6   :  { %2621 = vmatpush1.msra.mxu0 %v4675_v10 }
0x1bc7   :  { %2622 = vmatprep.subr.mxu0 %v4680_v12 }
0x1bc8   :  { %2623 = vmatpush1.msra.mxu0 %v4684_v18 }
0x1bc9   :  { %2882 = vmatprep.subr.mxu0 %v4597_v38 }
0x1c79   :  { %v2384_v62 = vpop.f32.mrf.mxu0 }
0x1c7a   :  { %v2390_v9 = vadd.f32 %v2384_v62, %v4757_v27 }
0x1c7b   :  { %v2386_v15 = vpop.f32.mrf.mxu0 }
0x1c7c   :  { %3860 = vtanh.f32 %v2390_v9  ;;  %v2392_v20 = vadd.f32 %v2386_v15, %v4772_v61  ;;  %v3499_v25 = vmul.f32 -1.442695, %v2390_v9 }
0x1c7e   :  { %3862 = vtanh.f32 %v2392_v20  ;;  %v3500_v28 = vmul.f32 -1.442695, %v2392_v20 }
0x1c7f   :  { %3864 = vpow2.f32 %v3499_v25 }
0x1c80   :  { %3866 = vpow2.f32 %v3500_v28 }
0x1c89   :  { %v3861_v21 = vpop.eup %3860 }
0x1c8a   :  { %2409 = vrot.lane.b32.xlu0 %v3861_v21, %s4060_s3 }
0x1c8b   :  { %v3863_v22 = vpop.eup %3862 }
0x1c8c   :  { %2426 = vrot.lane.b32.xlu1 %v3863_v22, %s4060_s3  ;;  %v3865_v29 = vpop.eup %3864 }
0x1c8d   :  { %v3867_v63 = vpop.eup %3866  ;;  %v2396_v42 = vadd.f32 1.0, %v3865_v29 }
0x1c8e   :  { %v2403_v56 = vadd.f32 1.0, %v3867_v63 }
0x1c8f   :  { %3868 = vrcp.f32 %v2396_v42 }
0x1c90   :  { %3870 = vrcp.f32 %v2403_v56 }
0x1c9c   :  { %v3869_v27 = vpop.eup %3868 }
0x1c9d   :  { %v3871_v53 = vpop.eup %3870  ;;  %v2407_v11 = vmul.f32 %v3869_v27, %v4821_v0 }
0x1c9e   :  { %v2424_v57 = vmul.f32 %v3871_v53, %v4825_v40 }
0x1cfc   :  { %v2410_v7 = vpop.permute.xlu0 %2409 }
0x1cfd   :  { %v2412_v61 = vmul.f32 %v3869_v27, %v2410_v7 }
0x1cfe   :  { %v2427_v23 = vpop.permute.xlu1 %2426 }
0x1cff   :  { %2414 = vrot.lane.b32.xlu0 %v2412_v61, %s4060_s3  ;;  %v2429_v3 = vmul.f32 %v3871_v53, %v2427_v23 }
0x1d01   :  { %2431 = vrot.lane.b32.xlu1 %v2429_v3, %s4060_s3 }
0x1d71   :  { %v2415_v47 = vpop.permute.xlu0 %2414 }
0x1d72   :  { %v4860_v1 = vadd.f32 %v2415_v47, %v2407_v11 }
0x1d73   :  { %v2432_v13 = vpop.permute.xlu1 %2431 }
0x1d74   :  { %3872 = vtanh.f32 %v4860_v1  ;;  %v4864_v16 = vadd.f32 %v2432_v13, %v2424_v57 }
0x1d76   :  { %3874 = vtanh.f32 %v4864_v16 }
0x1d81   :  { %v3873_v39 = vpop.eup %3872 }
0x1d82   :  { %2420 = vrot.lane.b32.xlu0 %v3873_v39, %s4060_s3 }
0x1d83   :  { %v3875_v26 = vpop.eup %3874 }
0x1d84   :  { %2437 = vrot.lane.b32.xlu1 %v3875_v26, %s4060_s3 }
0x1df4   :  { %v2421_v37 = vpop.permute.xlu0 %2420 }
0x1df5   :  { %v2423_v0 = vmul.f32 %v3869_v27, %v2421_v37 }
0x1df6   :  { %v2438_v33 = vpop.permute.xlu1 %2437 }
0x1df7   :  { %2442 = vrot.lane.b32.xlu0 %v2423_v0, %s4061_s21  ;;  %v2440_v41 = vmul.f32 %v3871_v53, %v2438_v33 }
0x1df9   :  { %2447 = vrot.lane.b32.xlu1 %v2440_v41, %s4062_s22 }
0x1e69   :  { %v2443_v40 = vpop.permute.xlu0 %2442 }
0x1e6a   :  { %2445 = vst.msk [vmem:[#allocation2 + $0x10] sm:$0xff] %vm872_vm0, %v2443_v40 }
0x1e6b   :  { %v2448_v17 = vpop.permute.xlu1 %2447 }
0x1e6c   :  { %2450 = vst.msk [vmem:[#allocation2 + $0x28] sm:$0xff] %vm878_vm1, %v2448_v17  ;;  %v2451_v44 = vsel %vm872_vm0, %v2443_v40, %v2448_v17 }
0x1e6d   :  { %3501 = vmatmul.mubr.msk.f32.vlgmr.msra.gmra.mxu1 %vm741_vm2, %v2451_v44 }
0x1e6e   :  { %2746 = vmatpush1.msra.mxu1 %v4602_v24  ;;  %2793 = vmatprep.mubr.f32.mxu1 %v4059_v32 }
0x1e6f   :  { %2747 = vmatprep.subr.mxu1 %v4608_v14 }
0x1e70   :  { %2748 = vmatpush1.msra.mxu1 %v4614_v36 }
0x1e71   :  { %2749 = vmatprep.subr.mxu1 %v4623_v31 }
0x1e72   :  { %2750 = vmatpush1.msra.mxu1 %v4629_v54 }
0x1e73   :  { %2751 = vmatprep.subr.mxu1 %v4635_v55 }
0x1e74   :  { %2752 = vmatpush1.msra.mxu1 %v4641_v48 }
0x1e75   :  { %2753 = vmatprep.subr.mxu1 %v4647_v49 }
0x1e76   :  { %2754 = vmatpush1.msra.mxu1 %v4652_v50 }
0x1e77   :  { %2755 = vmatprep.subr.mxu1 %v4658_v52 }
0x1e78   :  { %2756 = vmatpush1.msra.mxu1 %v4664_v5 }
0x1e79   :  { %2757 = vmatprep.subr.mxu1 %v4669_v8 }
0x1e7a   :  { %2758 = vmatpush1.msra.mxu1 %v4675_v10 }
0x1e7b   :  { %2759 = vmatprep.subr.mxu1 %v4680_v12 }
0x1e7c   :  { %2760 = vmatpush1.msra.mxu1 %v4684_v18 }
0x1e7d   :  { %3019 = vmatprep.subr.mxu1 %v4597_v38 }
0x1f2d   :  { %v2521_v51 = vpop.f32.mrf.mxu1 }
0x1f2e   :  { %v2527_v35 = vadd.f32 %v2521_v51, %v4761_v30 }
0x1f2f   :  { %v2523_v45 = vpop.f32.mrf.mxu1 }
0x1f30   :  { %3876 = vtanh.f32 %v2527_v35  ;;  %v2529_v46 = vadd.f32 %v2523_v45, %v4767_v59  ;;  %v3502_v15 = vmul.f32 -1.442695, %v2527_v35 }
0x1f32   :  { %3878 = vtanh.f32 %v2529_v46  ;;  %v3503_v20 = vmul.f32 -1.442695, %v2529_v46 }
0x1f33   :  { %3880 = vpow2.f32 %v3502_v15 }
0x1f34   :  { %3882 = vpow2.f32 %v3503_v20 }
0x1f3d   :  { %v3877_v62 = vpop.eup %3876 }
0x1f3e   :  { %2546 = vrot.lane.b32.xlu0 %v3877_v62, %s4060_s3 }
0x1f3f   :  { %v3879_v9 = vpop.eup %3878 }
0x1f40   :  { %2563 = vrot.lane.b32.xlu1 %v3879_v9, %s4060_s3  ;;  %v3881_v21 = vpop.eup %3880 }
0x1f41   :  { %v3883_v38 = vpop.eup %3882  ;;  %v2533_v22 = vadd.f32 1.0, %v3881_v21 }
0x1f42   :  { %v2540_v25 = vadd.f32 1.0, %v3883_v38 }
0x1f43   :  { %3884 = vrcp.f32 %v2533_v22 }
0x1f44   :  { %3886 = vrcp.f32 %v2540_v25 }
0x1f50   :  { %v3885_v30 = vpop.eup %3884 }
0x1f51   :  { %v3887_v29 = vpop.eup %3886  ;;  %v2544_v56 = vmul.f32 %v3885_v30, %v4860_v1 }
0x1f52   :  { %v2561_v61 = vmul.f32 %v3887_v29, %v4864_v16 }
0x1fb0   :  { %v2547_v28 = vpop.permute.xlu0 %2546 }
0x1fb1   :  { %v2549_v59 = vmul.f32 %v3885_v30, %v2547_v28 }
0x1fb2   :  { %v2564_v63 = vpop.permute.xlu1 %2563 }
0x1fb3   :  { %2551 = vrot.lane.b32.xlu0 %v2549_v59, %s4060_s3  ;;  %v2566_v42 = vmul.f32 %v3887_v29, %v2564_v63 }
0x1fb5   :  { %2568 = vrot.lane.b32.xlu1 %v2566_v42, %s4060_s3 }
0x2025   :  { %v2552_v27 = vpop.permute.xlu0 %2551 }
0x2026   :  { %v4899_v7 = vadd.f32 %v2552_v27, %v2544_v56 }
0x2027   :  { %v2569_v53 = vpop.permute.xlu1 %2568 }
0x2028   :  { %3888 = vtanh.f32 %v4899_v7  ;;  %v4903_v23 = vadd.f32 %v2569_v53, %v2561_v61 }
0x202a   :  { %3890 = vtanh.f32 %v4903_v23 }
0x2035   :  { %v3889_v3 = vpop.eup %3888 }
0x2036   :  { %2557 = vrot.lane.b32.xlu0 %v3889_v3, %s4060_s3 }
0x2037   :  { %v3891_v11 = vpop.eup %3890 }
0x2038   :  { %2574 = vrot.lane.b32.xlu1 %v3891_v11, %s4060_s3 }
0x20a8   :  { %v2558_v47 = vpop.permute.xlu0 %2557 }
0x20a9   :  { %v2560_v1 = vmul.f32 %v3885_v30, %v2558_v47 }
0x20aa   :  { %v2575_v57 = vpop.permute.xlu1 %2574 }
0x20ab   :  { %2579 = vrot.lane.b32.xlu0 %v2560_v1, %s4061_s21  ;;  %v2577_v13 = vmul.f32 %v3887_v29, %v2575_v57 }
0x20ad   :  { %2584 = vrot.lane.b32.xlu1 %v2577_v13, %s4062_s22 }
0x211d   :  { %v2580_v16 = vpop.permute.xlu0 %2579 }
0x211e   :  { %2582 = vst.msk [vmem:[#allocation2 + $0x18] sm:$0xff] %vm872_vm0, %v2580_v16 }
0x211f   :  { %v2585_v39 = vpop.permute.xlu1 %2584 }
0x2120   :  { %2587 = vst.msk [vmem:[#allocation2 + $0x20] sm:$0xff] %vm878_vm1, %v2585_v39  ;;  %v2588_v26 = vsel %vm872_vm0, %v2580_v16, %v2585_v39 }
0x2121   :  { %3504 = vmatmul.mubr.msk.f32.vlgmr.msra.gmra.mxu0 %vm741_vm2, %v2588_v26 }
0x2122   :  { %2883 = vmatpush1.msra.mxu0 %v4602_v24  ;;  %2930 = vmatprep.mubr.f32.mxu0 %v4059_v32 }
0x2123   :  { %2884 = vmatprep.subr.mxu0 %v4608_v14 }
0x2124   :  { %2885 = vmatpush1.msra.mxu0 %v4614_v36 }
0x2125   :  { %2886 = vmatprep.subr.mxu0 %v4623_v31 }
0x2126   :  { %2887 = vmatpush1.msra.mxu0 %v4629_v54 }
0x2127   :  { %2888 = vmatprep.subr.mxu0 %v4635_v55 }
0x2128   :  { %2889 = vmatpush1.msra.mxu0 %v4641_v48 }
0x2129   :  { %2890 = vmatprep.subr.mxu0 %v4647_v49 }
0x212a   :  { %2891 = vmatpush1.msra.mxu0 %v4652_v50 }
0x212b   :  { %2892 = vmatprep.subr.mxu0 %v4658_v52 }
0x212c   :  { %2893 = vmatpush1.msra.mxu0 %v4664_v5 }
0x212d   :  { %2894 = vmatprep.subr.mxu0 %v4669_v8 }
0x212e   :  { %2895 = vmatpush1.msra.mxu0 %v4675_v10 }
0x212f   :  { %2896 = vmatprep.subr.mxu0 %v4680_v12 }
0x2130   :  { %2897 = vmatpush1.msra.mxu0 %v4684_v18 }
0x21e1   :  { %v2658_v37 = vpop.f32.mrf.mxu0 }
0x21e2   :  { %v2664_v0 = vadd.f32 %v2658_v37, %v4765_v4 }
0x21e3   :  { %v2660_v33 = vpop.f32.mrf.mxu0 }
0x21e4   :  { %3892 = vtanh.f32 %v2664_v0  ;;  %v2666_v41 = vadd.f32 %v2660_v33, %v4763_v2  ;;  %v3505_v44 = vmul.f32 -1.442695, %v2664_v0 }
0x21e6   :  { %3894 = vtanh.f32 %v2666_v41  ;;  %v3506_v51 = vmul.f32 -1.442695, %v2666_v41 }
0x21e7   :  { %3896 = vpow2.f32 %v3505_v44 }
0x21e8   :  { %3898 = vpow2.f32 %v3506_v51 }
0x21f1   :  { %v3893_v40 = vpop.eup %3892 }
0x21f2   :  { %2683 = vrot.lane.b32.xlu0 %v3893_v40, %s4060_s3 }
0x21f3   :  { %v3895_v17 = vpop.eup %3894 }
0x21f4   :  { %2700 = vrot.lane.b32.xlu1 %v3895_v17, %s4060_s3  ;;  %v3897_v35 = vpop.eup %3896 }
0x21f5   :  { %v3899_v45 = vpop.eup %3898  ;;  %v2670_v46 = vadd.f32 1.0, %v3897_v35 }
0x21f6   :  { %v2677_v62 = vadd.f32 1.0, %v3899_v45 }
0x21f7   :  { %3900 = vrcp.f32 %v2670_v46 }
0x21f8   :  { %3902 = vrcp.f32 %v2677_v62 }
0x2204   :  { %v3901_v4 = vpop.eup %3900 }
0x2205   :  { %v3903_v15 = vpop.eup %3902  ;;  %v2681_v38 = vmul.f32 %v3901_v4, %v4899_v7 }
0x2206   :  { %v2698_v30 = vmul.f32 %v3903_v15, %v4903_v23 }
0x2264   :  { %v2684_v9 = vpop.permute.xlu0 %2683 }
0x2265   :  { %v2686_v2 = vmul.f32 %v3901_v4, %v2684_v9 }
0x2266   :  { %v2701_v20 = vpop.permute.xlu1 %2700 }
0x2267   :  { %2688 = vrot.lane.b32.xlu0 %v2686_v2, %s4060_s3  ;;  %v2703_v21 = vmul.f32 %v3903_v15, %v2701_v20 }
0x2269   :  { %2705 = vrot.lane.b32.xlu1 %v2703_v21, %s4060_s3 }
0x22d9   :  { %v2689_v22 = vpop.permute.xlu0 %2688 }
0x22da   :  { %v4937_v25 = vadd.f32 %v2689_v22, %v2681_v38 }
0x22db   :  { %v2706_v28 = vpop.permute.xlu1 %2705 }
0x22dc   :  { %3904 = vtanh.f32 %v4937_v25  ;;  %v4941_v59 = vadd.f32 %v2706_v28, %v2698_v30 }
0x22de   :  { %3906 = vtanh.f32 %v4941_v59 }
0x22e9   :  { %v3905_v29 = vpop.eup %3904 }
0x22ea   :  { %2694 = vrot.lane.b32.xlu0 %v3905_v29, %s4060_s3 }
0x22eb   :  { %v3907_v63 = vpop.eup %3906 }
0x22ec   :  { %2711 = vrot.lane.b32.xlu1 %v3907_v63, %s4060_s3 }
0x235c   :  { %v2695_v42 = vpop.permute.xlu0 %2694 }
0x235d   :  { %v2697_v56 = vmul.f32 %v3901_v4, %v2695_v42 }
0x235e   :  { %v2712_v27 = vpop.permute.xlu1 %2711 }
0x235f   :  { %2716 = vrot.lane.b32.xlu0 %v2697_v56, %s4061_s21  ;;  %v2714_v7 = vmul.f32 %v3903_v15, %v2712_v27 }
0x2361   :  { %2721 = vrot.lane.b32.xlu1 %v2714_v7, %s4062_s22 }
0x23d1   :  { %v2717_v61 = vpop.permute.xlu0 %2716 }
0x23d2   :  { %2719 = vst.msk [vmem:[#allocation2 + $0x20] sm:$0xff] %vm872_vm0, %v2717_v61 }
0x23d3   :  { %v2722_v53 = vpop.permute.xlu1 %2721 }
0x23d4   :  { %2724 = vst.msk [vmem:[#allocation2 + $0x18] sm:$0xff] %vm878_vm1, %v2722_v53  ;;  %v2725_v23 = vsel %vm872_vm0, %v2717_v61, %v2722_v53 }
0x23d5   :  { %3507 = vmatmul.mubr.msk.f32.vlgmr.msra.gmra.mxu1 %vm741_vm2, %v2725_v23 }
0x23d6   :  { %3020 = vmatpush1.msra.mxu1 %v4602_v24  ;;  %3067 = vmatprep.mubr.f32.mxu1 %v4059_v32 }
0x23d7   :  { %3021 = vmatprep.subr.mxu1 %v4608_v14 }
0x23d8   :  { %3022 = vmatpush1.msra.mxu1 %v4614_v36 }
0x23d9   :  { %3023 = vmatprep.subr.mxu1 %v4623_v31 }
0x23da   :  { %3024 = vmatpush1.msra.mxu1 %v4629_v54 }
0x23db   :  { %3025 = vmatprep.subr.mxu1 %v4635_v55 }
0x23dc   :  { %3026 = vmatpush1.msra.mxu1 %v4641_v48 }
0x23dd   :  { %3027 = vmatprep.subr.mxu1 %v4647_v49 }
0x23de   :  { %3028 = vmatpush1.msra.mxu1 %v4652_v50 }
0x23df   :  { %3029 = vmatprep.subr.mxu1 %v4658_v52 }
0x23e0   :  { %3030 = vmatpush1.msra.mxu1 %v4664_v5 }
0x23e1   :  { %3031 = vmatprep.subr.mxu1 %v4669_v8 }
0x23e2   :  { %3032 = vmatpush1.msra.mxu1 %v4675_v10 }
0x23e3   :  { %3033 = vmatprep.subr.mxu1 %v4680_v12 }
0x23e4   :  { %3034 = vmatpush1.msra.mxu1 %v4684_v18 }
0x2495   :  { %v2795_v32 = vpop.f32.mrf.mxu1 }
0x2496   :  { %v2801_v24 = vadd.f32 %v2795_v32, %v4770_v60 }
0x2497   :  { %v2797_v14 = vpop.f32.mrf.mxu1 }
0x2498   :  { %3908 = vtanh.f32 %v2801_v24  ;;  %v2803_v36 = vadd.f32 %v2797_v14, %v4759_v34  ;;  %v3508_v55 = vmul.f32 -1.442695, %v2801_v24 }
0x249a   :  { %3910 = vtanh.f32 %v2803_v36  ;;  %v3509_v48 = vmul.f32 -1.442695, %v2803_v36 }
0x249b   :  { %3912 = vpow2.f32 %v3508_v55 }
0x249c   :  { %3914 = vpow2.f32 %v3509_v48 }
0x24a5   :  { %v3909_v31 = vpop.eup %3908 }
0x24a6   :  { %2820 = vrot.lane.b32.xlu0 %v3909_v31, %s4060_s3 }
0x24a7   :  { %v3911_v54 = vpop.eup %3910 }
0x24a8   :  { %2837 = vrot.lane.b32.xlu1 %v3911_v54, %s4060_s3  ;;  %v3913_v49 = vpop.eup %3912 }
0x24a9   :  { %v3915_v50 = vpop.eup %3914  ;;  %v2807_v52 = vadd.f32 1.0, %v3913_v49 }
0x24aa   :  { %v2814_v5 = vadd.f32 1.0, %v3915_v50 }
0x24ab   :  { %3916 = vrcp.f32 %v2807_v52 }
0x24ac   :  { %3918 = vrcp.f32 %v2814_v5 }
0x24b8   :  { %v3917_v8 = vpop.eup %3916 }
0x24b9   :  { %v3919_v18 = vpop.eup %3918  ;;  %v2818_v3 = vmul.f32 %v3917_v8, %v4937_v25 }
0x24ba   :  { %v2835_v1 = vmul.f32 %v3919_v18, %v4941_v59 }
0x2518   :  { %v2821_v10 = vpop.permute.xlu0 %2820 }
0x2519   :  { %v2823_v12 = vmul.f32 %v3917_v8, %v2821_v10 }
0x251a   :  { %v2838_v34 = vpop.permute.xlu1 %2837 }
0x251b   :  { %2825 = vrot.lane.b32.xlu0 %v2823_v12, %s4060_s3  ;;  %v2840_v60 = vmul.f32 %v3919_v18, %v2838_v34 }
0x251d   :  { %2842 = vrot.lane.b32.xlu1 %v2840_v60, %s4060_s3 }
0x258d   :  { %v2826_v11 = vpop.permute.xlu0 %2825 }
0x258e   :  { %v2828_v47 = vadd.f32 %v2826_v11, %v2818_v3 }
0x258f   :  { %v2843_v57 = vpop.permute.xlu1 %2842 }
0x2590   :  { %3920 = vtanh.f32 %v2828_v47  ;;  %v2845_v13 = vadd.f32 %v2843_v57, %v2835_v1 }
0x2592   :  { %3922 = vtanh.f32 %v2845_v13 }
0x259d   :  { %v3921_v16 = vpop.eup %3920 }
0x259e   :  { %2831 = vrot.lane.b32.xlu0 %v3921_v16, %s4060_s3 }
0x259f   :  { %v3923_v39 = vpop.eup %3922 }
0x25a0   :  { %2848 = vrot.lane.b32.xlu1 %v3923_v39, %s4060_s3 }
0x2610   :  { %v2832_v26 = vpop.permute.xlu0 %2831 }
0x2611   :  { %v2834_v37 = vmul.f32 %v3917_v8, %v2832_v26  ;;  %v3151_v26 = vld [vmem:[%s5105_s7 + $0x38] sm:$0xff] }
0x2612   :  { %v2849_v0 = vpop.permute.xlu1 %2848  ;;  %3541 = vmatprep.subr.mxu0 %v3151_v26 }
0x2613   :  { %2853 = vrot.lane.b32.xlu0 %v2834_v37, %s4061_s21  ;;  %v2851_v33 = vmul.f32 %v3919_v18, %v2849_v0  ;;  %v3150_v37 = vld [vmem:[%s5105_s7 + $0x30] sm:$0xff]  ;;  %v3149_v0 = vld [vmem:[%s5105_s7 + $0x28] sm:$0xff] }
0x2615   :  { %2858 = vrot.lane.b32.xlu1 %v2851_v33, %s4062_s22 }
0x2685   :  { %v2854_v41 = vpop.permute.xlu0 %2853 }
0x2686   :  { %2856 = vst.msk [vmem:[#allocation2 + $0x28] sm:$0xff] %vm872_vm0, %v2854_v41 }
0x2687   :  { %v2859_v40 = vpop.permute.xlu1 %2858 }
0x2688   :  { %2861 = vst.msk [vmem:[#allocation2 + $0x10] sm:$0xff] %vm878_vm1, %v2859_v40  ;;  %v2862_v17 = vsel %vm872_vm0, %v2854_v41, %v2859_v40  ;;  %v3148_v40 = vld [vmem:[%s5105_s7 + $0x20] sm:$0xff] }
0x2689   :  { %3510 = vmatmul.mubr.msk.f32.vlgmr.msra.gmra.mxu0 %vm741_vm2, %v2862_v17  ;;  %v3147_v17 = vld [vmem:[%s5105_s7 + $0x18] sm:$0xff] }
0x268a   :  { %3542 = vmatpush3.msra.mxu0 %v3151_v26 }
0x268b   :  { %3543 = vmatprep.subr.mxu0 %v3150_v37 }
0x268c   :  { %3544 = vmatpush3.msra.mxu0 %v3150_v37 }
0x268d   :  { %3545 = vmatprep.subr.mxu0 %v3149_v0 }
0x268e   :  { %3546 = vmatpush3.msra.mxu0 %v3149_v0 }
0x268f   :  { %3547 = vmatprep.subr.mxu0 %v3148_v40 }
0x2690   :  { %3548 = vmatpush3.msra.mxu0 %v3148_v40 }
0x2691   :  { %3549 = vmatprep.subr.mxu0 %v3147_v17 }
0x2692   :  { %3550 = vmatpush3.msra.mxu0 %v3147_v17 }
0x2749   :  { %v2932_v44 = vpop.f32.mrf.mxu0 }
0x274a   :  { %v2938_v51 = vadd.f32 %v2932_v44, %v4774_v6  ;;  %v3146_v44 = vld [vmem:[%s5105_s7 + $0x10] sm:$0xff] }
0x274b   :  { %v2934_v35 = vpop.f32.mrf.mxu0  ;;  %3551 = vmatprep.subr.mxu0 %v3146_v44 }
0x274c   :  { %3924 = vtanh.f32 %v2938_v51  ;;  %v2940_v45 = vadd.f32 %v2934_v35, %v4755_v43  ;;  %v3511_v4 = vmul.f32 -1.442695, %v2938_v51  ;;  %v3145_v51 = vld [vmem:[%s5105_s7 + $0x8] sm:$0xff]  ;;  %3552 = vmatpush3.msra.mxu0 %v3146_v44  ;;  %v3144_v35 = vld [vmem:[%s5105_s7] sm:$0xff] }
0x274d   :  { %3553 = vmatprep.subr.mxu0 %v3145_v51 }
0x274e   :  { %3926 = vtanh.f32 %v2940_v45  ;;  %v3512_v9 = vmul.f32 -1.442695, %v2940_v45  ;;  %3554 = vmatpush3.msra.mxu0 %v3145_v51 }
0x274f   :  { %3928 = vpow2.f32 %v3511_v4  ;;  %3555 = vmatprep.subr.mxu0 %v3144_v35 }
0x2750   :  { %3930 = vpow2.f32 %v3512_v9  ;;  %3556 = vmatpush3.msra.mxu0 %v3144_v35 }
0x2759   :  { %v3925_v46 = vpop.eup %3924 }
0x275a   :  { %2957 = vrot.lane.b32.xlu0 %v3925_v46, %s4060_s3 }
0x275b   :  { %v3927_v62 = vpop.eup %3926 }
0x275c   :  { %2974 = vrot.lane.b32.xlu1 %v3927_v62, %s4060_s3  ;;  %v3929_v2 = vpop.eup %3928 }
0x275d   :  { %v3931_v15 = vpop.eup %3930  ;;  %v2944_v20 = vadd.f32 1.0, %v3929_v2 }
0x275e   :  { %v2951_v21 = vadd.f32 1.0, %v3931_v15 }
0x275f   :  { %3932 = vrcp.f32 %v2944_v20 }
0x2760   :  { %3934 = vrcp.f32 %v2951_v21  ;;  %v3138_v21 = vld [vmem:[#allocation2 + $0x10] sm:$0xff] }
0x276c   :  { %v3933_v6 = vpop.eup %3932 }
0x276d   :  { %v3935_v22 = vpop.eup %3934  ;;  %v2955_v28 = vmul.f32 %v3933_v6, %v2828_v47 }
0x276e   :  { %v2972_v63 = vmul.f32 %v3935_v22, %v2845_v13 }
0x27cc   :  { %v2958_v38 = vpop.permute.xlu0 %2957 }
0x27cd   :  { %v2960_v43 = vmul.f32 %v3933_v6, %v2958_v38  ;;  %v3140_v38 = vld [vmem:[#allocation2 + $0x20] sm:$0xff] }
0x27ce   :  { %v2975_v25 = vpop.permute.xlu1 %2974 }
0x27cf   :  { %2962 = vrot.lane.b32.xlu0 %v2960_v43, %s4060_s3  ;;  %v2977_v30 = vmul.f32 %v3935_v22, %v2975_v25  ;;  %v3141_v43 = vld [vmem:[#allocation2 + $0x28] sm:$0xff] }
0x27d1   :  { %2979 = vrot.lane.b32.xlu1 %v2977_v30, %s4060_s3  ;;  %v3516_v30 = vld [vmem:[#allocation8] ss:$0 sm:$0xff] }
0x2841   :  { %v2963_v59 = vpop.permute.xlu0 %2962 }
0x2842   :  { %v2965_v29 = vadd.f32 %v2963_v59, %v2955_v28 }
0x2843   :  { %v2980_v42 = vpop.permute.xlu1 %2979 }
0x2844   :  { %3936 = vtanh.f32 %v2965_v29  ;;  %v2982_v56 = vadd.f32 %v2980_v42, %v2972_v63 }
0x2846   :  { %3938 = vtanh.f32 %v2982_v56 }
0x2851   :  { %v3937_v27 = vpop.eup %3936 }
0x2852   :  { %2968 = vrot.lane.b32.xlu0 %v3937_v27, %s4060_s3 }
0x2853   :  { %v3939_v7 = vpop.eup %3938 }
0x2854   :  { %2985 = vrot.lane.b32.xlu1 %v3939_v7, %s4060_s3 }
0x28c4   :  { %v2969_v61 = vpop.permute.xlu0 %2968 }
0x28c5   :  { %v2971_v53 = vmul.f32 %v3933_v6, %v2969_v61  ;;  %v3139_v6 = vld [vmem:[#allocation2 + $0x18] sm:$0xff] }
0x28c6   :  { %v2986_v23 = vpop.permute.xlu1 %2985 }
0x28c7   :  { %2990 = vrot.lane.b32.xlu0 %v2971_v53, %s4061_s21  ;;  %v2988_v32 = vmul.f32 %v3935_v22, %v2986_v23 }
0x28c9   :  { %2995 = vrot.lane.b32.xlu1 %v2988_v32, %s4062_s22 }
0x2939   :  { %v2991_v24 = vpop.permute.xlu0 %2990 }
0x293a   :  { %2993 = vst.msk [vmem:[#allocation2 + $0x30] sm:$0xff] %vm872_vm0, %v2991_v24 }
0x293b   :  { %v2996_v14 = vpop.permute.xlu1 %2995 }
0x293c   :  { %2998 = vst.msk [vmem:[#allocation2 + $0x8] sm:$0xff] %vm878_vm1, %v2996_v14  ;;  %v2999_v36 = vsel %vm872_vm0, %v2991_v24, %v2996_v14 }
0x293d   :  { %3513 = vmatmul.mubr.msk.f32.vlgmr.msra.gmra.mxu1 %vm741_vm2, %v2999_v36 }
0x2941   :  { %v3142_v22 = vld [vmem:[#allocation2 + $0x30] sm:$0xff] }
0x2943   :  { %v3137_v20 = vld [vmem:[#allocation2 + $0x8] sm:$0xff] }
0x29fd   :  { %v3069_v31 = vpop.f32.mrf.mxu1 }
0x29fe   :  { %v3075_v54 = vadd.f32 %v3069_v31, %v4778_v19 }
0x29ff   :  { %v3071_v55 = vpop.f32.mrf.mxu1 }
0x2a00   :  { %3940 = vtanh.f32 %v3075_v54  ;;  %v3077_v48 = vadd.f32 %v3071_v55, %v4751_v58  ;;  %v3514_v52 = vmul.f32 -1.442695, %v3075_v54 }
0x2a02   :  { %3942 = vtanh.f32 %v3077_v48  ;;  %v3515_v5 = vmul.f32 -1.442695, %v3077_v48 }
0x2a03   :  { %3944 = vpow2.f32 %v3514_v52 }
0x2a04   :  { %3946 = vpow2.f32 %v3515_v5 }
0x2a0d   :  { %v3941_v49 = vpop.eup %3940 }
0x2a0e   :  { %3094 = vrot.lane.b32.xlu1 %v3941_v49, %s4060_s3 }
0x2a0f   :  { %v3943_v50 = vpop.eup %3942 }
0x2a10   :  { %3111 = vrot.lane.b32.xlu0 %v3943_v50, %s4060_s3  ;;  %v3945_v8 = vpop.eup %3944 }
0x2a11   :  { %v3947_v10 = vpop.eup %3946  ;;  %v3081_v12 = vadd.f32 1.0, %v3945_v8 }
0x2a12   :  { %v3088_v18 = vadd.f32 1.0, %v3947_v10 }
0x2a13   :  { %3948 = vrcp.f32 %v3081_v12 }
0x2a14   :  { %3950 = vrcp.f32 %v3088_v18 }
0x2a20   :  { %v3949_v19 = vpop.eup %3948 }
0x2a21   :  { %v3951_v60 = vpop.eup %3950  ;;  %v3092_v47 = vmul.f32 %v3949_v19, %v2965_v29 }
0x2a22   :  { %v3109_v13 = vmul.f32 %v3951_v60, %v2982_v56 }
0x2a80   :  { %v3095_v34 = vpop.permute.xlu1 %3094 }
0x2a81   :  { %v3097_v58 = vmul.f32 %v3949_v19, %v3095_v34 }
0x2a82   :  { %v3112_v3 = vpop.permute.xlu0 %3111 }
0x2a83   :  { %3099 = vrot.lane.b32.xlu1 %v3097_v58, %s4060_s3  ;;  %v3114_v11 = vmul.f32 %v3951_v60, %v3112_v3 }
0x2a85   :  { %3116 = vrot.lane.b32.xlu0 %v3114_v11, %s4060_s3 }
0x2af5   :  { %v3100_v1 = vpop.permute.xlu1 %3099 }
0x2af6   :  { %v3102_v57 = vadd.f32 %v3100_v1, %v3092_v47 }
0x2af7   :  { %v3117_v16 = vpop.permute.xlu0 %3116 }
0x2af8   :  { %3952 = vtanh.f32 %v3102_v57  ;;  %v3119_v39 = vadd.f32 %v3117_v16, %v3109_v13 }
0x2afa   :  { %3954 = vtanh.f32 %v3119_v39 }
0x2b05   :  { %v3953_v33 = vpop.eup %3952 }
0x2b06   :  { %3105 = vrot.lane.b32.xlu1 %v3953_v33, %s4060_s3 }
0x2b07   :  { %v3955_v41 = vpop.eup %3954 }
0x2b08   :  { %3122 = vrot.lane.b32.xlu0 %v3955_v41, %s4060_s3 }
0x2b78   :  { %v3106_v45 = vpop.permute.xlu1 %3105 }
0x2b79   :  { %v3108_v46 = vmul.f32 %v3949_v19, %v3106_v45 }
0x2b7a   :  { %v3123_v62 = vpop.permute.xlu0 %3122 }
0x2b7b   :  { %3127 = vrot.lane.b32.xlu1 %v3108_v46, %s4061_s21  ;;  %v3125_v4 = vmul.f32 %v3951_v60, %v3123_v62 }
0x2b7d   :  { %3132 = vrot.lane.b32.xlu0 %v3125_v4, %s4062_s22 }
0x2bed   :  { %v3128_v9 = vpop.permute.xlu1 %3127 }
0x2bee   :  { %3130 = vst.msk [vmem:[#allocation2 + $0x38] sm:$0xff] %vm872_vm0, %v3128_v9 }
0x2bef   :  { %v3133_v2 = vpop.permute.xlu0 %3132 }
0x2bf0   :  { %3135 = vst.msk [vmem:[#allocation2] sm:$0xff] %vm878_vm1, %v3133_v2 }
0x2bf5   :  { %v3143_v25 = vld [vmem:[#allocation2 + $0x38] sm:$0xff] }
0x2bf7   :  { %v3136_v15 = vld [vmem:[#allocation2] sm:$0xff] }
0x2bf8   :  { %3557 = vmatprep.mubr.msk.f32.mxu0 %vm741_vm2, %v3136_v15 }
0x2bf9   :  { %3558 = vmatmul.mubr.msk.f32.vlgmr.msra.gmra.mxu0 %vm741_vm2, %v3137_v20 }
0x2bfa   :  { %3560 = vmatprep.mubr.msk.f32.mxu0 %vm741_vm2, %v3138_v21 }
0x2bfd   :  { %3561 = vmatmul.mubr.msk.f32.gmra.mxu0 %vm741_vm2, %v3139_v6 }
0x2bfe   :  { %3563 = vmatprep.mubr.msk.f32.mxu0 %vm741_vm2, %v3140_v38 }
0x2c01   :  { %3564 = vmatmul.mubr.msk.f32.gmra.mxu0 %vm741_vm2, %v3141_v43 }
0x2c02   :  { %3566 = vmatprep.mubr.msk.f32.mxu0 %vm741_vm2, %v3142_v22 }
0x2c05   :  { %3567 = vmatmul.mubr.msk.f32.gmra.mxu0 %vm741_vm2, %v3143_v25 }
0x2cb9   :  { %v3559_v28 = vpop.f32.mrf.mxu0 }
0x2cba   :  { %v3255_v59 = vadd.f32 %v3559_v28, %v3516_v30 }
0x2cbb   :  { %v3249_v29 = vpop.f32.mrf.mxu0 }
0x2cbc   :  { %v3250_v63 = vadd.f32 %v3516_v30, %v3249_v29  ;;  %3290 = vmax.xlane.f32.xlu1 %v3255_v59 }
0x2cbd   :  { %v3562_v42 = vpop.f32.mrf.mxu0 }
0x2cbe   :  { %3288 = vmax.xlane.f32.xlu0 %v3250_v63  ;;  %v3265_v27 = vadd.f32 %v3562_v42, %v3516_v30 }
0x2cbf   :  { %v3259_v56 = vpop.f32.mrf.mxu0 }
0x2cc0   :  { %v3260_v53 = vadd.f32 %v3516_v30, %v3259_v56 }
0x2cc1   :  { %v3565_v7 = vpop.f32.mrf.mxu0 }
0x2cc2   :  { %3294 = vmax.xlane.f32.xlu0 %v3265_v27  ;;  %v3275_v14 = vadd.f32 %v3565_v7, %v3516_v30 }
0x2cc3   :  { %v3269_v61 = vpop.f32.mrf.mxu0 }
0x2cc4   :  { %v3270_v23 = vadd.f32 %v3516_v30, %v3269_v61 }
0x2cc5   :  { %v3568_v32 = vpop.f32.mrf.mxu0 }
0x2cc6   :  { %3296 = vmax.xlane.f32.xlu1 %v3270_v23  ;;  %3292 = vmax.xlane.f32.xlu0 %v3260_v53  ;;  %v3285_v31 = vadd.f32 %v3568_v32, %v3516_v30 }
0x2cc7   :  { %v3279_v24 = vpop.f32.mrf.mxu0 }
0x2cc8   :  { %v3280_v36 = vadd.f32 %v3516_v30, %v3279_v24 }
0x2cca   :  { %3300 = vmax.xlane.f32.xlu1 %v3280_v36  ;;  %3298 = vmax.xlane.f32.xlu0 %v3275_v14 }
0x2cce   :  { %3302 = vmax.xlane.f32.xlu0 %v3285_v31 }
0x2d45   :  { %v3291_v54 = vpop.xlane.xlu1 %3290 }
0x2d46   :  { %v5042_v55 = vsub.f32 %v3255_v59, %v3291_v54 }
0x2d47   :  { %v3289_v48 = vpop.xlane.xlu0 %3288 }
0x2d48   :  { %v3314_v49 = vmul.f32 1.442695, %v5042_v55  ;;  %v5045_v50 = vsub.f32 %v3250_v63, %v3289_v48 }
0x2d4a   :  { %3956 = vpow2.f32 %v3314_v49  ;;  %v3312_v52 = vmul.f32 1.442695, %v5045_v50 }
0x2d4b   :  { %v3295_v5 = vpop.xlane.xlu0 %3294 }
0x2d4c   :  { %3958 = vpow2.f32 %v3312_v52  ;;  %v5048_v8 = vsub.f32 %v3265_v27, %v3295_v5 }
0x2d4e   :  { %v3318_v10 = vmul.f32 1.442695, %v5048_v8 }
0x2d4f   :  { %v3297_v12 = vpop.xlane.xlu1 %3296  ;;  %v3293_v18 = vpop.xlane.xlu0 %3292 }
0x2d50   :  { %3960 = vpow2.f32 %v3318_v10  ;;  %v5051_v19 = vsub.f32 %v3270_v23, %v3297_v12  ;;  %v5053_v34 = vsub.f32 %v3260_v53, %v3293_v18 }
0x2d52   :  { %v3316_v58 = vmul.f32 1.442695, %v5053_v34  ;;  %v3320_v11 = vmul.f32 1.442695, %v5051_v19 }
0x2d53   :  { %v3301_v60 = vpop.xlane.xlu1 %3300  ;;  %v3299_v3 = vpop.xlane.xlu0 %3298 }
0x2d54   :  { %v5057_v47 = vsub.f32 %v3275_v14, %v3299_v3  ;;  %3962 = vpow2.f32 %v3316_v58  ;;  %v5059_v1 = vsub.f32 %v3280_v36, %v3301_v60 }
0x2d55   :  { %3964 = vpow2.f32 %v3320_v11 }
0x2d56   :  { %v3322_v57 = vmul.f32 1.442695, %v5057_v47  ;;  %v3324_v37 = vmul.f32 1.442695, %v5059_v1 }
0x2d57   :  { %v3957_v13 = vpop.eup %3956  ;;  %v3303_v16 = vpop.xlane.xlu0 %3302 }
0x2d58   :  { %v5062_v39 = vsub.f32 %v3285_v31, %v3303_v16  ;;  %3330 = vadd.xlane.f32.xlu0 %v3957_v13  ;;  %3966 = vpow2.f32 %v3322_v57 }
0x2d59   :  { %v3959_v26 = vpop.eup %3958 }
0x2d5a   :  { %v3326_v0 = vmul.f32 1.442695, %v5062_v39  ;;  %3328 = vadd.xlane.f32.xlu1 %v3959_v26 }
0x2d5c   :  { %3968 = vpow2.f32 %v3326_v0 }
0x2d5d   :  { %v3961_v33 = vpop.eup %3960  ;;  %3970 = vpow2.f32 %v3324_v37 }
0x2d5e   :  { %3334 = vadd.xlane.f32.xlu0 %v3961_v33 }
0x2d61   :  { %v3963_v41 = vpop.eup %3962 }
0x2d62   :  { %3332 = vadd.xlane.f32.xlu1 %v3963_v41  ;;  %v3965_v40 = vpop.eup %3964 }
0x2d65   :  { %v3967_v17 = vpop.eup %3966 }
0x2d66   :  { %3336 = vadd.xlane.f32.xlu1 %v3965_v40  ;;  %3338 = vadd.xlane.f32.xlu0 %v3967_v17 }
0x2d69   :  { %v3969_v44 = vpop.eup %3968 }
0x2d6a   :  { %v3971_v51 = vpop.eup %3970  ;;  %3342 = vadd.xlane.f32.xlu0 %v3969_v44 }
0x2d6b   :  { %3340 = vadd.xlane.f32.xlu1 %v3971_v51 }
0x2de1   :  { %v3331_v35 = vpop.xlane.xlu0 %3330 }
0x2de2   :  { %3972 = vlog2.f32 %v3331_v35 }
0x2de3   :  { %v3329_v45 = vpop.xlane.xlu1 %3328 }
0x2de4   :  { %3974 = vlog2.f32 %v3329_v45 }
0x2de7   :  { %v3335_v46 = vpop.xlane.xlu0 %3334 }
0x2de8   :  { %3976 = vlog2.f32 %v3335_v46 }
0x2deb   :  { %v3333_v62 = vpop.xlane.xlu1 %3332 }
0x2dec   :  { %3978 = vlog2.f32 %v3333_v62 }
0x2def   :  { %v3973_v4 = vpop.eup %3972  ;;  %v3337_v2 = vpop.xlane.xlu1 %3336 }
0x2df0   :  { %v3347_v9 = vmul.f32 0.6931472, %v3973_v4  ;;  %v3339_v15 = vpop.xlane.xlu0 %3338  ;;  %3980 = vlog2.f32 %v3337_v2 }
0x2df1   :  { %v3975_v20 = vpop.eup %3974  ;;  %3982 = vlog2.f32 %v3339_v15 }
0x2df2   :  { %v3361_v21 = vsub.f32 %v5042_v55, %v3347_v9  ;;  %v3345_v6 = vmul.f32 0.6931472, %v3975_v20 }
0x2df4   :  { %3369 = vst [vmem:[%s5107_s9 + $0x8] sm:$0xff] %v3361_v21  ;;  %v3360_v38 = vsub.f32 %v5045_v50, %v3345_v6  ;;  %v3341_v43 = vpop.xlane.xlu1 %3340  ;;  %v3343_v22 = vpop.xlane.xlu0 %3342 }
0x2df5   :  { %v3977_v25 = vpop.eup %3976  ;;  %3984 = vlog2.f32 %v3341_v43 }
0x2df6   :  { %3368 = vst [vmem:[%s5107_s9] sm:$0xff] %v3360_v38  ;;  %v3351_v30 = vmul.f32 0.6931472, %v3977_v25  ;;  %3986 = vlog2.f32 %v3343_v22 }
0x2df8   :  { %v3363_v28 = vsub.f32 %v5048_v8, %v3351_v30 }
0x2df9   :  { %v3979_v59 = vpop.eup %3978 }
0x2dfa   :  { %3371 = vst [vmem:[%s5107_s9 + $0x18] sm:$0xff] %v3363_v28  ;;  %v3349_v29 = vmul.f32 0.6931472, %v3979_v59 }
0x2dfc   :  { %v3362_v63 = vsub.f32 %v5053_v34, %v3349_v29 }
0x2dfd   :  { %v3981_v42 = vpop.eup %3980 }
0x2dfe   :  { %v3983_v56 = vpop.eup %3982  ;;  %3370 = vst [vmem:[%s5107_s9 + $0x10] sm:$0xff] %v3362_v63  ;;  %v3353_v27 = vmul.f32 0.6931472, %v3981_v42 }
0x2dff   :  { %v3355_v7 = vmul.f32 0.6931472, %v3983_v56 }
0x2e00   :  { %v3364_v61 = vsub.f32 %v5051_v19, %v3353_v27 }
0x2e01   :  { %v3365_v23 = vsub.f32 %v5057_v47, %v3355_v7 }
0x2e02   :  { %v3985_v53 = vpop.eup %3984  ;;  %3372 = vst [vmem:[%s5107_s9 + $0x20] sm:$0xff] %v3364_v61 }
0x2e03   :  { %v3987_v32 = vpop.eup %3986  ;;  %v3357_v24 = vmul.f32 0.6931472, %v3985_v53  ;;  %3373 = vst [vmem:[%s5107_s9 + $0x28] sm:$0xff] %v3365_v23 }
0x2e04   :  { %v3359_v14 = vmul.f32 0.6931472, %v3987_v32 }
0x2e05   :  { %v3366_v36 = vsub.f32 %v5059_v1, %v3357_v24 }
0x2e06   :  { %v3367_v31 = vsub.f32 %v5062_v39, %v3359_v14 }
0x2e07   :  { %3374 = vst [vmem:[%s5107_s9 + $0x30] sm:$0xff] %v3366_v36 }
0x2e08   :  { %3375 = vst [vmem:[%s5107_s9 + $0x38] sm:$0xff] %v3367_v31 }
0x2e09   :  { %3380 = vsyncpa [#allocation5], 1 }
0x2e0a   :  { %3381 = vsyncpa [#allocation7], 1 }

</bundles_post_ra>
